<compile_context>
chip_gen: v6e
topology: v6e:2x2x1
jax: 0.10.0
libtpu: 0.0.40
codegen_flags: <defaults>
</compile_context>

<pallas_src>
import functools
import math

import jax
import jax.numpy as jnp
from jax.experimental import pallas as pl
from jax.experimental.pallas import tpu as pltpu


# --------------------------- generation-aware tiling -------------------------------

def _tpu_vmem_capacity():
    try:
        info = pltpu.get_tpu_info()
        return int(getattr(info, "vmem_capacity_bytes", 64 << 20))
    except Exception:   # interpret mode / API drift -> conservative (v7x) defaults
        return 64 << 20


_VMEM_PHYS = _tpu_vmem_capacity()
if _VMEM_PHYS >= (100 << 20):          # v5e / v6e: 128 MiB physical VMEM
    _TM_TARGET, _TN_TARGET, _TK_TARGET = 512, 512, 512
else:                                   # v7x: 64 MiB physical VMEM
    _TM_TARGET, _TN_TARGET, _TK_TARGET = 256, 256, 512

# per-kernel scoped-VMEM ceiling: never above ~half the physical VMEM, never above 40 MiB
_VMEM_CEIL = min(40 << 20, max(16 << 20, _VMEM_PHYS // 2))


def _bytes(shape, dtype):
    n = 1
    for s in shape:
        n *= int(s)
    return n * jnp.dtype(dtype).itemsize


def _vmem_limit(*block_bytes):
    """Double-buffered block footprint + headroom, clamped for the current chip."""
    need = 2 * sum(block_bytes) + (4 << 20)
    return int(min(max(need, 16 << 20), _VMEM_CEIL))


def _fit_tile(dim, target, align):
    """Largest `align`-multiple tile <= target that divides dim; full dim otherwise."""
    if dim <= target:
        return dim
    t = (min(target, dim) // align) * align
    while t >= align:
        if dim % t == 0:
            return t
        t -= align
    return dim   # full-extent block is always legal (may be large; guarded by callers)


def _row_tile(M, target):
    """Row tile capped near M/2 so a lone 'parallel' axis has >= 2 blocks (megacore)."""
    if M < 16:
        return _fit_tile(M, target, 8)
    capped = min(target, max(8, (M // 2) // 8 * 8))
    return _fit_tile(M, capped, 8)


def _apply_act(y, act):
    if act == "gelu":
        # tanh GELU approximation (PyTorch nn.GELU default is erf-exact; small drift)
        return jax.nn.gelu(y, approximate=True)
    if act == "relu":
        return jnp.maximum(y, 0.0)
    if act == "silu":
        return y * jax.nn.sigmoid(y)
    return y


def _layernorm(y, g, b, eps=1e-5):
    mean = jnp.mean(y, axis=-1, keepdims=True)
    var = jnp.mean(jnp.square(y - mean), axis=-1, keepdims=True)
    return (y - mean) * jax.lax.rsqrt(var + eps) * g + b


# ----------------------------- Pallas kernels --------------------------------------

def _tiled_linear_kernel(x_ref, w_ref, b_ref, o_ref, acc_ref, *, act):
    k = pl.program_id(2)

    @pl.when(k == 0)
    def _():
        # init accumulator with the broadcast bias (saves a VPU pass in the epilogue)
        acc_ref[...] = jnp.broadcast_to(b_ref[...], acc_ref.shape)

    acc_ref[...] += jnp.dot(x_ref[...], w_ref[...], preferred_element_type=jnp.float32)

    @pl.when(k == pl.num_programs(2) - 1)
    def _():
        o_ref[...] = _apply_act(acc_ref[...], act).astype(o_ref.dtype)


def pallas_linear(x, w, b, act="none", out_dtype=jnp.bfloat16):
    """x:(M,K) @ w:(K,N) + b -> (M,N) (bf16 by default). Tiled/pipelined matmul."""
    M, K = x.shape
    N = w.shape[1]
    if not (M >= 8 and M % 8 == 0 and N >= 128 and N % 128 == 0):
        y = _apply_act(x.astype(jnp.float32) @ w.astype(jnp.float32)
                       + b.astype(jnp.float32), act)
        return y.astype(out_dtype)
    x = x.astype(jnp.bfloat16)
    w = w.astype(jnp.bfloat16)
    b = b.astype(jnp.float32).reshape(1, N)
    tm = _fit_tile(M, _TM_TARGET, 8)
    tn = _fit_tile(N, _TN_TARGET, 128)
    tk = _fit_tile(K, _TK_TARGET, 128)
    grid = (M // tm, N // tn, K // tk)
    vlim = _vmem_limit(_bytes((tm, tk), jnp.bfloat16), _bytes((tk, tn), jnp.bfloat16),
                       _bytes((tm, tn), out_dtype), _bytes((tm, tn), jnp.float32))
    return pl.pallas_call(
        functools.partial(_tiled_linear_kernel, act=act),
        out_shape=jax.ShapeDtypeStruct((M, N), out_dtype),
        grid=grid,
        in_specs=[pl.BlockSpec((tm, tk), lambda i, j, k: (i, k)),
                  pl.BlockSpec((tk, tn), lambda i, j, k: (k, j)),
                  pl.BlockSpec((1, tn), lambda i, j, k: (0, j))],
        out_specs=pl.BlockSpec((tm, tn), lambda i, j, k: (i, j)),
        scratch_shapes=[pltpu.VMEM((tm, tn), jnp.float32)],
        compiler_params=pltpu.CompilerParams(
            dimension_semantics=("parallel", "parallel", "arbitrary"),
            vmem_limit_bytes=vlim),
    )(x, w, b)


def _linear_res_ln_kernel(x_ref, w_ref, b_ref, res_ref, g_ref, bt_ref,
                          o_ref, acc_ref, *, eps):
    """o = LayerNorm((x @ w + b) + res); LN over the full feature (lane) axis."""
    k = pl.program_id(1)

    @pl.when(k == 0)
    def _():
        acc_ref[...] = jnp.broadcast_to(b_ref[...], acc_ref.shape)

    acc_ref[...] += jnp.dot(x_ref[...], w_ref[...], preferred_element_type=jnp.float32)

    @pl.when(k == pl.num_programs(1) - 1)
    def _():
        y = acc_ref[...] + res_ref[...].astype(jnp.float32)
        mean = jnp.mean(y, axis=-1, keepdims=True)
        var = jnp.mean(jnp.square(y - mean), axis=-1, keepdims=True)
        o_ref[...] = ((y - mean) * jax.lax.rsqrt(var + eps) * g_ref[...]
                      + bt_ref[...]).astype(o_ref.dtype)


def pallas_linear_residual_ln(x, w, b, res, gamma, beta, eps=1e-5,
                              out_dtype=jnp.bfloat16):
    M, K = x.shape
    N = w.shape[1]
    if not (M >= 8 and M % 8 == 0 and N >= 128 and N % 128 == 0):
        y = (x.astype(jnp.float32) @ w.astype(jnp.float32) + b.astype(jnp.float32)
             + res.astype(jnp.float32))
        return _layernorm(y, gamma, beta, eps).astype(out_dtype)
    x = x.astype(jnp.bfloat16)
    w = w.astype(jnp.bfloat16)
    res = res.astype(jnp.bfloat16)
    tm = _row_tile(M, _TM_TARGET)
    tk = _fit_tile(K, _TK_TARGET, 128)
    grid = (M // tm, K // tk)
    vlim = _vmem_limit(_bytes((tm, tk), jnp.bfloat16), _bytes((tk, N), jnp.bfloat16),
                       _bytes((tm, N), jnp.bfloat16), _bytes((tm, N), out_dtype),
                       _bytes((tm, N), jnp.float32))
    return pl.pallas_call(
        functools.partial(_linear_res_ln_kernel, eps=eps),
        out_shape=jax.ShapeDtypeStruct((M, N), out_dtype),
        grid=grid,
        in_specs=[pl.BlockSpec((tm, tk), lambda i, k: (i, k)),
                  pl.BlockSpec((tk, N), lambda i, k: (k, 0)),
                  pl.BlockSpec((1, N), lambda i, k: (0, 0)),
                  pl.BlockSpec((tm, N), lambda i, k: (i, 0)),
                  pl.BlockSpec((1, N), lambda i, k: (0, 0)),
                  pl.BlockSpec((1, N), lambda i, k: (0, 0))],
        out_specs=pl.BlockSpec((tm, N), lambda i, k: (i, 0)),
        scratch_shapes=[pltpu.VMEM((tm, N), jnp.float32)],
        compiler_params=pltpu.CompilerParams(
            dimension_semantics=("parallel", "arbitrary"),
            vmem_limit_bytes=vlim),
    )(x, w, b.astype(jnp.float32).reshape(1, N), res,
      gamma.reshape(1, N), beta.reshape(1, N))


def _ffn_res_ln_kernel(x_ref, w1_ref, b1_ref, w2_ref, b2_ref, g_ref, bt_ref,
                       o_ref, acc_ref, *, act, eps):
    """o = LayerNorm(x + ff2(act(ff1(x)))); the ff intermediate never leaves VMEM."""
    f = pl.program_id(1)

    @pl.when(f == 0)
    def _():
        acc_ref[...] = jnp.broadcast_to(b2_ref[...], acc_ref.shape)

    h = jnp.dot(x_ref[...], w1_ref[...], preferred_element_type=jnp.float32) + b1_ref[...]
    h = _apply_act(h.astype(jnp.bfloat16), act)       # bf16 VPU/EUP activation
    acc_ref[...] += jnp.dot(h, w2_ref[...], preferred_element_type=jnp.float32)

    @pl.when(f == pl.num_programs(1) - 1)
    def _():
        y = acc_ref[...] + x_ref[...].astype(jnp.float32)    # residual = FFN input
        mean = jnp.mean(y, axis=-1, keepdims=True)
        var = jnp.mean(jnp.square(y - mean), axis=-1, keepdims=True)
        o_ref[...] = ((y - mean) * jax.lax.rsqrt(var + eps) * g_ref[...]
                      + bt_ref[...]).astype(o_ref.dtype)


def pallas_ffn_residual_ln(x, w1, b1, w2, b2, gamma, beta, act, eps=1e-5,
                           out_dtype=jnp.bfloat16):
    M, D = x.shape
    F = w1.shape[1]
    if not (M >= 8 and M % 8 == 0 and D >= 128 and D % 128 == 0):
        xf = x.astype(jnp.float32)
        h = _apply_act(xf @ w1.astype(jnp.float32) + b1.astype(jnp.float32), act)
        y = h @ w2.astype(jnp.float32) + b2.astype(jnp.float32) + xf
        return _layernorm(y, gamma, beta, eps).astype(out_dtype)
    x = x.astype(jnp.bfloat16)
    w1 = w1.astype(jnp.bfloat16)
    w2 = w2.astype(jnp.bfloat16)
    tm = _row_tile(M, _TM_TARGET)
    tf = _fit_tile(F, _TK_TARGET, 128)
    grid = (M // tm, F // tf)
    vlim = _vmem_limit(_bytes((tm, D), jnp.bfloat16), _bytes((D, tf), jnp.bfloat16),
                       _bytes((tf, D), jnp.bfloat16), _bytes((tm, D), out_dtype),
                       _bytes((tm, D), jnp.float32))
    return pl.pallas_call(
        functools.partial(_ffn_res_ln_kernel, act=act, eps=eps),
        out_shape=jax.ShapeDtypeStruct((M, D), out_dtype),
        grid=grid,
        in_specs=[pl.BlockSpec((tm, D), lambda i, f: (i, 0)),
                  pl.BlockSpec((D, tf), lambda i, f: (0, f)),
                  pl.BlockSpec((1, tf), lambda i, f: (0, f)),
                  pl.BlockSpec((tf, D), lambda i, f: (f, 0)),
                  pl.BlockSpec((1, D), lambda i, f: (0, 0)),
                  pl.BlockSpec((1, D), lambda i, f: (0, 0)),
                  pl.BlockSpec((1, D), lambda i, f: (0, 0))],
        out_specs=pl.BlockSpec((tm, D), lambda i, f: (i, 0)),
        scratch_shapes=[pltpu.VMEM((tm, D), jnp.float32)],
        compiler_params=pltpu.CompilerParams(
            dimension_semantics=("parallel", "arbitrary"),
            vmem_limit_bytes=vlim),
    )(x, w1, b1.astype(jnp.float32).reshape(1, F), w2,
      b2.astype(jnp.float32).reshape(1, D), gamma.reshape(1, D), beta.reshape(1, D))


def _mlp_head_kernel(x_ref, w1_ref, b1_ref, w2_ref, b2_ref, o_ref, acc_ref, *, act):
    """o = act(x @ w1 + b1) @ w2 + b2 ; hidden stays in VMEM (chunked over hidden)."""
    f = pl.program_id(1)

    @pl.when(f == 0)
    def _():
        acc_ref[...] = jnp.broadcast_to(b2_ref[...], acc_ref.shape)

    h = jnp.dot(x_ref[...], w1_ref[...], preferred_element_type=jnp.float32) + b1_ref[...]
    h = _apply_act(h.astype(jnp.bfloat16), act)
    acc_ref[...] += jnp.dot(h, w2_ref[...], preferred_element_type=jnp.float32)

    @pl.when(f == pl.num_programs(1) - 1)
    def _():
        o_ref[...] = acc_ref[...].astype(o_ref.dtype)


def pallas_mlp_head(x, w1, b1, w2, b2, act="gelu"):
    """Final output head. The narrow output dim is padded to 128 lanes for dense stores."""
    M, D = x.shape
    F = w1.shape[1]
    P = w2.shape[1]
    if not (M >= 8 and M % 8 == 0 and D >= 128 and D % 128 == 0 and F % 128 == 0):
        h = _apply_act(x.astype(jnp.float32) @ w1.astype(jnp.float32)
                       + b1.astype(jnp.float32), act)
        return h @ w2.astype(jnp.float32) + b2.astype(jnp.float32)
    Pp = ((P + 127) // 128) * 128
    w2p = jnp.pad(w2.astype(jnp.float32), ((0, 0), (0, Pp - P))) if Pp != P else w2
    b2p = jnp.pad(b2.astype(jnp.float32), (0, Pp - P)) if Pp != P else b2
    x = x.astype(jnp.bfloat16)
    w1 = w1.astype(jnp.bfloat16)
    w2p = w2p.astype(jnp.bfloat16)
    tm = _row_tile(M, _TM_TARGET)
    tf = _fit_tile(F, _TK_TARGET, 128)
    grid = (M // tm, F // tf)
    vlim = _vmem_limit(_bytes((tm, D), jnp.bfloat16), _bytes((D, tf), jnp.bfloat16),
                       _bytes((tf, Pp), jnp.bfloat16), _bytes((tm, Pp), jnp.float32),
                       _bytes((tm, Pp), jnp.float32))
    out = pl.pallas_call(
        functools.partial(_mlp_head_kernel, act=act),
        out_shape=jax.ShapeDtypeStruct((M, Pp), jnp.float32),
        grid=grid,
        in_specs=[pl.BlockSpec((tm, D), lambda i, f: (i, 0)),
                  pl.BlockSpec((D, tf), lambda i, f: (0, f)),
                  pl.BlockSpec((1, tf), lambda i, f: (0, f)),
                  pl.BlockSpec((tf, Pp), lambda i, f: (f, 0)),
                  pl.BlockSpec((1, Pp), lambda i, f: (0, 0))],
        out_specs=pl.BlockSpec((tm, Pp), lambda i, f: (i, 0)),
        scratch_shapes=[pltpu.VMEM((tm, Pp), jnp.float32)],
        compiler_params=pltpu.CompilerParams(
            dimension_semantics=("parallel", "arbitrary"),
            vmem_limit_bytes=vlim),
    )(x, w1, b1.astype(jnp.float32).reshape(1, F), w2p,
      b2p.astype(jnp.float32).reshape(1, Pp))
    return out[:, :P]


def _flash_mha_kernel(q_ref, k_ref, v_ref, o_ref, m_sc, l_sc, acc_sc, *, scale):
    """Flash-style attention: one (q-tile, kv-tile) step with online softmax."""
    kv = pl.program_id(2)

    @pl.when(kv == 0)
    def _():
        m_sc[...] = jnp.full_like(m_sc, -jnp.inf)
        l_sc[...] = jnp.zeros_like(l_sc)
        acc_sc[...] = jnp.zeros_like(acc_sc)

    s = jax.lax.dot_general(q_ref[...], k_ref[...], (((1,), (1,)), ((), ())),
                            preferred_element_type=jnp.float32) * scale
    m_prev = m_sc[...]
    m_new = jnp.maximum(m_prev, jnp.max(s, axis=-1, keepdims=True))
    alpha = jnp.exp(m_prev - m_new)
    p = jnp.exp(s - m_new)
    l_sc[...] = alpha * l_sc[...] + jnp.sum(p, axis=-1, keepdims=True)
    acc_sc[...] = alpha * acc_sc[...] + jnp.dot(p.astype(jnp.bfloat16), v_ref[...],
                                                preferred_element_type=jnp.float32)
    m_sc[...] = m_new

    @pl.when(kv == pl.num_programs(2) - 1)
    def _():
        o_ref[...] = (acc_sc[...] *
                      pl.reciprocal(l_sc[...], approx=True)).astype(o_ref.dtype)


def pallas_flash_mha(q, k, v, *, scale):
    """q,k,v: (B*H, S, dh) -> (B*H, S, dh); heads/batch and q-tiles on the grid."""
    BH, S, dh = q.shape
    if not (S >= 8 and S % 8 == 0):
        s = jnp.einsum("bqd,bkd->bqk", q.astype(jnp.float32),
                       k.astype(jnp.float32)) * scale
        p = jax.nn.softmax(s, axis=-1)
        return jnp.einsum("bqk,bkd->bqd", p, v.astype(jnp.float32)).astype(jnp.bfloat16)
    q = q.astype(jnp.bfloat16)
    k = k.astype(jnp.bfloat16)
    v = v.astype(jnp.bfloat16)
    tq = _fit_tile(S, max(128, _TM_TARGET // 2), 8)
    tk = _fit_tile(S, _TK_TARGET, 128)
    grid = (BH, S // tq, S // tk)
    vlim = _vmem_limit(_bytes((tq, dh), jnp.bfloat16), 2 * _bytes((tk, dh), jnp.bfloat16),
                       _bytes((tq, dh), jnp.bfloat16), _bytes((tq, dh), jnp.float32))
    return pl.pallas_call(
        functools.partial(_flash_mha_kernel, scale=scale),
        out_shape=jax.ShapeDtypeStruct((BH, S, dh), jnp.bfloat16),
        grid=grid,
        in_specs=[pl.BlockSpec((None, tq, dh), lambda b, i, j: (b, i, 0)),
                  pl.BlockSpec((None, tk, dh), lambda b, i, j: (b, j, 0)),
                  pl.BlockSpec((None, tk, dh), lambda b, i, j: (b, j, 0))],
        out_specs=pl.BlockSpec((None, tq, dh), lambda b, i, j: (b, i, 0)),
        scratch_shapes=[pltpu.VMEM((tq, 1), jnp.float32),
                        pltpu.VMEM((tq, 1), jnp.float32),
                        pltpu.VMEM((tq, dh), jnp.float32)],
        compiler_params=pltpu.CompilerParams(
            dimension_semantics=("parallel", "parallel", "arbitrary"),
            vmem_limit_bytes=vlim),
    )(q, k, v)


# --------------------------- composed blocks (glue) --------------------------------

def encoder_layer(x, p, num_heads, act):
    """nn.TransformerEncoderLayer (batch_first, post-LN, eval/no-dropout), fused path."""
    B, S, D = x.shape
    dh = D // num_heads
    x2d = x.reshape(B * S, D).astype(jnp.bfloat16)
    # fused QKV projection (one matmul) -> re-layout to per-head contiguous (B*H, S, dh)
    qkv = pallas_linear(x2d, p["attn"]["wqkv"], p["attn"]["bqkv"])          # (B*S, 3D) bf16
    qkv = qkv.reshape(B, S, 3, num_heads, dh).transpose(2, 0, 3, 1, 4)      # (3,B,H,S,dh)
    q = qkv[0].reshape(B * num_heads, S, dh)
    k = qkv[1].reshape(B * num_heads, S, dh)
    v = qkv[2].reshape(B * num_heads, S, dh)
    attn = pallas_flash_mha(q, k, v, scale=1.0 / math.sqrt(dh))             # (B*H, S, dh)
    attn = attn.reshape(B, num_heads, S, dh).transpose(0, 2, 1, 3).reshape(B * S, D)
    # out-projection + residual + LayerNorm1 fused
    x1 = pallas_linear_residual_ln(attn, p["attn"]["wo"], p["attn"]["bo"],
                                   x2d, p["ln1_g"], p["ln1_b"])
    # FFN + residual + LayerNorm2 fused (ff intermediate stays in VMEM)
    y = pallas_ffn_residual_ln(x1, p["ff1_w"], p["ff1_b"], p["ff2_w"], p["ff2_b"],
                               p["ln2_g"], p["ln2_b"], act=act)
    return y.reshape(B, S, D)


# -------------------- conditioning micro-path (plain XLA, B~2 rows) ----------------

def _mlp2(x, w1, b1, w2, b2, act):
    h = x @ w1 + b1
    if act == "gelu":
        h = jax.nn.gelu(h, approximate=True)
    elif act == "silu":
        h = jax.nn.silu(h)
    return h @ w2 + b2


def _jnp_mha_len1(q, k, v, p, num_heads):
    """nn.MultiheadAttention with query/key/value of sequence length 1 (batch_first)."""
    B, D = q.shape
    dh = D // num_heads
    qp = (q @ p["wq"] + p["bq"]).reshape(B, num_heads, dh)
    kp = (k @ p["wk"] + p["bk"]).reshape(B, num_heads, dh)
    vp = (v @ p["wv"] + p["bv"]).reshape(B, num_heads, dh)
    s = jnp.sum(qp * kp, axis=-1, keepdims=True) / math.sqrt(dh)
    attn = jax.nn.softmax(s, axis=-1)                  # softmax over a single key == 1
    out = (attn * vp).reshape(B, D)
    return out @ p["wo"] + p["bo"]


# ----------------------------- embeddings (glue) -----------------------------------

def timestep_embedding(t, dim, max_period=10000.0):
    half = dim // 2
    freqs = jnp.exp(-math.log(max_period) * jnp.arange(half, dtype=jnp.float32) / half)
    args = t.astype(jnp.float32)[:, None] * freqs[None, :]
    return jnp.concatenate([jnp.cos(args), jnp.sin(args)], axis=-1)


def _get_1d_sincos(embed_dim, pos):
    omega = jnp.arange(embed_dim // 2, dtype=jnp.float32) / (embed_dim / 2.0)
    omega = 1.0 / (10000.0 ** omega)
    out = pos.reshape(-1)[:, None] * omega[None, :]
    return jnp.concatenate([jnp.sin(out), jnp.cos(out)], axis=1)


def get_2d_sincos_pos_embed(embed_dim, gh, gw):
    grid_h = jnp.arange(gh, dtype=jnp.float32)
    grid_w = jnp.arange(gw, dtype=jnp.float32)
    gw_mesh, gh_mesh = jnp.meshgrid(grid_w, grid_h)
    emb_h = _get_1d_sincos(embed_dim // 2, gw_mesh)
    emb_w = _get_1d_sincos(embed_dim // 2, gh_mesh)
    return jnp.concatenate([emb_h, emb_w], axis=1)          # (gh*gw, embed_dim)


# ----------------------------- parameter init --------------------------------------

def _dense(key, fan_in, fan_out, w_dtype=jnp.float32):
    kw, kb = jax.random.split(key)
    w = (jax.random.normal(kw, (fan_in, fan_out), jnp.float32) * 0.02).astype(w_dtype)
    b = jax.random.normal(kb, (fan_out,), jnp.float32) * 0.01
    return w, b


def _mha_params(key, d):
    ks = jax.random.split(key, 4)
    wq, bq = _dense(ks[0], d, d)
    wk, bk = _dense(ks[1], d, d)
    wv, bv = _dense(ks[2], d, d)
    wo, bo = _dense(ks[3], d, d)
    return dict(wq=wq, bq=bq, wk=wk, bk=bk, wv=wv, bv=bv, wo=wo, bo=bo)


def _mha_params_fused(key, d):
    ks = jax.random.split(key, 4)
    wq, bq = _dense(ks[0], d, d)
    wk, bk = _dense(ks[1], d, d)
    wv, bv = _dense(ks[2], d, d)
    wo, bo = _dense(ks[3], d, d)
    return dict(
        wqkv=jnp.concatenate([wq, wk, wv], axis=1).astype(jnp.bfloat16),
        bqkv=jnp.concatenate([bq, bk, bv], axis=0),
        wo=wo.astype(jnp.bfloat16), bo=bo)


def _encoder_layer_params(key, d, ff_dim):
    ks = jax.random.split(key, 3)
    ff1_w, ff1_b = _dense(ks[1], d, ff_dim, w_dtype=jnp.bfloat16)
    ff2_w, ff2_b = _dense(ks[2], ff_dim, d, w_dtype=jnp.bfloat16)
    return dict(
        attn=_mha_params_fused(ks[0], d),
        ff1_w=ff1_w, ff1_b=ff1_b, ff2_w=ff2_w, ff2_b=ff2_b,
        ln1_g=jnp.ones((d,), jnp.float32), ln1_b=jnp.zeros((d,), jnp.float32),
        ln2_g=jnp.ones((d,), jnp.float32), ln2_b=jnp.zeros((d,), jnp.float32),
    )


def init_microdit_params(key, *, in_channels, patch_size, embed_dim, num_layers,
                         num_heads, mlp_dim, caption_embed_dim, patch_mixer_layers,
                         time_freq_dim=256):
    ph, pw = patch_size
    keys = jax.random.split(key, 16)
    p = {}
    pe_w, pe_b = _dense(keys[0], in_channels * ph * pw, embed_dim)
    p["patch_embed_w"], p["patch_embed_b"] = pe_w.astype(jnp.bfloat16), pe_b
    p["time_mlp1_w"], p["time_mlp1_b"] = _dense(keys[1], time_freq_dim, embed_dim)
    p["time_mlp2_w"], p["time_mlp2_b"] = _dense(keys[2], embed_dim, embed_dim)
    p["cap1_w"], p["cap1_b"] = _dense(keys[3], caption_embed_dim, embed_dim)
    p["cap2_w"], p["cap2_b"] = _dense(keys[4], embed_dim, embed_dim)
    p["mha"] = _mha_params(keys[5], embed_dim)
    p["mlp1_w"], p["mlp1_b"] = _dense(keys[6], embed_dim, embed_dim)
    p["mlp2_w"], p["mlp2_b"] = _dense(keys[7], embed_dim, embed_dim)
    p["pool1_w"], p["pool1_b"] = _dense(keys[8], embed_dim, embed_dim)
    p["pool2_w"], p["pool2_b"] = _dense(keys[9], embed_dim, embed_dim)
    p["lin_w"], p["lin_b"] = _dense(keys[10], embed_dim, embed_dim)
    pm_keys = jax.random.split(keys[11], patch_mixer_layers)
    p["patch_mixer"] = [_encoder_layer_params(k, embed_dim, 2048) for k in pm_keys]  # PyTorch default ffn
    bb_keys = jax.random.split(keys[12], num_layers)
    p["backbone"] = []
    cond_ws, cond_bs = [], []
    for k in bb_keys:
        k1, k2 = jax.random.split(k)
        p["backbone"].append(_encoder_layer_params(k1, embed_dim, mlp_dim))
        cw, cb = _dense(k2, embed_dim, embed_dim)
        cond_ws.append(cw)
        cond_bs.append(cb)
    p["backbone_cond_w"] = jnp.concatenate(cond_ws, axis=1)     # (D, L*D), hoisted
    p["backbone_cond_b"] = jnp.concatenate(cond_bs, axis=0)     # (L*D,)
    o1_w, o1_b = _dense(keys[13], embed_dim, embed_dim)
    o2_w, o2_b = _dense(keys[14], embed_dim, ph * pw * in_channels)
    p["out1_w"], p["out1_b"] = o1_w.astype(jnp.bfloat16), o1_b
    p["out2_w"], p["out2_b"] = o2_w.astype(jnp.bfloat16), o2_b
    return p


# ------------------------------- forward pass ---------------------------------------

def microdit_forward(params, x, t, caption_embeddings, *, patch_size, embed_dim,
                     num_heads, time_freq_dim=256):
    B, C, H, W = x.shape
    ph, pw = patch_size
    gh, gw = H // ph, W // pw
    N = gh * gw
    D = embed_dim

    # PatchEmbed: Conv2d(k=patch, stride=patch) == linear over (C, ph, pw)-flat patches.
    patches = x.reshape(B, C, gh, ph, gw, pw).transpose(0, 2, 4, 1, 3, 5)
    patches = patches.reshape(B * N, C * ph * pw)
    tok = pallas_linear(patches, params["patch_embed_w"], params["patch_embed_b"],
                        out_dtype=jnp.float32).reshape(B, N, D)

    pos = get_2d_sincos_pos_embed(D, gh, gw)                 # (N, D)
    tok = tok + pos[None, :, :]

    # Conditioning micro-path: (B, D) with B~2 rows -> plain XLA (Pallas is overhead here).
    tfreq = timestep_embedding(t, time_freq_dim)
    t_emb = _mlp2(tfreq, params["time_mlp1_w"], params["time_mlp1_b"],
                  params["time_mlp2_w"], params["time_mlp2_b"], act="silu")   # (B, D)
    c_emb = _mlp2(caption_embeddings, params["cap1_w"], params["cap1_b"],
                  params["cap2_w"], params["cap2_b"], act="gelu")             # (B, D)
    mha_out = _jnp_mha_len1(t_emb, c_emb, c_emb, params["mha"], num_heads)    # (B, D)
    mlp_out = _mlp2(mha_out, params["mlp1_w"], params["mlp1_b"],
                    params["mlp2_w"], params["mlp2_b"], act="gelu")           # (B, D)
    # pool_mlp: AdaptiveAvgPool1d(1) over a length-1 axis is identity, then MLP
    pooled = jnp.mean(mlp_out[:, :, None], axis=2)
    pool_out = _mlp2(pooled, params["pool1_w"], params["pool1_b"],
                     params["pool2_w"], params["pool2_b"], act="gelu")
    pool_out = (pool_out + t_emb)[:, None, :]                                 # (B, 1, D)
    cond_signal = (mlp_out @ params["lin_w"] + params["lin_b"])[:, None, :]
    tok = tok + (cond_signal + pool_out)                                      # broadcast over N

    # PatchMixer: stack of nn.TransformerEncoderLayer (post-LN, relu, eval)
    for lp in params["patch_mixer"]:
        tok = encoder_layer(tok, lp, num_heads, act="relu")                   # bf16 out

    # mask is None -> no remove_masked_patches / add_masked_patches
    # TODO(synk): masking path (remove/add masked patches) not implemented (mask=None).
    tok = (tok.astype(jnp.float32) + (mlp_out[:, None, :] + pool_out)).astype(jnp.bfloat16)

    # TODO(synk): TransformerBackbone (MoE experts / exact conditioning) was not provided
    # in the source; approximated with dense transformer blocks conditioned by a stacked
    # projection of c_emb (all per-layer projections hoisted into one matmul).
    cprojs = c_emb @ params["backbone_cond_w"] + params["backbone_cond_b"]    # (B, L*D)
    for li, lp in enumerate(params["backbone"]):
        tok = tok + cprojs[:, li * D:(li + 1) * D][:, None, :].astype(jnp.bfloat16)
        tok = encoder_layer(tok, lp, num_heads, act="gelu")

    # output head: Linear -> GELU -> Linear fused in one kernel (lane-padded output)
    out = pallas_mlp_head(tok.reshape(B * N, D), params["out1_w"], params["out1_b"],
                          params["out2_w"], params["out2_b"], act="gelu")
    out = out.reshape(B, N, ph * pw * C)

    # unpatchify: (B, N, ph*pw*C) -> (B, C, H, W); patch vector ordered (ph, pw, C)
    img = out.reshape(B, gh, gw, ph, pw, C).transpose(0, 5, 1, 3, 2, 4).reshape(B, C, H, W)
    return img


# ----------------------------------- main -------------------------------------------

if __name__ == "__main__":
    key = jax.random.PRNGKey(0)
    kx, kt, kc, kp = jax.random.split(key, 4)

    # Small but lane-aligned shapes (embed_dim=128) so the Pallas path is exercised.
    B, C, H, W = 2, 4, 16, 16
    patch_size = (2, 2)
    embed_dim = 128
    num_layers = 2          # backbone layers
    num_heads = 4
    mlp_dim = 256
    caption_embed_dim = 64
    patch_mixer_layers = 2

    x = jax.random.normal(kx, (B, C, H, W), jnp.float32)
    t = jax.random.uniform(kt, (B,), jnp.float32) * 1000.0
    caption_embeddings = jax.random.normal(kc, (B, caption_embed_dim), jnp.float32)

    params = init_microdit_params(
        kp, in_channels=C, patch_size=patch_size, embed_dim=embed_dim,
        num_layers=num_layers, num_heads=num_heads, mlp_dim=mlp_dim,
        caption_embed_dim=caption_embed_dim, patch_mixer_layers=patch_mixer_layers)

    fwd = jax.jit(functools.partial(
        microdit_forward, patch_size=patch_size, embed_dim=embed_dim, num_heads=num_heads))

    out = fwd(params, x, t, caption_embeddings)
    out = jax.block_until_ready(out)
    assert out.shape == (B, C, H, W), out.shape
    assert bool(jnp.all(jnp.isfinite(out)))
    print("KERNEL_OK")
</pallas_src>

<mosaic_0001>
module attributes {stable_mosaic.version = 11 : i64} {
  func.func @_tiled_linear_kernel(%arg0: i32, %arg1: i32, %arg2: i32, %arg3: memref<128x16xbf16, #tpu.memory_space<vmem>>, %arg4: memref<16x128xbf16, #tpu.memory_space<vmem>>, %arg5: memref<1x128xf32, #tpu.memory_space<vmem>>, %arg6: memref<128x128xf32, #tpu.memory_space<vmem>>, %arg7: memref<128x128xf32, #tpu.memory_space<vmem>>) attributes {dimension_semantics = [#tpu.dimension_semantics<parallel>, #tpu.dimension_semantics<parallel>, #tpu.dimension_semantics<arbitrary>], iteration_bounds = array<i64: 1, 1, 1>, scalar_prefetch = 0 : i64, scratch_operands = 1 : i64, tpu.core_type = #tpu.core_type<tc>, window_params = [{transform_indices = @transform_0, window_bounds = array<i64: 128, 16>}, {transform_indices = @transform_1, window_bounds = array<i64: 16, 128>}, {transform_indices = @transform_2, window_bounds = array<i64: 1, 128>}, {transform_indices = @transform_3, window_bounds = array<i64: 128, 128>}]} {
    %c0_i32 = arith.constant 0 : i32
    %0 = arith.cmpi eq, %arg2, %c0_i32 : i32
    %1 = arith.extui %0 : i1 to i32
    %c0_i32_0 = arith.constant 0 : i32
    %2 = arith.cmpi ne, %1, %c0_i32_0 : i32
    scf.if %2 {
      %c0_10 = arith.constant 0 : index
      %c0_11 = arith.constant 0 : index
      %12 = vector.load %arg5[%c0_10, %c0_11] : memref<1x128xf32, #tpu.memory_space<vmem>>, vector<1x128xf32>
      %13 = vector.shape_cast %12 : vector<1x128xf32> to vector<1x128xf32>
      %14 = vector.broadcast %13 : vector<1x128xf32> to vector<128x128xf32>
      %c0_12 = arith.constant 0 : index
      %c0_13 = arith.constant 0 : index
      %15 = vector.load %arg7[%c0_12, %c0_13] : memref<128x128xf32, #tpu.memory_space<vmem>>, vector<128x128xf32>
      tpu.vector_store %arg7[%c0_12, %c0_13], %14 {strides = array<i32>} : memref<128x128xf32, #tpu.memory_space<vmem>>, vector<128x128xf32>,
    } else {
    }
    %c0 = arith.constant 0 : index
    %c0_1 = arith.constant 0 : index
    %3 = vector.load %arg7[%c0, %c0_1] : memref<128x128xf32, #tpu.memory_space<vmem>>, vector<128x128xf32>
    %c0_2 = arith.constant 0 : index
    %c0_3 = arith.constant 0 : index
    %4 = vector.load %arg3[%c0_2, %c0_3] : memref<128x16xbf16, #tpu.memory_space<vmem>>, vector<128x16xbf16>
    %c0_4 = arith.constant 0 : index
    %c0_5 = arith.constant 0 : index
    %5 = vector.load %arg4[%c0_4, %c0_5] : memref<16x128xbf16, #tpu.memory_space<vmem>>, vector<16x128xbf16>
    %cst = arith.constant dense<0.000000e+00> : vector<128x128xf32>
    %6 = tpu.matmul %4, %5, %cst {dimension_numbers = #tpu.dot_dimension_numbers<[1], [0], [0], [1], [0, 0, 1, 1], [], []>} : vector<128x16xbf16>, vector<16x128xbf16>, vector<128x128xf32> -> vector<128x128xf32>
    %7 = arith.addf %3, %6 : vector<128x128xf32>
    %c0_6 = arith.constant 0 : index
    %c0_7 = arith.constant 0 : index
    %8 = vector.load %arg7[%c0_6, %c0_7] : memref<128x128xf32, #tpu.memory_space<vmem>>, vector<128x128xf32>
    tpu.vector_store %arg7[%c0_6, %c0_7], %7 {strides = array<i32>} : memref<128x128xf32, #tpu.memory_space<vmem>>, vector<128x128xf32>,
    %c0_i32_8 = arith.constant 0 : i32
    %9 = arith.cmpi eq, %arg2, %c0_i32_8 : i32
    %10 = arith.extui %9 : i1 to i32
    %c0_i32_9 = arith.constant 0 : i32
    %11 = arith.cmpi ne, %10, %c0_i32_9 : i32
    scf.if %11 {
      %c0_10 = arith.constant 0 : index
      %c0_11 = arith.constant 0 : index
      %12 = vector.load %arg7[%c0_10, %c0_11] : memref<128x128xf32, #tpu.memory_space<vmem>>, vector<128x128xf32>
      %c0_12 = arith.constant 0 : index
      %c0_13 = arith.constant 0 : index
      %13 = vector.load %arg6[%c0_12, %c0_13] : memref<128x128xf32, #tpu.memory_space<vmem>>, vector<128x128xf32>
      tpu.vector_store %arg6[%c0_12, %c0_13], %12 {strides = array<i32>} : memref<128x128xf32, #tpu.memory_space<vmem>>, vector<128x128xf32>,
    } else {
    }
    return
  }
  func.func @transform_0(%arg0: i32, %arg1: i32, %arg2: i32) -> (i32, i32) {
    %c0_i32 = arith.constant 0 : i32
    return %arg0, %arg2 : i32, i32
  }
  func.func @transform_1(%arg0: i32, %arg1: i32, %arg2: i32) -> (i32, i32) {
    %c0_i32 = arith.constant 0 : i32
    return %arg2, %arg1 : i32, i32
  }
  func.func @transform_2(%arg0: i32, %arg1: i32, %arg2: i32) -> (i32, i32) {
    %c0_i32 = arith.constant 0 : i32
    %c0_i32_0 = arith.constant 0 : i32
    return %c0_i32, %arg1 : i32, i32
  }
  func.func @transform_3(%arg0: i32, %arg1: i32, %arg2: i32) -> (i32, i32) {
    %c0_i32 = arith.constant 0 : i32
    return %arg0, %arg1 : i32, i32
  }
}

module attributes {stable_mosaic.version = 11 : i64} {
  func.func @_tiled_linear_kernel(%arg0: i32, %arg1: i32, %arg2: i32, %arg3: memref<128x128xbf16, #tpu.memory_space<vmem>>, %arg4: memref<128x128xbf16, #tpu.memory_space<vmem>>, %arg5: memref<1x128xf32, #tpu.memory_space<vmem>>, %arg6: memref<128x128xbf16, #tpu.memory_space<vmem>>, %arg7: memref<128x128xf32, #tpu.memory_space<vmem>>) attributes {dimension_semantics = [#tpu.dimension_semantics<parallel>, #tpu.dimension_semantics<parallel>, #tpu.dimension_semantics<arbitrary>], iteration_bounds = array<i64: 1, 3, 1>, scalar_prefetch = 0 : i64, scratch_operands = 1 : i64, tpu.core_type = #tpu.core_type<tc>, window_params = [{transform_indices = @transform_0, window_bounds = array<i64: 128, 128>}, {transform_indices = @transform_1, window_bounds = array<i64: 128, 128>}, {transform_indices = @transform_2, window_bounds = array<i64: 1, 128>}, {transform_indices = @transform_3, window_bounds = array<i64: 128, 128>}]} {
    %c0_i32 = arith.constant 0 : i32
    %0 = arith.cmpi eq, %arg2, %c0_i32 : i32
    %1 = arith.extui %0 : i1 to i32
    %c0_i32_0 = arith.constant 0 : i32
    %2 = arith.cmpi ne, %1, %c0_i32_0 : i32
    scf.if %2 {
      %c0_10 = arith.constant 0 : index
      %c0_11 = arith.constant 0 : index
      %12 = vector.load %arg5[%c0_10, %c0_11] : memref<1x128xf32, #tpu.memory_space<vmem>>, vector<1x128xf32>
      %13 = vector.shape_cast %12 : vector<1x128xf32> to vector<1x128xf32>
      %14 = vector.broadcast %13 : vector<1x128xf32> to vector<128x128xf32>
      %c0_12 = arith.constant 0 : index
      %c0_13 = arith.constant 0 : index
      %15 = vector.load %arg7[%c0_12, %c0_13] : memref<128x128xf32, #tpu.memory_space<vmem>>, vector<128x128xf32>
      tpu.vector_store %arg7[%c0_12, %c0_13], %14 {strides = array<i32>} : memref<128x128xf32, #tpu.memory_space<vmem>>, vector<128x128xf32>,
    } else {
    }
    %c0 = arith.constant 0 : index
    %c0_1 = arith.constant 0 : index
    %3 = vector.load %arg7[%c0, %c0_1] : memref<128x128xf32, #tpu.memory_space<vmem>>, vector<128x128xf32>
    %c0_2 = arith.constant 0 : index
    %c0_3 = arith.constant 0 : index
    %4 = vector.load %arg3[%c0_2, %c0_3] : memref<128x128xbf16, #tpu.memory_space<vmem>>, vector<128x128xbf16>
    %c0_4 = arith.constant 0 : index
    %c0_5 = arith.constant 0 : index
    %5 = vector.load %arg4[%c0_4, %c0_5] : memref<128x128xbf16, #tpu.memory_space<vmem>>, vector<128x128xbf16>
    %cst = arith.constant dense<0.000000e+00> : vector<128x128xf32>
    %6 = tpu.matmul %4, %5, %cst {dimension_numbers = #tpu.dot_dimension_numbers<[1], [0], [0], [1], [0, 0, 1, 1], [], []>} : vector<128x128xbf16>, vector<128x128xbf16>, vector<128x128xf32> -> vector<128x128xf32>
    %7 = arith.addf %3, %6 : vector<128x128xf32>
    %c0_6 = arith.constant 0 : index
    %c0_7 = arith.constant 0 : index
    %8 = vector.load %arg7[%c0_6, %c0_7] : memref<128x128xf32, #tpu.memory_space<vmem>>, vector<128x128xf32>
    tpu.vector_store %arg7[%c0_6, %c0_7], %7 {strides = array<i32>} : memref<128x128xf32, #tpu.memory_space<vmem>>, vector<128x128xf32>,
    %c0_i32_8 = arith.constant 0 : i32
    %9 = arith.cmpi eq, %arg2, %c0_i32_8 : i32
    %10 = arith.extui %9 : i1 to i32
    %c0_i32_9 = arith.constant 0 : i32
    %11 = arith.cmpi ne, %10, %c0_i32_9 : i32
    scf.if %11 {
      %c0_10 = arith.constant 0 : index
      %c0_11 = arith.constant 0 : index
      %12 = vector.load %arg7[%c0_10, %c0_11] : memref<128x128xf32, #tpu.memory_space<vmem>>, vector<128x128xf32>
      %13 = arith.truncf %12 : vector<128x128xf32> to vector<128x128xbf16>
      %c0_12 = arith.constant 0 : index
      %c0_13 = arith.constant 0 : index
      %14 = vector.load %arg6[%c0_12, %c0_13] : memref<128x128xbf16, #tpu.memory_space<vmem>>, vector<128x128xbf16>
      tpu.vector_store %arg6[%c0_12, %c0_13], %13 {strides = array<i32>} : memref<128x128xbf16, #tpu.memory_space<vmem>>, vector<128x128xbf16>,
    } else {
    }
    return
  }
  func.func @transform_0(%arg0: i32, %arg1: i32, %arg2: i32) -> (i32, i32) {
    %c0_i32 = arith.constant 0 : i32
    return %arg0, %arg2 : i32, i32
  }
  func.func @transform_1(%arg0: i32, %arg1: i32, %arg2: i32) -> (i32, i32) {
    %c0_i32 = arith.constant 0 : i32
    return %arg2, %arg1 : i32, i32
  }
  func.func @transform_2(%arg0: i32, %arg1: i32, %arg2: i32) -> (i32, i32) {
    %c0_i32 = arith.constant 0 : i32
    %c0_i32_0 = arith.constant 0 : i32
    return %c0_i32, %arg1 : i32, i32
  }
  func.func @transform_3(%arg0: i32, %arg1: i32, %arg2: i32) -> (i32, i32) {
    %c0_i32 = arith.constant 0 : i32
    return %arg0, %arg1 : i32, i32
  }
}

module attributes {stable_mosaic.version = 11 : i64} {
  func.func @_flash_mha_kernel(%arg0: i32, %arg1: i32, %arg2: i32, %arg3: memref<1x64x32xbf16, #tpu.memory_space<vmem>>, %arg4: memref<1x64x32xbf16, #tpu.memory_space<vmem>>, %arg5: memref<1x64x32xbf16, #tpu.memory_space<vmem>>, %arg6: memref<1x64x32xbf16, #tpu.memory_space<vmem>>, %arg7: memref<64x1xf32, #tpu.memory_space<vmem>>, %arg8: memref<64x1xf32, #tpu.memory_space<vmem>>, %arg9: memref<64x32xf32, #tpu.memory_space<vmem>>) attributes {dimension_semantics = [#tpu.dimension_semantics<parallel>, #tpu.dimension_semantics<parallel>, #tpu.dimension_semantics<arbitrary>], iteration_bounds = array<i64: 8, 1, 1>, scalar_prefetch = 0 : i64, scratch_operands = 3 : i64, tpu.core_type = #tpu.core_type<tc>, window_params = [{transform_indices = @transform_0, window_bounds = array<i64: 1, 64, 32>}, {transform_indices = @transform_1, window_bounds = array<i64: 1, 64, 32>}, {transform_indices = @transform_2, window_bounds = array<i64: 1, 64, 32>}, {transform_indices = @transform_3, window_bounds = array<i64: 1, 64, 32>}]} {
    %c0_i32 = arith.constant 0 : i32
    %0 = arith.cmpi eq, %arg2, %c0_i32 : i32
    %1 = arith.extui %0 : i1 to i32
    %c0_i32_0 = arith.constant 0 : i32
    %2 = arith.cmpi ne, %1, %c0_i32_0 : i32
    scf.if %2 {
      %cst_27 = arith.constant 0xFF800000 : f32
      %38 = vector.broadcast %cst_27 : f32 to vector<64x1xf32>
      %c0_28 = arith.constant 0 : index
      %c0_29 = arith.constant 0 : index
      %39 = vector.load %arg7[%c0_28, %c0_29] : memref<64x1xf32, #tpu.memory_space<vmem>>, vector<64x1xf32>
      tpu.vector_store %arg7[%c0_28, %c0_29], %38 {strides = array<i32>} : memref<64x1xf32, #tpu.memory_space<vmem>>, vector<64x1xf32>,
      %cst_30 = arith.constant 0.000000e+00 : f32
      %40 = vector.broadcast %cst_30 : f32 to vector<64x1xf32>
      %c0_31 = arith.constant 0 : index
      %c0_32 = arith.constant 0 : index
      %41 = vector.load %arg8[%c0_31, %c0_32] : memref<64x1xf32, #tpu.memory_space<vmem>>, vector<64x1xf32>
      tpu.vector_store %arg8[%c0_31, %c0_32], %40 {strides = array<i32>} : memref<64x1xf32, #tpu.memory_space<vmem>>, vector<64x1xf32>,
      %cst_33 = arith.constant 0.000000e+00 : f32
      %42 = vector.broadcast %cst_33 : f32 to vector<64x32xf32>
      %c0_34 = arith.constant 0 : index
      %c0_35 = arith.constant 0 : index
      %43 = vector.load %arg9[%c0_34, %c0_35] : memref<64x32xf32, #tpu.memory_space<vmem>>, vector<64x32xf32>
      tpu.vector_store %arg9[%c0_34, %c0_35], %42 {strides = array<i32>} : memref<64x32xf32, #tpu.memory_space<vmem>>, vector<64x32xf32>,
    } else {
    }
    %c0 = arith.constant 0 : index
    %c0_1 = arith.constant 0 : index
    %c0_2 = arith.constant 0 : index
    %3 = vector.load %arg3[%c0, %c0_1, %c0_2] : memref<1x64x32xbf16, #tpu.memory_space<vmem>>, vector<1x64x32xbf16>
    %4 = vector.shape_cast %3 : vector<1x64x32xbf16> to vector<64x32xbf16>
    %c0_3 = arith.constant 0 : index
    %c0_4 = arith.constant 0 : index
    %c0_5 = arith.constant 0 : index
    %5 = vector.load %arg4[%c0_3, %c0_4, %c0_5] : memref<1x64x32xbf16, #tpu.memory_space<vmem>>, vector<1x64x32xbf16>
    %6 = vector.shape_cast %5 : vector<1x64x32xbf16> to vector<64x32xbf16>
    %cst = arith.constant dense<0.000000e+00> : vector<64x64xf32>
    %7 = tpu.matmul %4, %6, %cst {dimension_numbers = #tpu.dot_dimension_numbers<[1], [1], [0], [0], [0, 0, 1, 0], [], []>} : vector<64x32xbf16>, vector<64x32xbf16>, vector<64x64xf32> -> vector<64x64xf32>
    %cst_6 = arith.constant 0.176776692 : f32
    %8 = vector.broadcast %cst_6 : f32 to vector<64x64xf32>
    %9 = arith.mulf %7, %8 : vector<64x64xf32>
    %c0_7 = arith.constant 0 : index
    %c0_8 = arith.constant 0 : index
    %10 = vector.load %arg7[%c0_7, %c0_8] : memref<64x1xf32, #tpu.memory_space<vmem>>, vector<64x1xf32>
    %cst_9 = arith.constant dense<0xFF800000> : vector<64xf32>
    %11 = vector.multi_reduction <maximumf>, %9, %cst_9 [1] : vector<64x64xf32> to vector<64xf32>
    %12 = vector.shape_cast %11 : vector<64xf32> to vector<64x1xf32>
    %13 = arith.maximumf %10, %12 : vector<64x1xf32>
    %14 = arith.subf %10, %13 : vector<64x1xf32>
    %15 = math.exp %14 : vector<64x1xf32>
    %16 = vector.broadcast %13 : vector<64x1xf32> to vector<64x64xf32>
    %17 = arith.subf %9, %16 : vector<64x64xf32>
    %18 = math.exp %17 : vector<64x64xf32>
    %c0_10 = arith.constant 0 : index
    %c0_11 = arith.constant 0 : index
    %19 = vector.load %arg8[%c0_10, %c0_11] : memref<64x1xf32, #tpu.memory_space<vmem>>, vector<64x1xf32>
    %20 = arith.mulf %15, %19 : vector<64x1xf32>
    %cst_12 = arith.constant dense<0.000000e+00> : vector<64xf32>
    %21 = vector.multi_reduction <add>, %18, %cst_12 [1] : vector<64x64xf32> to vector<64xf32>
    %22 = vector.shape_cast %21 : vector<64xf32> to vector<64x1xf32>
    %23 = arith.addf %20, %22 : vector<64x1xf32>
    %c0_13 = arith.constant 0 : index
    %c0_14 = arith.constant 0 : index
    %24 = vector.load %arg8[%c0_13, %c0_14] : memref<64x1xf32, #tpu.memory_space<vmem>>, vector<64x1xf32>
    tpu.vector_store %arg8[%c0_13, %c0_14], %23 {strides = array<i32>} : memref<64x1xf32, #tpu.memory_space<vmem>>, vector<64x1xf32>,
    %c0_15 = arith.constant 0 : index
    %c0_16 = arith.constant 0 : index
    %25 = vector.load %arg9[%c0_15, %c0_16] : memref<64x32xf32, #tpu.memory_space<vmem>>, vector<64x32xf32>
    %26 = vector.broadcast %15 : vector<64x1xf32> to vector<64x32xf32>
    %27 = arith.mulf %26, %25 : vector<64x32xf32>
    %28 = arith.truncf %18 : vector<64x64xf32> to vector<64x64xbf16>
    %c0_17 = arith.constant 0 : index
    %c0_18 = arith.constant 0 : index
    %c0_19 = arith.constant 0 : index
    %29 = vector.load %arg5[%c0_17, %c0_18, %c0_19] : memref<1x64x32xbf16, #tpu.memory_space<vmem>>, vector<1x64x32xbf16>
    %30 = vector.shape_cast %29 : vector<1x64x32xbf16> to vector<64x32xbf16>
    %cst_20 = arith.constant dense<0.000000e+00> : vector<64x32xf32>
    %31 = tpu.matmul %28, %30, %cst_20 {dimension_numbers = #tpu.dot_dimension_numbers<[1], [0], [0], [1], [0, 0, 1, 1], [], []>} : vector<64x64xbf16>, vector<64x32xbf16>, vector<64x32xf32> -> vector<64x32xf32>
    %32 = arith.addf %27, %31 : vector<64x32xf32>
    %c0_21 = arith.constant 0 : index
    %c0_22 = arith.constant 0 : index
    %33 = vector.load %arg9[%c0_21, %c0_22] : memref<64x32xf32, #tpu.memory_space<vmem>>, vector<64x32xf32>
    tpu.vector_store %arg9[%c0_21, %c0_22], %32 {strides = array<i32>} : memref<64x32xf32, #tpu.memory_space<vmem>>, vector<64x32xf32>,
    %c0_23 = arith.constant 0 : index
    %c0_24 = arith.constant 0 : index
    %34 = vector.load %arg7[%c0_23, %c0_24] : memref<64x1xf32, #tpu.memory_space<vmem>>, vector<64x1xf32>
    tpu.vector_store %arg7[%c0_23, %c0_24], %13 {strides = array<i32>} : memref<64x1xf32, #tpu.memory_space<vmem>>, vector<64x1xf32>,
    %c0_i32_25 = arith.constant 0 : i32
    %35 = arith.cmpi eq, %arg2, %c0_i32_25 : i32
    %36 = arith.extui %35 : i1 to i32
    %c0_i32_26 = arith.constant 0 : i32
    %37 = arith.cmpi ne, %36, %c0_i32_26 : i32
    scf.if %37 {
      %c0_27 = arith.constant 0 : index
      %c0_28 = arith.constant 0 : index
      %38 = vector.load %arg9[%c0_27, %c0_28] : memref<64x32xf32, #tpu.memory_space<vmem>>, vector<64x32xf32>
      %c0_29 = arith.constant 0 : index
      %c0_30 = arith.constant 0 : index
      %39 = vector.load %arg8[%c0_29, %c0_30] : memref<64x1xf32, #tpu.memory_space<vmem>>, vector<64x1xf32>
      %40 = tpu.reciprocal %39 {approx = true} : vector<64x1xf32> -> vector<64x1xf32>
      %41 = vector.broadcast %40 : vector<64x1xf32> to vector<64x32xf32>
      %42 = arith.mulf %38, %41 : vector<64x32xf32>
      %43 = arith.truncf %42 : vector<64x32xf32> to vector<64x32xbf16>
      %c0_31 = arith.constant 0 : index
      %c0_32 = arith.constant 0 : index
      %c0_33 = arith.constant 0 : index
      %44 = vector.load %arg6[%c0_31, %c0_32, %c0_33] : memref<1x64x32xbf16, #tpu.memory_space<vmem>>, vector<1x64x32xbf16>
      %45 = vector.shape_cast %44 : vector<1x64x32xbf16> to vector<64x32xbf16>
      %46 = vector.shape_cast %43 : vector<64x32xbf16> to vector<1x64x32xbf16>
      tpu.vector_store %arg6[%c0_31, %c0_32, %c0_33], %46 {strides = array<i32>} : memref<1x64x32xbf16, #tpu.memory_space<vmem>>, vector<1x64x32xbf16>,
    } else {
    }
    return
  }
  func.func @transform_0(%arg0: i32, %arg1: i32, %arg2: i32) -> (i32, i32, i32) {
    %c0_i32 = arith.constant 0 : i32
    %c0_i32_0 = arith.constant 0 : i32
    return %arg0, %arg1, %c0_i32 : i32, i32, i32
  }
  func.func @transform_1(%arg0: i32, %arg1: i32, %arg2: i32) -> (i32, i32, i32) {
    %c0_i32 = arith.constant 0 : i32
    %c0_i32_0 = arith.constant 0 : i32
    return %arg0, %arg2, %c0_i32 : i32, i32, i32
  }
  func.func @transform_2(%arg0: i32, %arg1: i32, %arg2: i32) -> (i32, i32, i32) {
    %c0_i32 = arith.constant 0 : i32
    %c0_i32_0 = arith.constant 0 : i32
    return %arg0, %arg2, %c0_i32 : i32, i32, i32
  }
  func.func @transform_3(%arg0: i32, %arg1: i32, %arg2: i32) -> (i32, i32, i32) {
    %c0_i32 = arith.constant 0 : i32
    %c0_i32_0 = arith.constant 0 : i32
    return %arg0, %arg1, %c0_i32 : i32, i32, i32
  }
}

module attributes {stable_mosaic.version = 11 : i64} {
  func.func @_linear_res_ln_kernel(%arg0: i32, %arg1: i32, %arg2: memref<64x128xbf16, #tpu.memory_space<vmem>>, %arg3: memref<128x128xbf16, #tpu.memory_space<vmem>>, %arg4: memref<1x128xf32, #tpu.memory_space<vmem>>, %arg5: memref<64x128xbf16, #tpu.memory_space<vmem>>, %arg6: memref<1x128xf32, #tpu.memory_space<vmem>>, %arg7: memref<1x128xf32, #tpu.memory_space<vmem>>, %arg8: memref<64x128xbf16, #tpu.memory_space<vmem>>, %arg9: memref<64x128xf32, #tpu.memory_space<vmem>>) attributes {dimension_semantics = [#tpu.dimension_semantics<parallel>, #tpu.dimension_semantics<arbitrary>], iteration_bounds = array<i64: 2, 1>, scalar_prefetch = 0 : i64, scratch_operands = 1 : i64, tpu.core_type = #tpu.core_type<tc>, window_params = [{transform_indices = @transform_0, window_bounds = array<i64: 64, 128>}, {transform_indices = @transform_1, window_bounds = array<i64: 128, 128>}, {pipeline_mode = #tpu.pipeline_mode<synchronous>, transform_indices = @transform_2, window_bounds = array<i64: 1, 128>}, {transform_indices = @transform_3, window_bounds = array<i64: 64, 128>}, {pipeline_mode = #tpu.pipeline_mode<synchronous>, transform_indices = @transform_4, window_bounds = array<i64: 1, 128>}, {pipeline_mode = #tpu.pipeline_mode<synchronous>, transform_indices = @transform_5, window_bounds = array<i64: 1, 128>}, {transform_indices = @transform_6, window_bounds = array<i64: 64, 128>}]} {
    %c0_i32 = arith.constant 0 : i32
    %0 = arith.cmpi eq, %arg1, %c0_i32 : i32
    %1 = arith.extui %0 : i1 to i32
    %c0_i32_0 = arith.constant 0 : i32
    %2 = arith.cmpi ne, %1, %c0_i32_0 : i32
    scf.if %2 {
      %c0_10 = arith.constant 0 : index
      %c0_11 = arith.constant 0 : index
      %12 = vector.load %arg4[%c0_10, %c0_11] : memref<1x128xf32, #tpu.memory_space<vmem>>, vector<1x128xf32>
      %13 = vector.shape_cast %12 : vector<1x128xf32> to vector<1x128xf32>
      %14 = vector.broadcast %13 : vector<1x128xf32> to vector<64x128xf32>
      %c0_12 = arith.constant 0 : index
      %c0_13 = arith.constant 0 : index
      %15 = vector.load %arg9[%c0_12, %c0_13] : memref<64x128xf32, #tpu.memory_space<vmem>>, vector<64x128xf32>
      tpu.vector_store %arg9[%c0_12, %c0_13], %14 {strides = array<i32>} : memref<64x128xf32, #tpu.memory_space<vmem>>, vector<64x128xf32>,
    } else {
    }
    %c0 = arith.constant 0 : index
    %c0_1 = arith.constant 0 : index
    %3 = vector.load %arg9[%c0, %c0_1] : memref<64x128xf32, #tpu.memory_space<vmem>>, vector<64x128xf32>
    %c0_2 = arith.constant 0 : index
    %c0_3 = arith.constant 0 : index
    %4 = vector.load %arg2[%c0_2, %c0_3] : memref<64x128xbf16, #tpu.memory_space<vmem>>, vector<64x128xbf16>
    %c0_4 = arith.constant 0 : index
    %c0_5 = arith.constant 0 : index
    %5 = vector.load %arg3[%c0_4, %c0_5] : memref<128x128xbf16, #tpu.memory_space<vmem>>, vector<128x128xbf16>
    %cst = arith.constant dense<0.000000e+00> : vector<64x128xf32>
    %6 = tpu.matmul %4, %5, %cst {dimension_numbers = #tpu.dot_dimension_numbers<[1], [0], [0], [1], [0, 0, 1, 1], [], []>} : vector<64x128xbf16>, vector<128x128xbf16>, vector<64x128xf32> -> vector<64x128xf32>
    %7 = arith.addf %3, %6 : vector<64x128xf32>
    %c0_6 = arith.constant 0 : index
    %c0_7 = arith.constant 0 : index
    %8 = vector.load %arg9[%c0_6, %c0_7] : memref<64x128xf32, #tpu.memory_space<vmem>>, vector<64x128xf32>
    tpu.vector_store %arg9[%c0_6, %c0_7], %7 {strides = array<i32>} : memref<64x128xf32, #tpu.memory_space<vmem>>, vector<64x128xf32>,
    %c0_i32_8 = arith.constant 0 : i32
    %9 = arith.cmpi eq, %arg1, %c0_i32_8 : i32
    %10 = arith.extui %9 : i1 to i32
    %c0_i32_9 = arith.constant 0 : i32
    %11 = arith.cmpi ne, %10, %c0_i32_9 : i32
    scf.if %11 {
      %c0_10 = arith.constant 0 : index
      %c0_11 = arith.constant 0 : index
      %12 = vector.load %arg9[%c0_10, %c0_11] : memref<64x128xf32, #tpu.memory_space<vmem>>, vector<64x128xf32>
      %c0_12 = arith.constant 0 : index
      %c0_13 = arith.constant 0 : index
      %13 = vector.load %arg5[%c0_12, %c0_13] : memref<64x128xbf16, #tpu.memory_space<vmem>>, vector<64x128xbf16>
      %14 = arith.extf %13 : vector<64x128xbf16> to vector<64x128xf32>
      %15 = arith.addf %12, %14 : vector<64x128xf32>
      %cst_14 = arith.constant dense<0.000000e+00> : vector<64xf32>
      %16 = vector.multi_reduction <add>, %15, %cst_14 [1] : vector<64x128xf32> to vector<64xf32>
      %17 = vector.shape_cast %16 : vector<64xf32> to vector<64x1xf32>
      %cst_15 = arith.constant 1.280000e+02 : f32
      %18 = vector.broadcast %cst_15 : f32 to vector<64x1xf32>
      %19 = arith.divf %17, %18 : vector<64x1xf32>
      %20 = vector.broadcast %19 : vector<64x1xf32> to vector<64x128xf32>
      %21 = arith.subf %15, %20 : vector<64x128xf32>
      %22 = arith.mulf %21, %21 : vector<64x128xf32>
      %cst_16 = arith.constant dense<0.000000e+00> : vector<64xf32>
      %23 = vector.multi_reduction <add>, %22, %cst_16 [1] : vector<64x128xf32> to vector<64xf32>
      %24 = vector.shape_cast %23 : vector<64xf32> to vector<64x1xf32>
      %cst_17 = arith.constant 1.280000e+02 : f32
      %25 = vector.broadcast %cst_17 : f32 to vector<64x1xf32>
      %26 = arith.divf %24, %25 : vector<64x1xf32>
      %27 = vector.broadcast %19 : vector<64x1xf32> to vector<64x128xf32>
      %28 = arith.subf %15, %27 : vector<64x128xf32>
      %cst_18 = arith.constant 9.99999974E-6 : f32
      %29 = vector.broadcast %cst_18 : f32 to vector<64x1xf32>
      %30 = arith.addf %26, %29 : vector<64x1xf32>
      %31 = math.rsqrt %30 : vector<64x1xf32>
      %32 = vector.broadcast %31 : vector<64x1xf32> to vector<64x128xf32>
      %33 = arith.mulf %28, %32 : vector<64x128xf32>
      %c0_19 = arith.constant 0 : index
      %c0_20 = arith.constant 0 : index
      %34 = vector.load %arg6[%c0_19, %c0_20] : memref<1x128xf32, #tpu.memory_space<vmem>>, vector<1x128xf32>
      %35 = vector.broadcast %34 : vector<1x128xf32> to vector<64x128xf32>
      %36 = arith.mulf %33, %35 : vector<64x128xf32>
      %c0_21 = arith.constant 0 : index
      %c0_22 = arith.constant 0 : index
      %37 = vector.load %arg7[%c0_21, %c0_22] : memref<1x128xf32, #tpu.memory_space<vmem>>, vector<1x128xf32>
      %38 = vector.broadcast %37 : vector<1x128xf32> to vector<64x128xf32>
      %39 = arith.addf %36, %38 : vector<64x128xf32>
      %40 = arith.truncf %39 : vector<64x128xf32> to vector<64x128xbf16>
      %c0_23 = arith.constant 0 : index
      %c0_24 = arith.constant 0 : index
      %41 = vector.load %arg8[%c0_23, %c0_24] : memref<64x128xbf16, #tpu.memory_space<vmem>>, vector<64x128xbf16>
      tpu.vector_store %arg8[%c0_23, %c0_24], %40 {strides = array<i32>} : memref<64x128xbf16, #tpu.memory_space<vmem>>, vector<64x128xbf16>,
    } else {
    }
    return
  }
  func.func @transform_0(%arg0: i32, %arg1: i32) -> (i32, i32) {
    %c0_i32 = arith.constant 0 : i32
    return %arg0, %arg1 : i32, i32
  }
  func.func @transform_1(%arg0: i32, %arg1: i32) -> (i32, i32) {
    %c0_i32 = arith.constant 0 : i32
    %c0_i32_0 = arith.constant 0 : i32
    return %arg1, %c0_i32 : i32, i32
  }
  func.func @transform_2(%arg0: i32, %arg1: i32) -> (i32, i32) {
    %c0_i32 = arith.constant 0 : i32
    %c0_i32_0 = arith.constant 0 : i32
    %c0_i32_1 = arith.constant 0 : i32
    return %c0_i32, %c0_i32_0 : i32, i32
  }
  func.func @transform_3(%arg0: i32, %arg1: i32) -> (i32, i32) {
    %c0_i32 = arith.constant 0 : i32
    %c0_i32_0 = arith.constant 0 : i32
    return %arg0, %c0_i32 : i32, i32
  }
  func.func @transform_4(%arg0: i32, %arg1: i32) -> (i32, i32) {
    %c0_i32 = arith.constant 0 : i32
    %c0_i32_0 = arith.constant 0 : i32
    %c0_i32_1 = arith.constant 0 : i32
    return %c0_i32, %c0_i32_0 : i32, i32
  }
  func.func @transform_5(%arg0: i32, %arg1: i32) -> (i32, i32) {
    %c0_i32 = arith.constant 0 : i32
    %c0_i32_0 = arith.constant 0 : i32
    %c0_i32_1 = arith.constant 0 : i32
    return %c0_i32, %c0_i32_0 : i32, i32
  }
  func.func @transform_6(%arg0: i32, %arg1: i32) -> (i32, i32) {
    %c0_i32 = arith.constant 0 : i32
    %c0_i32_0 = arith.constant 0 : i32
    return %arg0, %c0_i32 : i32, i32
  }
}

module attributes {stable_mosaic.version = 11 : i64} {
  func.func @_ffn_res_ln_kernel(%arg0: i32, %arg1: i32, %arg2: memref<64x128xbf16, #tpu.memory_space<vmem>>, %arg3: memref<128x512xbf16, #tpu.memory_space<vmem>>, %arg4: memref<1x512xf32, #tpu.memory_space<vmem>>, %arg5: memref<512x128xbf16, #tpu.memory_space<vmem>>, %arg6: memref<1x128xf32, #tpu.memory_space<vmem>>, %arg7: memref<1x128xf32, #tpu.memory_space<vmem>>, %arg8: memref<1x128xf32, #tpu.memory_space<vmem>>, %arg9: memref<64x128xbf16, #tpu.memory_space<vmem>>, %arg10: memref<64x128xf32, #tpu.memory_space<vmem>>) attributes {dimension_semantics = [#tpu.dimension_semantics<parallel>, #tpu.dimension_semantics<arbitrary>], iteration_bounds = array<i64: 2, 4>, scalar_prefetch = 0 : i64, scratch_operands = 1 : i64, tpu.core_type = #tpu.core_type<tc>, window_params = [{transform_indices = @transform_0, window_bounds = array<i64: 64, 128>}, {transform_indices = @transform_1, window_bounds = array<i64: 128, 512>}, {transform_indices = @transform_2, window_bounds = array<i64: 1, 512>}, {transform_indices = @transform_3, window_bounds = array<i64: 512, 128>}, {pipeline_mode = #tpu.pipeline_mode<synchronous>, transform_indices = @transform_4, window_bounds = array<i64: 1, 128>}, {pipeline_mode = #tpu.pipeline_mode<synchronous>, transform_indices = @transform_5, window_bounds = array<i64: 1, 128>}, {pipeline_mode = #tpu.pipeline_mode<synchronous>, transform_indices = @transform_6, window_bounds = array<i64: 1, 128>}, {transform_indices = @transform_7, window_bounds = array<i64: 64, 128>}]} {
    %c0_i32 = arith.constant 0 : i32
    %0 = arith.cmpi eq, %arg1, %c0_i32 : i32
    %1 = arith.extui %0 : i1 to i32
    %c0_i32_0 = arith.constant 0 : i32
    %2 = arith.cmpi ne, %1, %c0_i32_0 : i32
    scf.if %2 {
      %c0_15 = arith.constant 0 : index
      %c0_16 = arith.constant 0 : index
      %20 = vector.load %arg6[%c0_15, %c0_16] : memref<1x128xf32, #tpu.memory_space<vmem>>, vector<1x128xf32>
      %21 = vector.shape_cast %20 : vector<1x128xf32> to vector<1x128xf32>
      %22 = vector.broadcast %21 : vector<1x128xf32> to vector<64x128xf32>
      %c0_17 = arith.constant 0 : index
      %c0_18 = arith.constant 0 : index
      %23 = vector.load %arg10[%c0_17, %c0_18] : memref<64x128xf32, #tpu.memory_space<vmem>>, vector<64x128xf32>
      tpu.vector_store %arg10[%c0_17, %c0_18], %22 {strides = array<i32>} : memref<64x128xf32, #tpu.memory_space<vmem>>, vector<64x128xf32>,
    } else {
    }
    %c0 = arith.constant 0 : index
    %c0_1 = arith.constant 0 : index
    %3 = vector.load %arg2[%c0, %c0_1] : memref<64x128xbf16, #tpu.memory_space<vmem>>, vector<64x128xbf16>
    %c0_2 = arith.constant 0 : index
    %c0_3 = arith.constant 0 : index
    %4 = vector.load %arg3[%c0_2, %c0_3] : memref<128x512xbf16, #tpu.memory_space<vmem>>, vector<128x512xbf16>
    %cst = arith.constant dense<0.000000e+00> : vector<64x512xf32>
    %5 = tpu.matmul %3, %4, %cst {dimension_numbers = #tpu.dot_dimension_numbers<[1], [0], [0], [1], [0, 0, 1, 1], [], []>} : vector<64x128xbf16>, vector<128x512xbf16>, vector<64x512xf32> -> vector<64x512xf32>
    %c0_4 = arith.constant 0 : index
    %c0_5 = arith.constant 0 : index
    %6 = vector.load %arg4[%c0_4, %c0_5] : memref<1x512xf32, #tpu.memory_space<vmem>>, vector<1x512xf32>
    %7 = vector.broadcast %6 : vector<1x512xf32> to vector<64x512xf32>
    %8 = arith.addf %5, %7 : vector<64x512xf32>
    %9 = arith.truncf %8 : vector<64x512xf32> to vector<64x512xbf16>
    %cst_6 = arith.constant 0.000000e+00 : bf16
    %10 = vector.broadcast %cst_6 : bf16 to vector<64x512xbf16>
    %11 = arith.maximumf %9, %10 : vector<64x512xbf16>
    %c0_7 = arith.constant 0 : index
    %c0_8 = arith.constant 0 : index
    %12 = vector.load %arg10[%c0_7, %c0_8] : memref<64x128xf32, #tpu.memory_space<vmem>>, vector<64x128xf32>
    %c0_9 = arith.constant 0 : index
    %c0_10 = arith.constant 0 : index
    %13 = vector.load %arg5[%c0_9, %c0_10] : memref<512x128xbf16, #tpu.memory_space<vmem>>, vector<512x128xbf16>
    %cst_11 = arith.constant dense<0.000000e+00> : vector<64x128xf32>
    %14 = tpu.matmul %11, %13, %cst_11 {dimension_numbers = #tpu.dot_dimension_numbers<[1], [0], [0], [1], [0, 0, 1, 1], [], []>} : vector<64x512xbf16>, vector<512x128xbf16>, vector<64x128xf32> -> vector<64x128xf32>
    %15 = arith.addf %12, %14 : vector<64x128xf32>
    %c0_12 = arith.constant 0 : index
    %c0_13 = arith.constant 0 : index
    %16 = vector.load %arg10[%c0_12, %c0_13] : memref<64x128xf32, #tpu.memory_space<vmem>>, vector<64x128xf32>
    tpu.vector_store %arg10[%c0_12, %c0_13], %15 {strides = array<i32>} : memref<64x128xf32, #tpu.memory_space<vmem>>, vector<64x128xf32>,
    %c3_i32 = arith.constant 3 : i32
    %17 = arith.cmpi eq, %arg1, %c3_i32 : i32
    %18 = arith.extui %17 : i1 to i32
    %c0_i32_14 = arith.constant 0 : i32
    %19 = arith.cmpi ne, %18, %c0_i32_14 : i32
    scf.if %19 {
      %c0_15 = arith.constant 0 : index
      %c0_16 = arith.constant 0 : index
      %20 = vector.load %arg10[%c0_15, %c0_16] : memref<64x128xf32, #tpu.memory_space<vmem>>, vector<64x128xf32>
      %c0_17 = arith.constant 0 : index
      %c0_18 = arith.constant 0 : index
      %21 = vector.load %arg2[%c0_17, %c0_18] : memref<64x128xbf16, #tpu.memory_space<vmem>>, vector<64x128xbf16>
      %22 = arith.extf %21 : vector<64x128xbf16> to vector<64x128xf32>
      %23 = arith.addf %20, %22 : vector<64x128xf32>
      %cst_19 = arith.constant dense<0.000000e+00> : vector<64xf32>
      %24 = vector.multi_reduction <add>, %23, %cst_19 [1] : vector<64x128xf32> to vector<64xf32>
      %25 = vector.shape_cast %24 : vector<64xf32> to vector<64x1xf32>
      %cst_20 = arith.constant 1.280000e+02 : f32
      %26 = vector.broadcast %cst_20 : f32 to vector<64x1xf32>
      %27 = arith.divf %25, %26 : vector<64x1xf32>
      %28 = vector.broadcast %27 : vector<64x1xf32> to vector<64x128xf32>
      %29 = arith.subf %23, %28 : vector<64x128xf32>
      %30 = arith.mulf %29, %29 : vector<64x128xf32>
      %cst_21 = arith.constant dense<0.000000e+00> : vector<64xf32>
      %31 = vector.multi_reduction <add>, %30, %cst_21 [1] : vector<64x128xf32> to vector<64xf32>
      %32 = vector.shape_cast %31 : vector<64xf32> to vector<64x1xf32>
      %cst_22 = arith.constant 1.280000e+02 : f32
      %33 = vector.broadcast %cst_22 : f32 to vector<64x1xf32>
      %34 = arith.divf %32, %33 : vector<64x1xf32>
      %35 = vector.broadcast %27 : vector<64x1xf32> to vector<64x128xf32>
      %36 = arith.subf %23, %35 : vector<64x128xf32>
      %cst_23 = arith.constant 9.99999974E-6 : f32
      %37 = vector.broadcast %cst_23 : f32 to vector<64x1xf32>
      %38 = arith.addf %34, %37 : vector<64x1xf32>
      %39 = math.rsqrt %38 : vector<64x1xf32>
      %40 = vector.broadcast %39 : vector<64x1xf32> to vector<64x128xf32>
      %41 = arith.mulf %36, %40 : vector<64x128xf32>
      %c0_24 = arith.constant 0 : index
      %c0_25 = arith.constant 0 : index
      %42 = vector.load %arg7[%c0_24, %c0_25] : memref<1x128xf32, #tpu.memory_space<vmem>>, vector<1x128xf32>
      %43 = vector.broadcast %42 : vector<1x128xf32> to vector<64x128xf32>
      %44 = arith.mulf %41, %43 : vector<64x128xf32>
      %c0_26 = arith.constant 0 : index
      %c0_27 = arith.constant 0 : index
      %45 = vector.load %arg8[%c0_26, %c0_27] : memref<1x128xf32, #tpu.memory_space<vmem>>, vector<1x128xf32>
      %46 = vector.broadcast %45 : vector<1x128xf32> to vector<64x128xf32>
      %47 = arith.addf %44, %46 : vector<64x128xf32>
      %48 = arith.truncf %47 : vector<64x128xf32> to vector<64x128xbf16>
      %c0_28 = arith.constant 0 : index
      %c0_29 = arith.constant 0 : index
      %49 = vector.load %arg9[%c0_28, %c0_29] : memref<64x128xbf16, #tpu.memory_space<vmem>>, vector<64x128xbf16>
      tpu.vector_store %arg9[%c0_28, %c0_29], %48 {strides = array<i32>} : memref<64x128xbf16, #tpu.memory_space<vmem>>, vector<64x128xbf16>,
    } else {
    }
    return
  }
  func.func @transform_0(%arg0: i32, %arg1: i32) -> (i32, i32) {
    %c0_i32 = arith.constant 0 : i32
    %c0_i32_0 = arith.constant 0 : i32
    return %arg0, %c0_i32 : i32, i32
  }
  func.func @transform_1(%arg0: i32, %arg1: i32) -> (i32, i32) {
    %c0_i32 = arith.constant 0 : i32
    %c0_i32_0 = arith.constant 0 : i32
    return %c0_i32, %arg1 : i32, i32
  }
  func.func @transform_2(%arg0: i32, %arg1: i32) -> (i32, i32) {
    %c0_i32 = arith.constant 0 : i32
    %c0_i32_0 = arith.constant 0 : i32
    return %c0_i32, %arg1 : i32, i32
  }
  func.func @transform_3(%arg0: i32, %arg1: i32) -> (i32, i32) {
    %c0_i32 = arith.constant 0 : i32
    %c0_i32_0 = arith.constant 0 : i32
    return %arg1, %c0_i32 : i32, i32
  }
  func.func @transform_4(%arg0: i32, %arg1: i32) -> (i32, i32) {
    %c0_i32 = arith.constant 0 : i32
    %c0_i32_0 = arith.constant 0 : i32
    %c0_i32_1 = arith.constant 0 : i32
    return %c0_i32, %c0_i32_0 : i32, i32
  }
  func.func @transform_5(%arg0: i32, %arg1: i32) -> (i32, i32) {
    %c0_i32 = arith.constant 0 : i32
    %c0_i32_0 = arith.constant 0 : i32
    %c0_i32_1 = arith.constant 0 : i32
    return %c0_i32, %c0_i32_0 : i32, i32
  }
  func.func @transform_6(%arg0: i32, %arg1: i32) -> (i32, i32) {
    %c0_i32 = arith.constant 0 : i32
    %c0_i32_0 = arith.constant 0 : i32
    %c0_i32_1 = arith.constant 0 : i32
    return %c0_i32, %c0_i32_0 : i32, i32
  }
  func.func @transform_7(%arg0: i32, %arg1: i32) -> (i32, i32) {
    %c0_i32 = arith.constant 0 : i32
    %c0_i32_0 = arith.constant 0 : i32
    return %arg0, %c0_i32 : i32, i32
  }
}

module attributes {stable_mosaic.version = 11 : i64} {
  func.func @_mlp_head_kernel(%arg0: i32, %arg1: i32, %arg2: memref<64x128xbf16, #tpu.memory_space<vmem>>, %arg3: memref<128x128xbf16, #tpu.memory_space<vmem>>, %arg4: memref<1x128xf32, #tpu.memory_space<vmem>>, %arg5: memref<128x128xbf16, #tpu.memory_space<vmem>>, %arg6: memref<1x128xf32, #tpu.memory_space<vmem>>, %arg7: memref<64x128xf32, #tpu.memory_space<vmem>>, %arg8: memref<64x128xf32, #tpu.memory_space<vmem>>) attributes {dimension_semantics = [#tpu.dimension_semantics<parallel>, #tpu.dimension_semantics<arbitrary>], iteration_bounds = array<i64: 2, 1>, scalar_prefetch = 0 : i64, scratch_operands = 1 : i64, tpu.core_type = #tpu.core_type<tc>, window_params = [{transform_indices = @transform_0, window_bounds = array<i64: 64, 128>}, {transform_indices = @transform_1, window_bounds = array<i64: 128, 128>}, {transform_indices = @transform_2, window_bounds = array<i64: 1, 128>}, {transform_indices = @transform_3, window_bounds = array<i64: 128, 128>}, {pipeline_mode = #tpu.pipeline_mode<synchronous>, transform_indices = @transform_4, window_bounds = array<i64: 1, 128>}, {transform_indices = @transform_5, window_bounds = array<i64: 64, 128>}]} {
    %c0_i32 = arith.constant 0 : i32
    %0 = arith.cmpi eq, %arg1, %c0_i32 : i32
    %1 = arith.extui %0 : i1 to i32
    %c0_i32_0 = arith.constant 0 : i32
    %2 = arith.cmpi ne, %1, %c0_i32_0 : i32
    scf.if %2 {
      %c0_19 = arith.constant 0 : index
      %c0_20 = arith.constant 0 : index
      %31 = vector.load %arg6[%c0_19, %c0_20] : memref<1x128xf32, #tpu.memory_space<vmem>>, vector<1x128xf32>
      %32 = vector.shape_cast %31 : vector<1x128xf32> to vector<1x128xf32>
      %33 = vector.broadcast %32 : vector<1x128xf32> to vector<64x128xf32>
      %c0_21 = arith.constant 0 : index
      %c0_22 = arith.constant 0 : index
      %34 = vector.load %arg8[%c0_21, %c0_22] : memref<64x128xf32, #tpu.memory_space<vmem>>, vector<64x128xf32>
      tpu.vector_store %arg8[%c0_21, %c0_22], %33 {strides = array<i32>} : memref<64x128xf32, #tpu.memory_space<vmem>>, vector<64x128xf32>,
    } else {
    }
    %c0 = arith.constant 0 : index
    %c0_1 = arith.constant 0 : index
    %3 = vector.load %arg2[%c0, %c0_1] : memref<64x128xbf16, #tpu.memory_space<vmem>>, vector<64x128xbf16>
    %c0_2 = arith.constant 0 : index
    %c0_3 = arith.constant 0 : index
    %4 = vector.load %arg3[%c0_2, %c0_3] : memref<128x128xbf16, #tpu.memory_space<vmem>>, vector<128x128xbf16>
    %cst = arith.constant dense<0.000000e+00> : vector<64x128xf32>
    %5 = tpu.matmul %3, %4, %cst {dimension_numbers = #tpu.dot_dimension_numbers<[1], [0], [0], [1], [0, 0, 1, 1], [], []>} : vector<64x128xbf16>, vector<128x128xbf16>, vector<64x128xf32> -> vector<64x128xf32>
    %c0_4 = arith.constant 0 : index
    %c0_5 = arith.constant 0 : index
    %6 = vector.load %arg4[%c0_4, %c0_5] : memref<1x128xf32, #tpu.memory_space<vmem>>, vector<1x128xf32>
    %7 = vector.broadcast %6 : vector<1x128xf32> to vector<64x128xf32>
    %8 = arith.addf %5, %7 : vector<64x128xf32>
    %9 = arith.truncf %8 : vector<64x128xf32> to vector<64x128xbf16>
    %10 = arith.mulf %9, %9 : vector<64x128xbf16>
    %11 = arith.mulf %9, %10 : vector<64x128xbf16>
    %cst_6 = arith.constant 4.467770e-02 : bf16
    %12 = vector.broadcast %cst_6 : bf16 to vector<64x128xbf16>
    %13 = arith.mulf %12, %11 : vector<64x128xbf16>
    %14 = arith.addf %9, %13 : vector<64x128xbf16>
    %cst_7 = arith.constant 7.968750e-01 : bf16
    %15 = vector.broadcast %cst_7 : bf16 to vector<64x128xbf16>
    %16 = arith.mulf %15, %14 : vector<64x128xbf16>
    %17 = math.tanh %16 : vector<64x128xbf16>
    %cst_8 = arith.constant 1.000000e+00 : bf16
    %18 = vector.broadcast %cst_8 : bf16 to vector<64x128xbf16>
    %19 = arith.addf %18, %17 : vector<64x128xbf16>
    %cst_9 = arith.constant 5.000000e-01 : bf16
    %20 = vector.broadcast %cst_9 : bf16 to vector<64x128xbf16>
    %21 = arith.mulf %20, %19 : vector<64x128xbf16>
    %22 = arith.mulf %9, %21 : vector<64x128xbf16>
    %c0_10 = arith.constant 0 : index
    %c0_11 = arith.constant 0 : index
    %23 = vector.load %arg8[%c0_10, %c0_11] : memref<64x128xf32, #tpu.memory_space<vmem>>, vector<64x128xf32>
    %c0_12 = arith.constant 0 : index
    %c0_13 = arith.constant 0 : index
    %24 = vector.load %arg5[%c0_12, %c0_13] : memref<128x128xbf16, #tpu.memory_space<vmem>>, vector<128x128xbf16>
    %cst_14 = arith.constant dense<0.000000e+00> : vector<64x128xf32>
    %25 = tpu.matmul %22, %24, %cst_14 {dimension_numbers = #tpu.dot_dimension_numbers<[1], [0], [0], [1], [0, 0, 1, 1], [], []>} : vector<64x128xbf16>, vector<128x128xbf16>, vector<64x128xf32> -> vector<64x128xf32>
    %26 = arith.addf %23, %25 : vector<64x128xf32>
    %c0_15 = arith.constant 0 : index
    %c0_16 = arith.constant 0 : index
    %27 = vector.load %arg8[%c0_15, %c0_16] : memref<64x128xf32, #tpu.memory_space<vmem>>, vector<64x128xf32>
    tpu.vector_store %arg8[%c0_15, %c0_16], %26 {strides = array<i32>} : memref<64x128xf32, #tpu.memory_space<vmem>>, vector<64x128xf32>,
    %c0_i32_17 = arith.constant 0 : i32
    %28 = arith.cmpi eq, %arg1, %c0_i32_17 : i32
    %29 = arith.extui %28 : i1 to i32
    %c0_i32_18 = arith.constant 0 : i32
    %30 = arith.cmpi ne, %29, %c0_i32_18 : i32
    scf.if %30 {
      %c0_19 = arith.constant 0 : index
      %c0_20 = arith.constant 0 : index
      %31 = vector.load %arg8[%c0_19, %c0_20] : memref<64x128xf32, #tpu.memory_space<vmem>>, vector<64x128xf32>
      %c0_21 = arith.constant 0 : index
      %c0_22 = arith.constant 0 : index
      %32 = vector.load %arg7[%c0_21, %c0_22] : memref<64x128xf32, #tpu.memory_space<vmem>>, vector<64x128xf32>
      tpu.vector_store %arg7[%c0_21, %c0_22], %31 {strides = array<i32>} : memref<64x128xf32, #tpu.memory_space<vmem>>, vector<64x128xf32>,
    } else {
    }
    return
  }
  func.func @transform_0(%arg0: i32, %arg1: i32) -> (i32, i32) {
    %c0_i32 = arith.constant 0 : i32
    %c0_i32_0 = arith.constant 0 : i32
    return %arg0, %c0_i32 : i32, i32
  }
  func.func @transform_1(%arg0: i32, %arg1: i32) -> (i32, i32) {
    %c0_i32 = arith.constant 0 : i32
    %c0_i32_0 = arith.constant 0 : i32
    return %c0_i32, %arg1 : i32, i32
  }
  func.func @transform_2(%arg0: i32, %arg1: i32) -> (i32, i32) {
    %c0_i32 = arith.constant 0 : i32
    %c0_i32_0 = arith.constant 0 : i32
    return %c0_i32, %arg1 : i32, i32
  }
  func.func @transform_3(%arg0: i32, %arg1: i32) -> (i32, i32) {
    %c0_i32 = arith.constant 0 : i32
    %c0_i32_0 = arith.constant 0 : i32
    return %arg1, %c0_i32 : i32, i32
  }
  func.func @transform_4(%arg0: i32, %arg1: i32) -> (i32, i32) {
    %c0_i32 = arith.constant 0 : i32
    %c0_i32_0 = arith.constant 0 : i32
    %c0_i32_1 = arith.constant 0 : i32
    return %c0_i32, %c0_i32_0 : i32, i32
  }
  func.func @transform_5(%arg0: i32, %arg1: i32) -> (i32, i32) {
    %c0_i32 = arith.constant 0 : i32
    %c0_i32_0 = arith.constant 0 : i32
    return %arg0, %c0_i32 : i32, i32
  }
}

module attributes {stable_mosaic.version = 11 : i64} {
  func.func @_ffn_res_ln_kernel(%arg0: i32, %arg1: i32, %arg2: memref<64x128xbf16, #tpu.memory_space<vmem>>, %arg3: memref<128x256xbf16, #tpu.memory_space<vmem>>, %arg4: memref<1x256xf32, #tpu.memory_space<vmem>>, %arg5: memref<256x128xbf16, #tpu.memory_space<vmem>>, %arg6: memref<1x128xf32, #tpu.memory_space<vmem>>, %arg7: memref<1x128xf32, #tpu.memory_space<vmem>>, %arg8: memref<1x128xf32, #tpu.memory_space<vmem>>, %arg9: memref<64x128xbf16, #tpu.memory_space<vmem>>, %arg10: memref<64x128xf32, #tpu.memory_space<vmem>>) attributes {dimension_semantics = [#tpu.dimension_semantics<parallel>, #tpu.dimension_semantics<arbitrary>], iteration_bounds = array<i64: 2, 1>, scalar_prefetch = 0 : i64, scratch_operands = 1 : i64, tpu.core_type = #tpu.core_type<tc>, window_params = [{transform_indices = @transform_0, window_bounds = array<i64: 64, 128>}, {transform_indices = @transform_1, window_bounds = array<i64: 128, 256>}, {transform_indices = @transform_2, window_bounds = array<i64: 1, 256>}, {transform_indices = @transform_3, window_bounds = array<i64: 256, 128>}, {pipeline_mode = #tpu.pipeline_mode<synchronous>, transform_indices = @transform_4, window_bounds = array<i64: 1, 128>}, {pipeline_mode = #tpu.pipeline_mode<synchronous>, transform_indices = @transform_5, window_bounds = array<i64: 1, 128>}, {pipeline_mode = #tpu.pipeline_mode<synchronous>, transform_indices = @transform_6, window_bounds = array<i64: 1, 128>}, {transform_indices = @transform_7, window_bounds = array<i64: 64, 128>}]} {
    %c0_i32 = arith.constant 0 : i32
    %0 = arith.cmpi eq, %arg1, %c0_i32 : i32
    %1 = arith.extui %0 : i1 to i32
    %c0_i32_0 = arith.constant 0 : i32
    %2 = arith.cmpi ne, %1, %c0_i32_0 : i32
    scf.if %2 {
      %c0_19 = arith.constant 0 : index
      %c0_20 = arith.constant 0 : index
      %31 = vector.load %arg6[%c0_19, %c0_20] : memref<1x128xf32, #tpu.memory_space<vmem>>, vector<1x128xf32>
      %32 = vector.shape_cast %31 : vector<1x128xf32> to vector<1x128xf32>
      %33 = vector.broadcast %32 : vector<1x128xf32> to vector<64x128xf32>
      %c0_21 = arith.constant 0 : index
      %c0_22 = arith.constant 0 : index
      %34 = vector.load %arg10[%c0_21, %c0_22] : memref<64x128xf32, #tpu.memory_space<vmem>>, vector<64x128xf32>
      tpu.vector_store %arg10[%c0_21, %c0_22], %33 {strides = array<i32>} : memref<64x128xf32, #tpu.memory_space<vmem>>, vector<64x128xf32>,
    } else {
    }
    %c0 = arith.constant 0 : index
    %c0_1 = arith.constant 0 : index
    %3 = vector.load %arg2[%c0, %c0_1] : memref<64x128xbf16, #tpu.memory_space<vmem>>, vector<64x128xbf16>
    %c0_2 = arith.constant 0 : index
    %c0_3 = arith.constant 0 : index
    %4 = vector.load %arg3[%c0_2, %c0_3] : memref<128x256xbf16, #tpu.memory_space<vmem>>, vector<128x256xbf16>
    %cst = arith.constant dense<0.000000e+00> : vector<64x256xf32>
    %5 = tpu.matmul %3, %4, %cst {dimension_numbers = #tpu.dot_dimension_numbers<[1], [0], [0], [1], [0, 0, 1, 1], [], []>} : vector<64x128xbf16>, vector<128x256xbf16>, vector<64x256xf32> -> vector<64x256xf32>
    %c0_4 = arith.constant 0 : index
    %c0_5 = arith.constant 0 : index
    %6 = vector.load %arg4[%c0_4, %c0_5] : memref<1x256xf32, #tpu.memory_space<vmem>>, vector<1x256xf32>
    %7 = vector.broadcast %6 : vector<1x256xf32> to vector<64x256xf32>
    %8 = arith.addf %5, %7 : vector<64x256xf32>
    %9 = arith.truncf %8 : vector<64x256xf32> to vector<64x256xbf16>
    %10 = arith.mulf %9, %9 : vector<64x256xbf16>
    %11 = arith.mulf %9, %10 : vector<64x256xbf16>
    %cst_6 = arith.constant 4.467770e-02 : bf16
    %12 = vector.broadcast %cst_6 : bf16 to vector<64x256xbf16>
    %13 = arith.mulf %12, %11 : vector<64x256xbf16>
    %14 = arith.addf %9, %13 : vector<64x256xbf16>
    %cst_7 = arith.constant 7.968750e-01 : bf16
    %15 = vector.broadcast %cst_7 : bf16 to vector<64x256xbf16>
    %16 = arith.mulf %15, %14 : vector<64x256xbf16>
    %17 = math.tanh %16 : vector<64x256xbf16>
    %cst_8 = arith.constant 1.000000e+00 : bf16
    %18 = vector.broadcast %cst_8 : bf16 to vector<64x256xbf16>
    %19 = arith.addf %18, %17 : vector<64x256xbf16>
    %cst_9 = arith.constant 5.000000e-01 : bf16
    %20 = vector.broadcast %cst_9 : bf16 to vector<64x256xbf16>
    %21 = arith.mulf %20, %19 : vector<64x256xbf16>
    %22 = arith.mulf %9, %21 : vector<64x256xbf16>
    %c0_10 = arith.constant 0 : index
    %c0_11 = arith.constant 0 : index
    %23 = vector.load %arg10[%c0_10, %c0_11] : memref<64x128xf32, #tpu.memory_space<vmem>>, vector<64x128xf32>
    %c0_12 = arith.constant 0 : index
    %c0_13 = arith.constant 0 : index
    %24 = vector.load %arg5[%c0_12, %c0_13] : memref<256x128xbf16, #tpu.memory_space<vmem>>, vector<256x128xbf16>
    %cst_14 = arith.constant dense<0.000000e+00> : vector<64x128xf32>
    %25 = tpu.matmul %22, %24, %cst_14 {dimension_numbers = #tpu.dot_dimension_numbers<[1], [0], [0], [1], [0, 0, 1, 1], [], []>} : vector<64x256xbf16>, vector<256x128xbf16>, vector<64x128xf32> -> vector<64x128xf32>
    %26 = arith.addf %23, %25 : vector<64x128xf32>
    %c0_15 = arith.constant 0 : index
    %c0_16 = arith.constant 0 : index
    %27 = vector.load %arg10[%c0_15, %c0_16] : memref<64x128xf32, #tpu.memory_space<vmem>>, vector<64x128xf32>
    tpu.vector_store %arg10[%c0_15, %c0_16], %26 {strides = array<i32>} : memref<64x128xf32, #tpu.memory_space<vmem>>, vector<64x128xf32>,
    %c0_i32_17 = arith.constant 0 : i32
    %28 = arith.cmpi eq, %arg1, %c0_i32_17 : i32
    %29 = arith.extui %28 : i1 to i32
    %c0_i32_18 = arith.constant 0 : i32
    %30 = arith.cmpi ne, %29, %c0_i32_18 : i32
    scf.if %30 {
      %c0_19 = arith.constant 0 : index
      %c0_20 = arith.constant 0 : index
      %31 = vector.load %arg10[%c0_19, %c0_20] : memref<64x128xf32, #tpu.memory_space<vmem>>, vector<64x128xf32>
      %c0_21 = arith.constant 0 : index
      %c0_22 = arith.constant 0 : index
      %32 = vector.load %arg2[%c0_21, %c0_22] : memref<64x128xbf16, #tpu.memory_space<vmem>>, vector<64x128xbf16>
      %33 = arith.extf %32 : vector<64x128xbf16> to vector<64x128xf32>
      %34 = arith.addf %31, %33 : vector<64x128xf32>
      %cst_23 = arith.constant dense<0.000000e+00> : vector<64xf32>
      %35 = vector.multi_reduction <add>, %34, %cst_23 [1] : vector<64x128xf32> to vector<64xf32>
      %36 = vector.shape_cast %35 : vector<64xf32> to vector<64x1xf32>
      %cst_24 = arith.constant 1.280000e+02 : f32
      %37 = vector.broadcast %cst_24 : f32 to vector<64x1xf32>
      %38 = arith.divf %36, %37 : vector<64x1xf32>
      %39 = vector.broadcast %38 : vector<64x1xf32> to vector<64x128xf32>
      %40 = arith.subf %34, %39 : vector<64x128xf32>
      %41 = arith.mulf %40, %40 : vector<64x128xf32>
      %cst_25 = arith.constant dense<0.000000e+00> : vector<64xf32>
      %42 = vector.multi_reduction <add>, %41, %cst_25 [1] : vector<64x128xf32> to vector<64xf32>
      %43 = vector.shape_cast %42 : vector<64xf32> to vector<64x1xf32>
      %cst_26 = arith.constant 1.280000e+02 : f32
      %44 = vector.broadcast %cst_26 : f32 to vector<64x1xf32>
      %45 = arith.divf %43, %44 : vector<64x1xf32>
      %46 = vector.broadcast %38 : vector<64x1xf32> to vector<64x128xf32>
      %47 = arith.subf %34, %46 : vector<64x128xf32>
      %cst_27 = arith.constant 9.99999974E-6 : f32
      %48 = vector.broadcast %cst_27 : f32 to vector<64x1xf32>
      %49 = arith.addf %45, %48 : vector<64x1xf32>
      %50 = math.rsqrt %49 : vector<64x1xf32>
      %51 = vector.broadcast %50 : vector<64x1xf32> to vector<64x128xf32>
      %52 = arith.mulf %47, %51 : vector<64x128xf32>
      %c0_28 = arith.constant 0 : index
      %c0_29 = arith.constant 0 : index
      %53 = vector.load %arg7[%c0_28, %c0_29] : memref<1x128xf32, #tpu.memory_space<vmem>>, vector<1x128xf32>
      %54 = vector.broadcast %53 : vector<1x128xf32> to vector<64x128xf32>
      %55 = arith.mulf %52, %54 : vector<64x128xf32>
      %c0_30 = arith.constant 0 : index
      %c0_31 = arith.constant 0 : index
      %56 = vector.load %arg8[%c0_30, %c0_31] : memref<1x128xf32, #tpu.memory_space<vmem>>, vector<1x128xf32>
      %57 = vector.broadcast %56 : vector<1x128xf32> to vector<64x128xf32>
      %58 = arith.addf %55, %57 : vector<64x128xf32>
      %59 = arith.truncf %58 : vector<64x128xf32> to vector<64x128xbf16>
      %c0_32 = arith.constant 0 : index
      %c0_33 = arith.constant 0 : index
      %60 = vector.load %arg9[%c0_32, %c0_33] : memref<64x128xbf16, #tpu.memory_space<vmem>>, vector<64x128xbf16>
      tpu.vector_store %arg9[%c0_32, %c0_33], %59 {strides = array<i32>} : memref<64x128xbf16, #tpu.memory_space<vmem>>, vector<64x128xbf16>,
    } else {
    }
    return
  }
  func.func @transform_0(%arg0: i32, %arg1: i32) -> (i32, i32) {
    %c0_i32 = arith.constant 0 : i32
    %c0_i32_0 = arith.constant 0 : i32
    return %arg0, %c0_i32 : i32, i32
  }
  func.func @transform_1(%arg0: i32, %arg1: i32) -> (i32, i32) {
    %c0_i32 = arith.constant 0 : i32
    %c0_i32_0 = arith.constant 0 : i32
    return %c0_i32, %arg1 : i32, i32
  }
  func.func @transform_2(%arg0: i32, %arg1: i32) -> (i32, i32) {
    %c0_i32 = arith.constant 0 : i32
    %c0_i32_0 = arith.constant 0 : i32
    return %c0_i32, %arg1 : i32, i32
  }
  func.func @transform_3(%arg0: i32, %arg1: i32) -> (i32, i32) {
    %c0_i32 = arith.constant 0 : i32
    %c0_i32_0 = arith.constant 0 : i32
    return %arg1, %c0_i32 : i32, i32
  }
  func.func @transform_4(%arg0: i32, %arg1: i32) -> (i32, i32) {
    %c0_i32 = arith.constant 0 : i32
    %c0_i32_0 = arith.constant 0 : i32
    %c0_i32_1 = arith.constant 0 : i32
    return %c0_i32, %c0_i32_0 : i32, i32
  }
  func.func @transform_5(%arg0: i32, %arg1: i32) -> (i32, i32) {
    %c0_i32 = arith.constant 0 : i32
    %c0_i32_0 = arith.constant 0 : i32
    %c0_i32_1 = arith.constant 0 : i32
    return %c0_i32, %c0_i32_0 : i32, i32
  }
  func.func @transform_6(%arg0: i32, %arg1: i32) -> (i32, i32) {
    %c0_i32 = arith.constant 0 : i32
    %c0_i32_0 = arith.constant 0 : i32
    %c0_i32_1 = arith.constant 0 : i32
    return %c0_i32, %c0_i32_0 : i32, i32
  }
  func.func @transform_7(%arg0: i32, %arg1: i32) -> (i32, i32) {
    %c0_i32 = arith.constant 0 : i32
    %c0_i32_0 = arith.constant 0 : i32
    return %arg0, %c0_i32 : i32, i32
  }
}

</mosaic_0001>

<bundles_post_ra>
// kernel: mul.44
= control target key start
LH: loop header
LB: loop body
LE: loop exit
PB: predicated region body
PF: predicated region fallthrough
CT: control target
= control target key end

     0   :  { %s69_s10 = smov 56   ;;  %s70_s11 = smov 40   ;;  %vm3_vm0 = vcmask 64512   ;;  %vm9_vm1 = vcmask 523712   ;;  %vm15_vm2 = vcmask 458112   ;;  %vm21_vm3 = vcmask 392512   ;;  %s113_s0 = inlined_call_operand.vmem [shape: f32[8,8], index: 0, kind: input, shape index: {}]   ;;  %s114_s1 = inlined_call_operand.vmem [shape: f32[64], index: 1, kind: output, shape index: {}]  }
   0x1   :  { %v55_v0 = vld [vmem:[%s113_s0 + $0x7] sm:$0x1]   ;;  %v57_v1 = vld [vmem:[%s113_s0 + $0x5] sm:$0x1]   ;;  %v56_v2 = vld [vmem:[%s113_s0 + $0x6] sm:$0x1]  }
   0x2   :  { %7 = vrot.lane.b32.xlu0 %v55_v0, %s69_s10  ;;  %19 = vrot.lane.b32.xlu1 %v57_v1, %s70_s11  ;;  %v58_v3 = vld [vmem:[%s113_s0 + $0x4] sm:$0x1]   ;;  %v2_v4 = vld [vmem:[%s113_s0] sm:$0x1]   ;;  %s71_s18 = smov 48   ;;  %s72_s19 = smov 32  }
   0x3   :  { %4 = vst.msk [vmem:[#allocation0] sm:$0x1] %vm3_vm0, %v2_v4   ;;  %v59_v5 = vld [vmem:[%s113_s0 + $0x3] sm:$0x1]   ;;  %v60_v6 = vld [vmem:[%s113_s0 + $0x2] sm:$0x1]  }
   0x4   :  { %s73_s24 = smov 24   ;;  %s74_s25 = smov 16   ;;  %v61_v7 = vld [vmem:[%s113_s0 + $0x1] sm:$0x1]   ;;  %vm27_vm4 = vcmask 326912   ;;  %vm33_vm5 = vcmask 261312  }
   0x5   :  { %s75_s0 = smov 8   ;;  %vm39_vm6 = vcmask 195712   ;;  %vm45_vm7 = vcmask 130112  }
   0x6   :  { %13 = vrot.lane.b32.xlu0 %v56_v2, %s71_s18  ;;  %25 = vrot.lane.b32.xlu1 %v58_v3, %s72_s19 }
   0xa   :  { %31 = vrot.lane.b32.xlu0 %v59_v5, %s73_s24  ;;  %37 = vrot.lane.b32.xlu1 %v60_v6, %s74_s25 }
   0xe   :  { %43 = vrot.lane.b32.xlu0 %v61_v7, %s75_s0 }
  0x74   :  { %v8_v8 = vpop.permute.xlu0 %7   ;;  %v20_v9 = vpop.permute.xlu1 %19  }
  0x75   :  { %10 = vst.msk [vmem:[#allocation0] sm:$0x1] %vm9_vm1, %v8_v8  }
  0x78   :  { %v14_v10 = vpop.permute.xlu0 %13   ;;  %v26_v11 = vpop.permute.xlu1 %25  }
  0x79   :  { %16 = vst.msk [vmem:[#allocation0] sm:$0x1] %vm15_vm2, %v14_v10  }
  0x7a   :  { %22 = vst.msk [vmem:[#allocation0] sm:$0x1] %vm21_vm3, %v20_v9  }
  0x7b   :  { %28 = vst.msk [vmem:[#allocation0] sm:$0x1] %vm27_vm4, %v26_v11  }
  0x7c   :  { %v32_v12 = vpop.permute.xlu0 %31   ;;  %v38_v13 = vpop.permute.xlu1 %37  }
  0x7d   :  { %34 = vst.msk [vmem:[#allocation0] sm:$0x1] %vm33_vm5, %v32_v12  }
  0x7e   :  { %40 = vst.msk [vmem:[#allocation0] sm:$0x1] %vm39_vm6, %v38_v13  }
  0x80   :  { %v44_v14 = vpop.permute.xlu0 %43  }
  0x81   :  { %46 = vst.msk [vmem:[#allocation0] sm:$0x1] %vm45_vm7, %v44_v14  }
  0x88   :  { %v51_v15 = vld [vmem:[#allocation0] sm:$0x1] }
  0x89   :  { %54 = vst [vmem:[%s114_s1] sm:$0x1] %v51_v15 }

// kernel: microdit_forward.18
= control target key start
LH: loop header
LB: loop body
LE: loop exit
PB: predicated region body
PF: predicated region fallthrough
CT: control target
= control target key end

     0   :  { %vm122_vm0 = vcmask 130048   ;;  %s477_s1 = inlined_call_operand.vmem [shape: bf16[16,128], index: 1, kind: input, shape index: {}]   ;;  %s478_s0 = inlined_call_operand.vmem [shape: bf16[128,16], index: 0, kind: input, shape index: {}]   ;;  %s479_s2 = inlined_call_operand.vmem [shape: f32[1,128], index: 2, kind: input, shape index: {}]   ;;  %s480_s3 = inlined_call_operand.vmem [shape: f32[128,128], index: 3, kind: output, shape index: {}]  }
   0x1   :  { %v362_v0 = vld [vmem:[%s477_s1] sm:$0xff]   ;;  %v365_v3 = vld [vmem:[%s478_s0 + $0x8] sm:$0xff]   ;;  %v367_v5 = vld [vmem:[%s478_s0 + $0x10] sm:$0xff]  }
   0x2   :  { %v363_v1 = vld [vmem:[%s478_s0] sm:$0xff]   ;;  %342 = vmatprep.subr.bf16.mxu0 %v362_v0  ;;  %360 = vmatprep.subr.bf16.mxu1 %v362_v0  ;;  %v366_v4 = vld [vmem:[%s478_s0 + $0x28] sm:$0xff]   ;;  %v368_v6 = vld [vmem:[%s478_s0 + $0x30] sm:$0xff]  }
   0x3   :  { %v364_v2 = vld [vmem:[%s478_s0 + $0x20] sm:$0xff]   ;;  %343 = vmatpush3.bf16.msra.mxu0 %v362_v0  ;;  %361 = vmatpush3.bf16.msra.mxu1 %v362_v0  ;;  %v369_v7 = vld [vmem:[%s478_s0 + $0x18] sm:$0xff]  }
   0x4   :  { %344 = vmatprep.mubr.msk.bf16.mxu0 %vm122_vm0, %v363_v1  ;;  %352 = vmatprep.mubr.msk.bf16.mxu1 %vm122_vm0, %v364_v2  ;;  %v370_v8 = vld [vmem:[%s478_s0 + $0x38] sm:$0xff]   ;;  %v315_v9 = vld [vmem:[%s479_s2] ss:$0 sm:$0xff] }
   0x6   :  { %345 = vmatmul.mubr.msk.bf16.vlgmr.msra.gmra.mxu0 %vm122_vm0, %v365_v3  ;;  %353 = vmatmul.mubr.msk.bf16.vlgmr.msra.gmra.mxu1 %vm122_vm0, %v366_v4 }
   0x7   :  { %348 = vmatprep.mubr.msk.bf16.mxu0 %vm122_vm0, %v367_v5  ;;  %356 = vmatprep.mubr.msk.bf16.mxu1 %vm122_vm0, %v368_v6 }
   0xe   :  { %349 = vmatmul.mubr.msk.bf16.gmra.mxu0 %vm122_vm0, %v369_v7  ;;  %357 = vmatmul.mubr.msk.bf16.gmra.mxu1 %vm122_vm0, %v370_v8 }
  0xc6   :  { %v346_v10 = vpop.f32.mrf.mxu0  ;;  %v354_v11 = vpop.f32.mrf.mxu1 }
  0xc7   :  { %v246_v12 = vadd.f32 %v346_v10, %v315_v9  ;;  %v254_v13 = vadd.f32 %v354_v11, %v315_v9 }
  0xc8   :  { %v181_v14 = vpop.f32.mrf.mxu0  ;;  %v213_v15 = vpop.f32.mrf.mxu1 }
  0xc9   :  { %297 = vst [vmem:[%s480_s3 + $0x10] sm:$0xff] %v246_v12  ;;  %305 = vst [vmem:[%s480_s3 + $0x50] sm:$0xff] %v254_v13  ;;  %v244_v16 = vadd.f32 %v315_v9, %v181_v14  ;;  %v252_v17 = vadd.f32 %v315_v9, %v213_v15 }
  0xca   :  { %v347_v18 = vpop.f32.mrf.mxu0  ;;  %v355_v19 = vpop.f32.mrf.mxu1 }
  0xcb   :  { %295 = vst [vmem:[%s480_s3] sm:$0xff] %v244_v16  ;;  %303 = vst [vmem:[%s480_s3 + $0x40] sm:$0xff] %v252_v17  ;;  %v247_v20 = vadd.f32 %v347_v18, %v315_v9  ;;  %v255_v21 = vadd.f32 %v355_v19, %v315_v9 }
  0xcc   :  { %v184_v22 = vpop.f32.mrf.mxu0  ;;  %v216_v23 = vpop.f32.mrf.mxu1 }
  0xcd   :  { %298 = vst [vmem:[%s480_s3 + $0x18] sm:$0xff] %v247_v20  ;;  %306 = vst [vmem:[%s480_s3 + $0x58] sm:$0xff] %v255_v21  ;;  %v245_v24 = vadd.f32 %v315_v9, %v184_v22  ;;  %v253_v25 = vadd.f32 %v315_v9, %v216_v23 }
  0xce   :  { %v350_v26 = vpop.f32.mrf.mxu0  ;;  %v358_v27 = vpop.f32.mrf.mxu1 }
  0xcf   :  { %296 = vst [vmem:[%s480_s3 + $0x8] sm:$0xff] %v245_v24  ;;  %304 = vst [vmem:[%s480_s3 + $0x48] sm:$0xff] %v253_v25  ;;  %v250_v28 = vadd.f32 %v350_v26, %v315_v9  ;;  %v258_v29 = vadd.f32 %v358_v27, %v315_v9 }
  0xd0   :  { %v197_v30 = vpop.f32.mrf.mxu0  ;;  %v229_v31 = vpop.f32.mrf.mxu1 }
  0xd1   :  { %301 = vst [vmem:[%s480_s3 + $0x30] sm:$0xff] %v250_v28  ;;  %309 = vst [vmem:[%s480_s3 + $0x70] sm:$0xff] %v258_v29  ;;  %v248_v32 = vadd.f32 %v315_v9, %v197_v30  ;;  %v256_v33 = vadd.f32 %v315_v9, %v229_v31 }
  0xd2   :  { %v351_v34 = vpop.f32.mrf.mxu0  ;;  %v359_v35 = vpop.f32.mrf.mxu1 }
  0xd3   :  { %299 = vst [vmem:[%s480_s3 + $0x20] sm:$0xff] %v248_v32  ;;  %307 = vst [vmem:[%s480_s3 + $0x60] sm:$0xff] %v256_v33  ;;  %v251_v36 = vadd.f32 %v351_v34, %v315_v9  ;;  %v259_v37 = vadd.f32 %v359_v35, %v315_v9 }
  0xd4   :  { %v200_v38 = vpop.f32.mrf.mxu0  ;;  %v232_v39 = vpop.f32.mrf.mxu1 }
  0xd5   :  { %302 = vst [vmem:[%s480_s3 + $0x38] sm:$0xff] %v251_v36  ;;  %310 = vst [vmem:[%s480_s3 + $0x78] sm:$0xff] %v259_v37  ;;  %v249_v40 = vadd.f32 %v315_v9, %v200_v38  ;;  %v257_v41 = vadd.f32 %v315_v9, %v232_v39 }
  0xd7   :  { %300 = vst [vmem:[%s480_s3 + $0x28] sm:$0xff] %v249_v40  ;;  %308 = vst [vmem:[%s480_s3 + $0x68] sm:$0xff] %v257_v41 }

// kernel: microdit_forward.19
= control target key start
LH: loop header
LB: loop body
LE: loop exit
PB: predicated region body
PF: predicated region fallthrough
CT: control target
= control target key end

     0   :  { %s1245_s12 = smov 0   ;;  %s1247_s13 = smov 0   ;;  %s1404_s0 = inlined_call_operand.vmem [shape: bf16[128,128], index: 0, kind: input, shape index: {}]   ;;  %s1405_s1 = inlined_call_operand.vmem [shape: bf16[128,384], index: 1, kind: input, shape index: {}]   ;;  %s1406_s2 = inlined_call_operand.vmem [shape: f32[1,384], index: 2, kind: input, shape index: {}]   ;;  %s1407_s3 = inlined_call_operand.vmem [shape: bf16[128,384], index: 3, kind: output, shape index: {}]  }
   0x1   :  { %s1249_s14 = smov 0   ;;  %s1251_s15 = smov 0  }
   0x2   :  { %s1253_s16 = smov 0  }
   0x3 LB: > { %s28_s17 = sadd.s32 1, %s1219_s15  ;;  %s955_s18 = sadd.s32 4294967295, %s1223_s16   ;;  %s1223_s16 = sphi %s1253_s16, %s13_s16   ;;  %s1219_s15 = sphi %s1251_s15, %s1412_s15   ;;  %s1215_s14 = sphi %s1249_s14, %s1411_s14   ;;  %s1211_s13 = sphi %s1247_s13, %s1410_s13   ;;  %s1207_s12 = sphi %s1245_s12, %s1409_s12  }
   0x4   : > { %p30_p0 = scmp.ge.s32.totalorder %s28_s17, 3  ;;  %p76_p1 = scmp.ne.s32.totalorder %s1211_s13, %s1207_s12 }
   0x5   : > { %p77_p2 = scmp.eq.s32.totalorder %s1223_s16, 0  ;;  %p134_p4 = scmp.eq.s32.totalorder %s955_s18, 2 }
   0x6   : > { %s1414_s17 = smov (%p30_p0, %s28_s17), 0  ;;  %s69_s20 = sadd.s32 1, %s1211_s13 }
   0x7   : > { %p78_p3 = por %p77_p2, %p76_p1  ;;  %s65_s19 = ssub.s32 %s1219_s15, %s1414_s17 }
   0x8   : > { %p67_p5 = scmp.eq.s32.totalorder %s65_s19, 0  ;;  %p1280_p6 = por %p134_p4, %p76_p1 }
   0x9   : > { %p959_p7 = scmp.ge.s32.totalorder %s1223_s16, 3 }
   0xa   : > { %s1285_s22 = scalar_select %p67_p5, %s1211_s13, %s69_s20  }
   0xb   : > { %168 = sbr.rel (%p959_p7) target bundleno = 30 (0x1e), region = 20 }
  0x10   : > { %171 = sbr.rel (!%p78_p3) target bundleno = 30 (0x1e), region = 24  ;;  %s173_s23 = sand.u32 (%p78_p3), 1, %s1211_s13  }
  0x11   : > { %s961_s24 = sshll.u32 (%p78_p3), %s1219_s15, 2  ;;  %s960_s25 = sshll.u32 (%p78_p3), %s173_s23, 6 }
  0x12   : > { %s1293_s28 = scalar_lea.vmem (%p78_p3), %s1405_s1, %s961_s24  ;;  %s175_s29 = scalar_lea.vmem (%p78_p3), [#allocation3], %s960_s25 }
  0x13   : > { %v197_v0 = vld [vmem:[%s1293_s28] sm:$0xf] (%p78_p3)  ;;  %v199_v1 = vld [vmem:[%s1293_s28 + $0xc] sm:$0xf] (%p78_p3)  ;;  %v201_v2 = vld [vmem:[%s1293_s28 + $0x18] sm:$0xf] (%p78_p3) }
  0x14   : > { %198 = vst [vmem:[%s175_s29] sm:$0xf] (%p78_p3), %v197_v0  ;;  %200 = vst [vmem:[%s175_s29 + $0x4] sm:$0xf] (%p78_p3), %v199_v1  ;;  %v203_v3 = vld [vmem:[%s1293_s28 + $0x24] sm:$0xf] (%p78_p3) }
  0x15   : > { %v205_v4 = vld [vmem:[%s1293_s28 + $0x30] sm:$0xf]  ;;  %202 = vst [vmem:[%s175_s29 + $0x8] sm:$0xf] %v201_v2  ;;  %204 = vst [vmem:[%s175_s29 + $0xc] sm:$0xf] %v203_v3 }
  0x16   : > { %206 = vst [vmem:[%s175_s29 + $0x10] sm:$0xf] %v205_v4  ;;  %v207_v5 = vld [vmem:[%s1293_s28 + $0x3c] sm:$0xf]  ;;  %v209_v6 = vld [vmem:[%s1293_s28 + $0x48] sm:$0xf] }
  0x17   : > { %v211_v7 = vld [vmem:[%s1293_s28 + $0x54] sm:$0xf]  ;;  %208 = vst [vmem:[%s175_s29 + $0x14] sm:$0xf] %v207_v5  ;;  %210 = vst [vmem:[%s175_s29 + $0x18] sm:$0xf] %v209_v6 }
  0x18   : > { %212 = vst [vmem:[%s175_s29 + $0x1c] sm:$0xf] %v211_v7  ;;  %v213_v8 = vld [vmem:[%s1293_s28 + $0x60] sm:$0xf]  ;;  %v215_v9 = vld [vmem:[%s1293_s28 + $0x6c] sm:$0xf] }
  0x19   : > { %v217_v10 = vld [vmem:[%s1293_s28 + $0x78] sm:$0xf]  ;;  %214 = vst [vmem:[%s175_s29 + $0x20] sm:$0xf] %v213_v8  ;;  %216 = vst [vmem:[%s175_s29 + $0x24] sm:$0xf] %v215_v9 }
  0x1a   : > { %218 = vst [vmem:[%s175_s29 + $0x28] sm:$0xf] %v217_v10  ;;  %v219_v11 = vld [vmem:[%s1293_s28 + $0x84] sm:$0xf]  ;;  %v221_v12 = vld [vmem:[%s1293_s28 + $0x90] sm:$0xf] }
  0x1b   : > { %v223_v13 = vld [vmem:[%s1293_s28 + $0x9c] sm:$0xf]  ;;  %220 = vst [vmem:[%s175_s29 + $0x2c] sm:$0xf] %v219_v11  ;;  %222 = vst [vmem:[%s175_s29 + $0x30] sm:$0xf] %v221_v12 }
  0x1c   : > { %224 = vst [vmem:[%s175_s29 + $0x34] sm:$0xf] %v223_v13  ;;  %v225_v14 = vld [vmem:[%s1293_s28 + $0xa8] sm:$0xf]  ;;  %v227_v15 = vld [vmem:[%s1293_s28 + $0xb4] sm:$0xf] }
  0x1d   : > { %226 = vst [vmem:[%s175_s29 + $0x38] sm:$0xf] %v225_v14  ;;  %228 = vst [vmem:[%s175_s29 + $0x3c] sm:$0xf] %v227_v15 }
  0x1e PF: > { %p962_p8 = scmp.ge.s32.totalorder %s1223_s16, 1  ;;  %p289_p9 = scmp.lt.s32.totalorder %s1223_s16, 4 }
  0x20   : > { %p290_p10 = pnand %p962_p8, %p289_p9 }
  0x21   : > { %s296_s30 = sand.u32 (!%p290_p10), 1, %s1207_s12   ;;  %p339_p11 = scmp.lt.s32.totalorder (!%p290_p10), %s1215_s14, 2 }
  0x22   : > { %293 = sbr.rel (%p290_p10) target bundleno = 295 (0x127), region = 69  ;;  %s1317_s6 = sshll.u32 (!%p290_p10), %s296_s30, 6 }
  0x23   : > { %s1323_s9 = scalar_lea.vmem (!%p290_p10), [#allocation3], %s1317_s6  ;;  %s1357_s7 = scalar_lea.vmem (!%p290_p10), [#allocation4], %s1317_s6 }
  0x27   : > { %v1177_v16 = vld [vmem:[%s1404_s0] sm:$0xff]   ;;  %v1169_v18 = vld [vmem:[%s1323_s9 + $0x38] sm:$0xff]   ;;  %v1170_v19 = vld [vmem:[%s1323_s9 + $0x30] sm:$0xff]   ;;  %s340_s29 = scalar_select %p339_p11, %s1215_s14, 2 }
  0x28   : > { %v1178_v17 = vld [vmem:[%s1404_s0 + $0x20] sm:$0xff]   ;;  %1097 = vmatprep.mubr.bf16.mxu0 %v1177_v16  ;;  %1081 = vmatprep.subr.bf16.mxu0 %v1169_v18  ;;  %v1171_v20 = vld [vmem:[%s1323_s9 + $0x28] sm:$0xff]   ;;  %v1173_v22 = vld [vmem:[%s1323_s9 + $0x18] sm:$0xff]   ;;  %s999_s6 = sshll.u32 (%p1280_p6), %s1215_s14, 2 }
  0x29   : > { %1105 = vmatprep.mubr.bf16.mxu1 %v1178_v17  ;;  %1113 = vmatprep.subr.bf16.mxu1 %v1169_v18  ;;  %v1172_v21 = vld [vmem:[%s1323_s9 + $0x20] sm:$0xff]   ;;  %v1174_v23 = vld [vmem:[%s1323_s9 + $0x10] sm:$0xff]   ;;  %v1175_v24 = vld [vmem:[%s1323_s9 + $0x8] sm:$0xff]   ;;  %s341_s5 = scalar_lea.vmem %s1406_s2, %s340_s29  ;;  %s754_s10 = scalar_lea.vmem (%p1280_p6), %s1407_s3, %s999_s6 }
  0x2a   : > { %1082 = vmatpush3.bf16.msra.mxu0 %v1169_v18  ;;  %1121 = vmatpush3.bf16.msra.mxu1 %v1169_v18  ;;  %v1176_v25 = vld [vmem:[%s1323_s9] sm:$0xff]   ;;  %v1179_v26 = vld [vmem:[%s1404_s0 + $0x8] sm:$0xff]   ;;  %v1181_v28 = vld [vmem:[%s1404_s0 + $0x10] sm:$0xff]  }
  0x2b   : > { %1083 = vmatprep.subr.bf16.mxu0 %v1170_v19  ;;  %1114 = vmatprep.subr.bf16.mxu1 %v1170_v19  ;;  %v1180_v27 = vld [vmem:[%s1404_s0 + $0x28] sm:$0xff]   ;;  %v1182_v29 = vld [vmem:[%s1404_s0 + $0x30] sm:$0xff]   ;;  %v1183_v30 = vld [vmem:[%s1404_s0 + $0x18] sm:$0xff]  }
  0x2c   : > { %v1184_v31 = vld [vmem:[%s1404_s0 + $0x38] sm:$0xff]   ;;  %v965_v34 = vld [vmem:[%s341_s5] ss:$0 sm:$0xff] }
  0x2e   : > { %1084 = vmatpush3.bf16.msra.mxu0 %v1170_v19  ;;  %1122 = vmatpush3.bf16.msra.mxu1 %v1170_v19 }
  0x2f   : > { %1085 = vmatprep.subr.bf16.mxu0 %v1171_v20  ;;  %1115 = vmatprep.subr.bf16.mxu1 %v1171_v20 }
  0x32   : > { %1086 = vmatpush3.bf16.msra.mxu0 %v1171_v20  ;;  %1123 = vmatpush3.bf16.msra.mxu1 %v1171_v20 }
  0x33   : > { %1087 = vmatprep.subr.bf16.mxu0 %v1172_v21  ;;  %1116 = vmatprep.subr.bf16.mxu1 %v1172_v21 }
  0x36   : > { %1088 = vmatpush3.bf16.msra.mxu0 %v1172_v21  ;;  %1124 = vmatpush3.bf16.msra.mxu1 %v1172_v21 }
  0x37   : > { %1089 = vmatprep.subr.bf16.mxu0 %v1173_v22  ;;  %1117 = vmatprep.subr.bf16.mxu1 %v1173_v22 }
  0x3a   : > { %1090 = vmatpush3.bf16.msra.mxu0 %v1173_v22  ;;  %1125 = vmatpush3.bf16.msra.mxu1 %v1173_v22 }
  0x3b   : > { %1091 = vmatprep.subr.bf16.mxu0 %v1174_v23  ;;  %1118 = vmatprep.subr.bf16.mxu1 %v1174_v23 }
  0x3e   : > { %1092 = vmatpush3.bf16.msra.mxu0 %v1174_v23  ;;  %1126 = vmatpush3.bf16.msra.mxu1 %v1174_v23 }
  0x3f   : > { %1093 = vmatprep.subr.bf16.mxu0 %v1175_v24  ;;  %1119 = vmatprep.subr.bf16.mxu1 %v1175_v24 }
  0x42   : > { %1094 = vmatpush3.bf16.msra.mxu0 %v1175_v24  ;;  %1127 = vmatpush3.bf16.msra.mxu1 %v1175_v24 }
  0x43   : > { %1095 = vmatprep.subr.bf16.mxu0 %v1176_v25  ;;  %1120 = vmatprep.subr.bf16.mxu1 %v1176_v25 }
  0x46   : > { %1096 = vmatpush3.bf16.msra.mxu0 %v1176_v25  ;;  %1128 = vmatpush3.bf16.msra.mxu1 %v1176_v25 }
  0x49   : > { %1098 = vmatmul.mubr.bf16.vlgmr.msra.gmra.mxu0 %v1179_v26  ;;  %1106 = vmatmul.mubr.bf16.vlgmr.msra.gmra.mxu1 %v1180_v27 }
  0x4a   : > { %1101 = vmatprep.mubr.bf16.mxu0 %v1181_v28  ;;  %1109 = vmatprep.mubr.bf16.mxu1 %v1182_v29 }
  0x51   : > { %1102 = vmatmul.mubr.bf16.gmra.mxu0 %v1183_v30  ;;  %1110 = vmatmul.mubr.bf16.gmra.mxu1 %v1184_v31 }
 0x109   : > { %v1099_v32 = vpop.f32.mrf.mxu0  ;;  %v1107_v33 = vpop.f32.mrf.mxu1 }
 0x10a   : > { %v614_v39 = vadd.f32 %v1099_v32, %v965_v34  ;;  %v622_v40 = vadd.f32 %v1107_v33, %v965_v34 }
 0x10b   : > { %v549_v35 = vpop.f32.mrf.mxu0  ;;  %v581_v36 = vpop.f32.mrf.mxu1 }
 0x10c   : > { %v612_v43 = vadd.f32 %v965_v34, %v549_v35  ;;  %v620_v44 = vadd.f32 %v965_v34, %v581_v36 }
 0x10d   : > { %v1100_v37 = vpop.f32.mrf.mxu0  ;;  %v1108_v38 = vpop.f32.mrf.mxu1 }
 0x10e   : > { %v615_v41 = vadd.f32 %v1100_v37, %v965_v34  ;;  %v623_v42 = vadd.f32 %v1108_v38, %v965_v34 }
 0x10f   : > { %v552_v45 = vpop.f32.mrf.mxu0  ;;  %v584_v46 = vpop.f32.mrf.mxu1 }
 0x110   : > { %v1026_v47 = vpack.c.bf16 %v615_v41, %v614_v39  ;;  %v1046_v48 = vpack.c.bf16 %v623_v42, %v622_v40  ;;  %v613_v49 = vadd.f32 %v965_v34, %v552_v45  ;;  %v621_v50 = vadd.f32 %v965_v34, %v584_v46 }
 0x111   : > { %v1103_v51 = vpop.f32.mrf.mxu0  ;;  %v1111_v52 = vpop.f32.mrf.mxu1 }
 0x112   : > { %1058 = vst [vmem:[%s1357_s7 + $0x8] sm:$0xff] %v1026_v47   ;;  %1062 = vst [vmem:[%s1357_s7 + $0x28] sm:$0xff] %v1046_v48   ;;  %v1021_v53 = vpack.c.bf16 %v613_v49, %v612_v43  ;;  %v1041_v54 = vpack.c.bf16 %v621_v50, %v620_v44  ;;  %v618_v59 = vadd.f32 %v1103_v51, %v965_v34 }
 0x113   : > { %v565_v55 = vpop.f32.mrf.mxu0  ;;  %v597_v56 = vpop.f32.mrf.mxu1  ;;  %v626_v60 = vadd.f32 %v1111_v52, %v965_v34 }
 0x114   : > { %1022 = vst [vmem:[%s1357_s7] sm:$0xff] %v1021_v53   ;;  %1061 = vst [vmem:[%s1357_s7 + $0x20] sm:$0xff] %v1041_v54   ;;  %v616_v63 = vadd.f32 %v965_v34, %v565_v55  ;;  %v624_v0 = vadd.f32 %v965_v34, %v597_v56 }
 0x115   : > { %v1104_v57 = vpop.f32.mrf.mxu0  ;;  %v1112_v58 = vpop.f32.mrf.mxu1 }
 0x116   : > { %v619_v61 = vadd.f32 %v1104_v57, %v965_v34  ;;  %v627_v62 = vadd.f32 %v1112_v58, %v965_v34 }
 0x117   : > { %v568_v1 = vpop.f32.mrf.mxu0  ;;  %v600_v2 = vpop.f32.mrf.mxu1 }
 0x118   : > { %v1036_v3 = vpack.c.bf16 %v619_v61, %v618_v59  ;;  %v1056_v4 = vpack.c.bf16 %v627_v62, %v626_v60  ;;  %v617_v5 = vadd.f32 %v965_v34, %v568_v1  ;;  %v625_v6 = vadd.f32 %v965_v34, %v600_v2  ;;  %749 = sbr.rel (!%p1280_p6) target bundleno = 295 (0x127), region = 85 }
 0x119   : > { %v775_v11 = vld [vmem:[%s1357_s7 + $0x8] sm:$0xf] (%p1280_p6)  ;;  %v777_v12 = vld [vmem:[%s1357_s7 + $0xc] sm:$0xf] (%p1280_p6) }
 0x11a   : > { %1060 = vst [vmem:[%s1357_s7 + $0x18] sm:$0xff] %v1036_v3   ;;  %1064 = vst [vmem:[%s1357_s7 + $0x38] sm:$0xff] %v1056_v4   ;;  %v1031_v7 = vpack.c.bf16 %v617_v5, %v616_v63  ;;  %v1051_v8 = vpack.c.bf16 %v625_v6, %v624_v0  ;;  %v791_v19 = vld [vmem:[%s1357_s7 + $0x28] sm:$0xf] (%p1280_p6)  ;;  %v793_v20 = vld [vmem:[%s1357_s7 + $0x2c] sm:$0xf] (%p1280_p6) }
 0x11b   : > { %v771_v9 = vld [vmem:[%s1357_s7] sm:$0xf] (%p1280_p6)  ;;  %v773_v10 = vld [vmem:[%s1357_s7 + $0x4] sm:$0xf] (%p1280_p6)  ;;  %776 = vst [vmem:[%s754_s10 + $0x18] sm:$0xf] (%p1280_p6), %v775_v11 }
 0x11c   : > { %1059 = vst [vmem:[%s1357_s7 + $0x10] sm:$0xff] %v1031_v7   ;;  %1063 = vst [vmem:[%s1357_s7 + $0x30] sm:$0xff] %v1051_v8   ;;  %v787_v17 = vld [vmem:[%s1357_s7 + $0x20] sm:$0xf] (%p1280_p6)  ;;  %v789_v18 = vld [vmem:[%s1357_s7 + $0x24] sm:$0xf] (%p1280_p6) }
 0x11d   : > { %772 = vst [vmem:[%s754_s10] sm:$0xf] %v771_v9  ;;  %774 = vst [vmem:[%s754_s10 + $0xc] sm:$0xf] %v773_v10 }
 0x11e   : > { %778 = vst [vmem:[%s754_s10 + $0x24] sm:$0xf] %v777_v12  ;;  %788 = vst [vmem:[%s754_s10 + $0x60] sm:$0xf] %v787_v17 }
 0x11f   : > { %790 = vst [vmem:[%s754_s10 + $0x6c] sm:$0xf] %v789_v18  ;;  %792 = vst [vmem:[%s754_s10 + $0x78] sm:$0xf] %v791_v19 }
 0x120   : > { %794 = vst [vmem:[%s754_s10 + $0x84] sm:$0xf] %v793_v20 }
 0x121   : > { %v783_v15 = vld [vmem:[%s1357_s7 + $0x18] sm:$0xf]  ;;  %v785_v16 = vld [vmem:[%s1357_s7 + $0x1c] sm:$0xf] }
 0x122   : > { %784 = vst [vmem:[%s754_s10 + $0x48] sm:$0xf] %v783_v15  ;;  %786 = vst [vmem:[%s754_s10 + $0x54] sm:$0xf] %v785_v16  ;;  %v799_v23 = vld [vmem:[%s1357_s7 + $0x38] sm:$0xf] }
 0x123   : > { %v779_v13 = vld [vmem:[%s1357_s7 + $0x10] sm:$0xf]  ;;  %v781_v14 = vld [vmem:[%s1357_s7 + $0x14] sm:$0xf]  ;;  %v801_v24 = vld [vmem:[%s1357_s7 + $0x3c] sm:$0xf] }
 0x124   : > { %780 = vst [vmem:[%s754_s10 + $0x30] sm:$0xf] %v779_v13  ;;  %782 = vst [vmem:[%s754_s10 + $0x3c] sm:$0xf] %v781_v14  ;;  %v795_v21 = vld [vmem:[%s1357_s7 + $0x30] sm:$0xf] }
 0x125   : > { %v797_v22 = vld [vmem:[%s1357_s7 + $0x34] sm:$0xf]  ;;  %796 = vst [vmem:[%s754_s10 + $0x90] sm:$0xf] %v795_v21  ;;  %800 = vst [vmem:[%s754_s10 + $0xa8] sm:$0xf] %v799_v23 }
 0x126   : > { %798 = vst [vmem:[%s754_s10 + $0x9c] sm:$0xf] %v797_v22  ;;  %802 = vst [vmem:[%s754_s10 + $0xb4] sm:$0xf] %v801_v24 }
 0x127 PF: > { %s13_s16 = sadd.s32 1, %s1223_s16   ;;  %s1409_s12 = smov %s1211_s13 }
 0x128   : > { %p10_p12 = scmp.ge.s32.totalorder %s13_s16, 5   ;;  %s1410_s13 = smov %s1285_s22 }
 0x129   : > { %s1411_s14 = smov %s1219_s15  ;;  %s1412_s15 = smov %s1414_s17 }
 0x12a   :  { %12 = sbr.rel (!%p10_p12) target bundleno = 3 (0x3), region = 163 }

// kernel: microdit_forward.20
= control target key start
LH: loop header
LB: loop body
LE: loop exit
PB: predicated region body
PF: predicated region fallthrough
CT: control target
= control target key end

     0   :  { %s1338_s12 = smov 0   ;;  %s1340_s13 = smov 0   ;;  %s1609_s0 = inlined_call_operand.vmem [shape: bf16[8,64,32], index: 0, kind: input, shape index: {}]   ;;  %s1610_s1 = inlined_call_operand.vmem [shape: bf16[8,64,32], index: 1, kind: input, shape index: {}]   ;;  %s1611_s2 = inlined_call_operand.vmem [shape: bf16[8,64,32], index: 2, kind: input, shape index: {}]   ;;  %s1612_s3 = inlined_call_operand.vmem [shape: bf16[8,64,32], index: 3, kind: output, shape index: {}]  }
   0x1   :  { %s1342_s14 = smov 0  }
   0x2 LB: > { %s32_s15 = sadd.s32 1, %s1309_s13  ;;  %p1099_p0 = scmp.ge.s32.totalorder %s1313_s14, 1  ;;  %s1313_s14 = sphi %s1342_s14, %s13_s14   ;;  %s1309_s13 = sphi %s1340_s13, %s1614_s13   ;;  %s1305_s12 = sphi %s1338_s12, %s1613_s12  }
   0x3   : > { %p34_p1 = scmp.ge.s32.totalorder %s32_s15, 8  ;;  %p199_p2 = scmp.lt.s32.totalorder %s1313_s14, 9 }
   0x5   : > { %s1616_s15 = smov (%p34_p1, %s32_s15), 0  ;;  %p200_p3 = pnand %p1099_p0, %p199_p2 }
   0x6   : > { %p250_p4 = scmp.lt.s32.totalorder (!%p200_p3), %s1305_s12, 7 }
   0x7   : > { %203 = sbr.rel (%p200_p3) target bundleno = 845 (0x34d), region = 32 }
   0xc   : > { %s1618_s12 = smov (!%p250_p4, %s1305_s12), 7  ;;  %vm311_vm0 = vcmask 261120   ;;  %vm294_vm1 = vcmask 7168   ;;  %v1315_v12 = vmov -inf   ;;  %vm482_vm2 = vcmask 523264  }
   0xd   : > { %s1356_s16 = sshll.u32 %s1618_s12, 5  ;;  %297 = vst.msk [vmem:[#allocation2 + $0x10] sm:$0xff] %vm294_vm1, %v1315_v12  ;;  %295 = vst.msk [vmem:[#allocation2] sm:$0xff] %vm294_vm1, %v1315_v12  ;;  %v1316_v33 = vmov 0   ;;  %v1317_v38 = vmov 0.0   ;;  %vm960_vm3 = vcmask 257024  }
   0xe   : > { %s267_s19 = scalar_lea.vmem %s1610_s1, %s1356_s16  ;;  %s257_s22 = scalar_lea.vmem %s1609_s0, %s1356_s16  ;;  %296 = vst.msk [vmem:[#allocation2 + $0x8] sm:$0xff] %vm294_vm1, %v1315_v12  ;;  %298 = vst.msk [vmem:[#allocation2 + $0x18] sm:$0xff] %vm294_vm1, %v1315_v12  ;;  %1230 = vset.pattern.permute.xlu1 %v1316_v33  ;;  %1229 = vset.pattern.permute.xlu0 %v1316_v33 }
   0xf   : > { %v1231_v0 = vld [vmem:[%s267_s19 + $0x18] sm:$0xff]   ;;  %v1232_v1 = vld [vmem:[%s267_s19 + $0x10] sm:$0xff]   ;;  %v1235_v3 = vld [vmem:[%s257_s22] sm:$0xff]   ;;  %299 = vst.msk [vmem:[#allocation2 + $0x20] sm:$0xff] %vm294_vm1, %v1315_v12  ;;  %s277_s25 = scalar_lea.vmem %s1611_s2, %s1356_s16  ;;  %s1582_s28 = scalar_lea.vmem %s1612_s3, %s1356_s16 }
  0x10   : > { %1198 = vmatprep.subr.msk.bf16.mxu0 %vm311_vm0, %v1231_v0  ;;  %v399_v2 = vsel %vm311_vm0, %v1231_v0, 0  ;;  %1174 = vmatprep.mubr.msk.bf16.mxu0 %vm311_vm0, %v1235_v3  ;;  %v396_v4 = vsel %vm311_vm0, %v1232_v1, 0  ;;  %v1233_v5 = vld [vmem:[%s267_s19 + $0x8] sm:$0xff]   ;;  %v1234_v7 = vld [vmem:[%s267_s19] sm:$0xff]   ;;  %v1237_v10 = vld [vmem:[%s257_s22 + $0x10] sm:$0xff]   ;;  %300 = vst.msk [vmem:[#allocation2 + $0x28] sm:$0xff] %vm294_vm1, %v1315_v12 }
  0x11   : > { %1167 = vmatpush3.bf16.xpose.msra.mxu0 %v399_v2  ;;  %v393_v6 = vsel %vm311_vm0, %v1233_v5, 0  ;;  %v390_v8 = vsel %vm311_vm0, %v1234_v7, 0  ;;  %v1236_v9 = vld [vmem:[%s257_s22 + $0x8] sm:$0xff]   ;;  %v1238_v11 = vld [vmem:[%s257_s22 + $0x18] sm:$0xff]   ;;  %301 = vst.msk [vmem:[#allocation2 + $0x30] sm:$0xff] %vm294_vm1, %v1315_v12  ;;  %302 = vst.msk [vmem:[#allocation2 + $0x38] sm:$0xff] %vm294_vm1, %v1315_v12 }
  0x12   : > { %1199 = vmatprep.subr.msk.bf16.mxu0 %vm311_vm0, %v1232_v1  ;;  %305 = vst.msk [vmem:[#allocation3 + $0x10] sm:$0xff] %vm294_vm1, %v1317_v38  ;;  %303 = vst.msk [vmem:[#allocation3] sm:$0xff] %vm294_vm1, %v1317_v38  ;;  %v1239_v60 = vld [vmem:[%s277_s25 + $0x18] sm:$0xff]   ;;  %v1240_v2 = vld [vmem:[%s277_s25 + $0x10] sm:$0xff]  }
  0x13   : > { %304 = vst.msk [vmem:[#allocation3 + $0x8] sm:$0xff] %vm294_vm1, %v1317_v38  ;;  %306 = vst.msk [vmem:[#allocation3 + $0x18] sm:$0xff] %vm294_vm1, %v1317_v38  ;;  %1182 = vmatprep.subr.bf16.mxu1 %v1239_v60 }
  0x14   : > { %307 = vst.msk [vmem:[#allocation3 + $0x20] sm:$0xff] %vm294_vm1, %v1317_v38  ;;  %308 = vst.msk [vmem:[#allocation3 + $0x28] sm:$0xff] %vm294_vm1, %v1317_v38  ;;  %v1434_v39 = vld [vmem:[#allocation2 + $0x10] sm:$0xff]  ;;  %v1436_v41 = vld [vmem:[#allocation2] sm:$0xff]  ;;  %1183 = vmatpush3.bf16.msra.mxu1 %v1239_v60 }
  0x15   : > { %309 = vst.msk [vmem:[#allocation3 + $0x30] sm:$0xff] %vm294_vm1, %v1317_v38  ;;  %310 = vst.msk [vmem:[#allocation3 + $0x38] sm:$0xff] %vm294_vm1, %v1317_v38  ;;  %v1441_v44 = vld [vmem:[#allocation2 + $0x18] sm:$0xff]  ;;  %v1451_v48 = vld [vmem:[#allocation2 + $0x8] sm:$0xff]  ;;  %1184 = vmatprep.subr.bf16.mxu1 %v1240_v2 }
  0x16   : > { %312 = vst.msk [vmem:[#allocation4] sm:$0xff] %vm311_vm0, %v1317_v38  ;;  %313 = vst.msk [vmem:[#allocation4 + $0x8] sm:$0xff] %vm311_vm0, %v1317_v38  ;;  %v1469_v54 = vld [vmem:[#allocation2 + $0x20] sm:$0xff] }
  0x17   : > { %314 = vst.msk [vmem:[#allocation4 + $0x10] sm:$0xff] %vm311_vm0, %v1317_v38  ;;  %315 = vst.msk [vmem:[#allocation4 + $0x18] sm:$0xff] %vm311_vm0, %v1317_v38  ;;  %v1485_v59 = vld [vmem:[#allocation2 + $0x28] sm:$0xff] }
  0x18   : > { %316 = vst.msk [vmem:[#allocation4 + $0x20] sm:$0xff] %vm311_vm0, %v1317_v38  ;;  %317 = vst.msk [vmem:[#allocation4 + $0x28] sm:$0xff] %vm311_vm0, %v1317_v38  ;;  %v1475_v57 = vld [vmem:[#allocation2 + $0x30] sm:$0xff]  ;;  %v1497_v3 = vld [vmem:[#allocation2 + $0x38] sm:$0xff]  ;;  %1185 = vmatpush3.bf16.msra.mxu1 %v1240_v2 }
  0x19   : > { %1169 = vmatpush3.bf16.xpose.msra.mxu0 %v396_v4  ;;  %318 = vst.msk [vmem:[#allocation4 + $0x30] sm:$0xff] %vm311_vm0, %v1317_v38  ;;  %319 = vst.msk [vmem:[#allocation4 + $0x38] sm:$0xff] %vm311_vm0, %v1317_v38 }
  0x1a   : > { %1200 = vmatprep.subr.msk.bf16.mxu0 %vm311_vm0, %v1233_v5 }
  0x21   : > { %1171 = vmatpush3.bf16.xpose.msra.mxu0 %v393_v6 }
  0x22   : > { %1201 = vmatprep.subr.msk.bf16.mxu0 %vm311_vm0, %v1234_v7 }
  0x29   : > { %1173 = vmatpush3.bf16.xpose.msra.mxu0 %v390_v8  ;;  %v1241_v8 = vld [vmem:[%s277_s25 + $0x8] sm:$0xff]  }
  0x2a   : > { %1186 = vmatprep.subr.bf16.mxu1 %v1241_v8 }
  0x2b   : > { %1187 = vmatpush3.bf16.msra.mxu1 %v1241_v8 }
  0x30   : > { %1175 = vmatmul.mubr.msk.bf16.vlgmr.msra.gmra.mxu0 %vm311_vm0, %v1236_v9 }
  0x31   : > { %1178 = vmatprep.mubr.msk.bf16.mxu0 %vm311_vm0, %v1237_v10  ;;  %v1242_v10 = vld [vmem:[%s277_s25] sm:$0xff]  }
  0x32   : > { %1188 = vmatprep.subr.bf16.mxu1 %v1242_v10 }
  0x33   : > { %1189 = vmatpush3.bf16.msra.mxu1 %v1242_v10 }
  0x38   : > { %1179 = vmatmul.mubr.msk.bf16.gmra.mxu0 %vm311_vm0, %v1238_v11 }
  0xf0   : > { %v1176_v13 = vpop.f32.mrf.mxu0 }
  0xf1   : > { %v1386_v14 = vmul.f32 0.17677669, %v1176_v13 }
  0xf2   : > { %v435_v15 = vpop.f32.mrf.mxu0 }
  0xf3   : > { %v1388_v16 = vmul.f32 0.17677669, %v435_v15  ;;  %v489_v17 = vsel %vm482_vm2, %v1386_v14, -inf }
  0xf4   : > { %490 = vmax.xlane.f32.xlu1 %v489_v17  ;;  %v1177_v18 = vpop.f32.mrf.mxu0 }
  0xf5   : > { %v1392_v19 = vmul.f32 0.17677669, %v1177_v18  ;;  %v483_v20 = vsel %vm482_vm2, %v1388_v16, -inf }
  0xf6   : > { %484 = vmax.xlane.f32.xlu0 %v483_v20  ;;  %v438_v21 = vpop.f32.mrf.mxu0 }
  0xf7   : > { %v1396_v22 = vmul.f32 0.17677669, %v438_v21  ;;  %v492_v23 = vsel %vm482_vm2, %v1392_v19, -inf }
  0xf8   : > { %493 = vmax.xlane.f32.xlu1 %v492_v23  ;;  %v1180_v24 = vpop.f32.mrf.mxu0 }
  0xf9   : > { %v486_v25 = vsel %vm482_vm2, %v1396_v22, -inf  ;;  %v1404_v29 = vmul.f32 0.17677669, %v1180_v24 }
  0xfa   : > { %487 = vmax.xlane.f32.xlu0 %v486_v25  ;;  %v451_v26 = vpop.f32.mrf.mxu0 }
  0xfb   : > { %v1402_v27 = vmul.f32 0.17677669, %v451_v26  ;;  %v501_v35 = vsel %vm482_vm2, %v1404_v29, -inf }
  0xfc   : > { %v1181_v28 = vpop.f32.mrf.mxu0 }
  0xfd   : > { %v495_v30 = vsel %vm482_vm2, %v1402_v27, -inf  ;;  %v1410_v34 = vmul.f32 0.17677669, %v1181_v28 }
  0xfe   : > { %496 = vmax.xlane.f32.xlu0 %v495_v30  ;;  %v454_v31 = vpop.f32.mrf.mxu0 }
  0xff   : > { %v1408_v32 = vmul.f32 0.17677669, %v454_v31  ;;  %v504_v37 = vsel %vm482_vm2, %v1410_v34, -inf }
 0x101   : > { %v498_v36 = vsel %vm482_vm2, %v1408_v32, -inf }
 0x102   : > { %502 = vmax.xlane.f32.xlu0 %v501_v35  ;;  %499 = vmax.xlane.f32.xlu1 %v498_v36 }
 0x106   : > { %505 = vmax.xlane.f32.xlu1 %v504_v37 }
 0x17d   : > { %v491_v40 = vpop.xlane.xlu1 %490 }
 0x17e   : > { %v1439_v42 = vmax.f32 %v1434_v39, %v491_v40 }
 0x17f   : > { %v485_v43 = vpop.xlane.xlu0 %484 }
 0x180   : > { %v517_v45 = vsub.f32 %v1434_v39, %v1439_v42  ;;  %847 = vst.msk [vmem:[#allocation2 + $0x10] sm:$0xff] %vm294_vm1, %v1439_v42  ;;  %v1448_v46 = vmax.f32 %v1436_v41, %v485_v43  ;;  %551 = vperm.xlu1 %1230, %v1439_v42  }
 0x181   : > { %v494_v47 = vpop.xlane.xlu1 %493 }
 0x182   : > { %v515_v49 = vsub.f32 %v1436_v41, %v1448_v46  ;;  %845 = vst.msk [vmem:[#allocation2] sm:$0xff] %vm294_vm1, %v1448_v46  ;;  %v1458_v50 = vmax.f32 %v1441_v44, %v494_v47  ;;  %541 = vperm.xlu0 %1229, %v1448_v46  }
 0x183   : > { %v488_v51 = vpop.xlane.xlu0 %487 }
 0x184   : > { %v518_v52 = vsub.f32 %v1441_v44, %v1458_v50  ;;  %848 = vst.msk [vmem:[#allocation2 + $0x18] sm:$0xff] %vm294_vm1, %v1458_v50  ;;  %v1466_v53 = vmax.f32 %v1451_v48, %v488_v51  ;;  %556 = vperm.xlu1 %1230, %v1458_v50  }
 0x186   : > { %v516_v55 = vsub.f32 %v1451_v48, %v1466_v53  ;;  %846 = vst.msk [vmem:[#allocation2 + $0x8] sm:$0xff] %vm294_vm1, %v1466_v53  ;;  %v529_v48 = vmul.f32 1.442695, %v518_v52 }
 0x187   : > { %v497_v56 = vpop.xlane.xlu0 %496 }
 0x188   : > { %v1482_v58 = vmax.f32 %v1469_v54, %v497_v56  ;;  %546 = vperm.xlu1 %1230, %v1466_v53  }
 0x18a   : > { %v519_v61 = vsub.f32 %v1469_v54, %v1482_v58  ;;  %849 = vst.msk [vmem:[#allocation2 + $0x20] sm:$0xff] %vm294_vm1, %v1482_v58 }
 0x18b   : > { %v503_v62 = vpop.xlane.xlu0 %502  ;;  %v500_v63 = vpop.xlane.xlu1 %499 }
 0x18c   : > { %v1492_v0 = vmax.f32 %v1475_v57, %v503_v62  ;;  %v1495_v1 = vmax.f32 %v1485_v59, %v500_v63  ;;  %v531_v53 = vmul.f32 1.442695, %v519_v61 }
 0x18e   : > { %v521_v4 = vsub.f32 %v1475_v57, %v1492_v0  ;;  %851 = vst.msk [vmem:[#allocation2 + $0x30] sm:$0xff] %vm294_vm1, %v1492_v0  ;;  %v520_v5 = vsub.f32 %v1485_v59, %v1495_v1  ;;  %850 = vst.msk [vmem:[#allocation2 + $0x28] sm:$0xff] %vm294_vm1, %v1495_v1  ;;  %571 = vperm.xlu1 %1230, %v1492_v0   ;;  %v605_v57 = vld [vmem:[#allocation3 + $0x10] sm:$0xff] }
 0x18f   : > { %v506_v6 = vpop.xlane.xlu1 %505 }
 0x190   : > { %v1509_v7 = vmax.f32 %v1497_v3, %v506_v6  ;;  %v533_v41 = vmul.f32 1.442695, %v520_v5  ;;  %v535_v39 = vmul.f32 1.442695, %v521_v4  ;;  %v606_v4 = vld [vmem:[#allocation3 + $0x18] sm:$0xff] }
 0x192   : > { %v522_v9 = vsub.f32 %v1497_v3, %v1509_v7  ;;  %852 = vst.msk [vmem:[#allocation2 + $0x38] sm:$0xff] %vm294_vm1, %v1509_v7  ;;  %561 = vperm.xlu1 %1230, %v1482_v58   ;;  %v603_v58 = vld [vmem:[#allocation3] sm:$0xff] }
 0x194   : > { %v537_v42 = vmul.f32 1.442695, %v522_v9 }
 0x196   : > { %566 = vperm.xlu1 %1230, %v1495_v1  }
 0x19a   : > { %576 = vperm.xlu1 %1230, %v1509_v7   ;;  %v604_v7 = vld [vmem:[#allocation3 + $0x8] sm:$0xff] }
 0x1fb   : > { %v552_v11 = vpop.permute.xlu1 %551 }
 0x1fc   : > { %v581_v12 = vsub.f32 %v1386_v14, %v552_v11 }
 0x1fd   : > { %v542_v13 = vpop.permute.xlu0 %541 }
 0x1fe   : > { %v591_v15 = vmul.f32 1.442695, %v581_v12  ;;  %v579_v17 = vsub.f32 %v1388_v16, %v542_v13  ;;  %v525_v13 = vmul.f32 1.442695, %v516_v55 }
 0x1ff   : > { %v557_v18 = vpop.permute.xlu1 %556 }
 0x200   : > { %1243 = vpow2.f32 %v591_v15  ;;  %v587_v20 = vmul.f32 1.442695, %v579_v17  ;;  %v582_v21 = vsub.f32 %v1392_v19, %v557_v18  ;;  %v523_v18 = vmul.f32 1.442695, %v515_v49 }
 0x202   : > { %1245 = vpow2.f32 %v587_v20  ;;  %v593_v23 = vmul.f32 1.442695, %v582_v21  ;;  %v527_v20 = vmul.f32 1.442695, %v517_v45 }
 0x203   : > { %v547_v24 = vpop.permute.xlu1 %546 }
 0x204   : > { %1247 = vpow2.f32 %v593_v23  ;;  %v580_v25 = vsub.f32 %v1396_v22, %v547_v24 }
 0x206   : > { %v589_v26 = vmul.f32 1.442695, %v580_v25 }
 0x208   : > { %1249 = vpow2.f32 %v589_v26 }
 0x209   : > { %v572_v28 = vpop.permute.xlu1 %571 }
 0x20a   : > { %v585_v14 = vsub.f32 %v1404_v29, %v572_v28 }
 0x20c   : > { %v599_v19 = vmul.f32 1.442695, %v585_v14 }
 0x20d   : > { %v1244_v30 = vpop.eup %1243  ;;  %v562_v31 = vpop.permute.xlu1 %561 }
 0x20e   : > { %v583_v16 = vsub.f32 %v1402_v27, %v562_v31  ;;  %v625_v33 = vsel %vm482_vm2, %v1244_v30, 0.0 }
 0x20f   : > { %v1246_v35 = vpop.eup %1245  ;;  %626 = vadd.xlane.f32.xlu0 %v625_v33 }
 0x210   : > { %v595_v36 = vmul.f32 1.442695, %v583_v16  ;;  %v619_v37 = vsel %vm482_vm2, %v1246_v35, 0.0 }
 0x211   : > { %v1248_v38 = vpop.eup %1247  ;;  %620 = vadd.xlane.f32.xlu1 %v619_v37  ;;  %v567_v22 = vpop.permute.xlu1 %566 }
 0x212   : > { %1251 = vpow2.f32 %v595_v36  ;;  %v584_v40 = vsub.f32 %v1408_v32, %v567_v22  ;;  %v628_v43 = vsel %vm482_vm2, %v1248_v38, 0.0  ;;  %v717_v62 = vpack.c.bf16 %v1248_v38, %v1244_v30  ;;  %v607_v30 = vld [vmem:[#allocation3 + $0x20] sm:$0xff] }
 0x213   : > { %1253 = vpow2.f32 %v599_v19  ;;  %v608_v19 = vld [vmem:[#allocation3 + $0x28] sm:$0xff] }
 0x214   : > { %v597_v29 = vmul.f32 1.442695, %v584_v40 }
 0x215   : > { %v1250_v47 = vpop.eup %1249  ;;  %629 = vadd.xlane.f32.xlu1 %v628_v43  ;;  %v577_v27 = vpop.permute.xlu1 %576  ;;  %v610_v43 = vld [vmem:[#allocation3 + $0x38] sm:$0xff] }
 0x216   : > { %1255 = vpow2.f32 %v597_v29  ;;  %v586_v51 = vsub.f32 %v1410_v34, %v577_v27  ;;  %v622_v56 = vsel %vm482_vm2, %v1250_v47, 0.0  ;;  %v716_v60 = vpack.c.bf16 %v1250_v47, %v1246_v35  ;;  %v609_v35 = vld [vmem:[#allocation3 + $0x30] sm:$0xff] }
 0x217   : > { %623 = vadd.xlane.f32.xlu0 %v622_v56 }
 0x218   : > { %v601_v63 = vmul.f32 1.442695, %v586_v51  ;;  %1190 = vmatprep.mubr.msk.bf16.mxu1 %vm482_vm2, %v716_v60 }
 0x219   : > { %1191 = vmatmul.mubr.msk.bf16.vlgmr.msra.gmra.mxu1 %vm482_vm2, %v717_v62 }
 0x21a   : > { %1257 = vpow2.f32 %v601_v63 }
 0x21b   : > { %1259 = vpow2.f32 %v525_v13 }
 0x21c   : > { %1261 = vpow2.f32 %v523_v18 }
 0x21d   : > { %1263 = vpow2.f32 %v527_v20  ;;  %v662_v20 = vld [vmem:[#allocation4 + $0x10] sm:$0xff] }
 0x21e   : > { %1265 = vpow2.f32 %v529_v48 }
 0x21f   : > { %v1252_v32 = vpop.eup %1251  ;;  %1267 = vpow2.f32 %v531_v53  ;;  %v660_v53 = vld [vmem:[#allocation4] sm:$0xff] }
 0x220   : > { %v631_v2 = vsel %vm482_vm2, %v1252_v32, 0.0  ;;  %v1254_v6 = vpop.eup %1253  ;;  %1269 = vpow2.f32 %v533_v41 }
 0x221   : > { %632 = vadd.xlane.f32.xlu0 %v631_v2  ;;  %v637_v10 = vsel %vm482_vm2, %v1254_v6, 0.0  ;;  %1271 = vpow2.f32 %v535_v39  ;;  %v663_v39 = vld [vmem:[#allocation4 + $0x18] sm:$0xff] }
 0x222   : > { %1273 = vpow2.f32 %v537_v42 }
 0x223   : > { %v1256_v8 = vpop.eup %1255 }
 0x224   : > { %v634_v34 = vsel %vm482_vm2, %v1256_v8, 0.0  ;;  %v718_v11 = vpack.c.bf16 %v1256_v8, %v1252_v32 }
 0x225   : > { %638 = vadd.xlane.f32.xlu0 %v637_v10  ;;  %635 = vadd.xlane.f32.xlu1 %v634_v34 }
 0x226   : > { %1194 = vmatprep.mubr.msk.bf16.mxu1 %vm482_vm2, %v718_v11 }
 0x227   : > { %v1258_v12 = vpop.eup %1257 }
 0x228   : > { %v640_v15 = vsel %vm482_vm2, %v1258_v12, 0.0  ;;  %v719_v17 = vpack.c.bf16 %v1258_v12, %v1254_v6  ;;  %v1260_v44 = vpop.eup %1259 }
 0x229   : > { %641 = vadd.xlane.f32.xlu1 %v640_v15  ;;  %v1262_v45 = vpop.eup %1261  ;;  %v612_v24 = vmul.f32 %v1260_v44, %v604_v7 }
 0x22a   : > { %1195 = vmatmul.mubr.msk.bf16.gmra.mxu1 %vm482_vm2, %v719_v17  ;;  %v1264_v46 = vpop.eup %1263  ;;  %v611_v1 = vmul.f32 %v1262_v45, %v603_v58 }
 0x22b   : > { %v1266_v49 = vpop.eup %1265  ;;  %v613_v59 = vmul.f32 %v1264_v46, %v605_v57 }
 0x22c   : > { %v1268_v50 = vpop.eup %1267  ;;  %v614_v9 = vmul.f32 %v1266_v49, %v606_v4 }
 0x22d   : > { %v1270_v52 = vpop.eup %1269  ;;  %v615_v16 = vmul.f32 %v1268_v50, %v607_v30 }
 0x22e   : > { %v1272_v54 = vpop.eup %1271  ;;  %v616_v22 = vmul.f32 %v1270_v52, %v608_v19 }
 0x22f   : > { %v1274_v55 = vpop.eup %1273  ;;  %v617_v38 = vmul.f32 %v1272_v54, %v609_v35 }
 0x230   : > { %v618_v56 = vmul.f32 %v1274_v55, %v610_v43 }
 0x23a   : > { %675 = vperm.xlu1 %1230, %v1260_v44  }
 0x23b   : > { %670 = vperm.xlu0 %1229, %v1262_v45  }
 0x23e   : > { %680 = vperm.xlu1 %1230, %v1264_v46  }
 0x23f   : > { %685 = vperm.xlu0 %1229, %v1266_v49   ;;  %v661_v49 = vld [vmem:[#allocation4 + $0x8] sm:$0xff] }
 0x242   : > { %690 = vperm.xlu1 %1230, %v1268_v50  }
 0x243   : > { %695 = vperm.xlu0 %1229, %v1270_v52  }
 0x246   : > { %700 = vperm.xlu1 %1230, %v1272_v54  }
 0x247   : > { %705 = vperm.xlu0 %1229, %v1274_v55  }
 0x298   : > { %v627_v61 = vpop.xlane.xlu0 %626 }
 0x299   : > { %v645_v0 = vadd.f32 %v627_v61, %v613_v59 }
 0x29a   : > { %v621_v3 = vpop.xlane.xlu1 %620 }
 0x29b   : > { %654 = vst.msk [vmem:[#allocation3 + $0x10] sm:$0xff] %vm294_vm1, %v645_v0  ;;  %v643_v5 = vadd.f32 %v621_v3, %v611_v1  ;;  %v666_v3 = vld [vmem:[#allocation4 + $0x30] sm:$0xff] }
 0x29d   : > { %652 = vst.msk [vmem:[#allocation3] sm:$0xff] %vm294_vm1, %v643_v5  ;;  %v664_v5 = vld [vmem:[#allocation4 + $0x20] sm:$0xff] }
 0x29e   : > { %v630_v21 = vpop.xlane.xlu1 %629 }
 0x29f   : > { %v646_v23 = vadd.f32 %v630_v21, %v614_v9  ;;  %v667_v9 = vld [vmem:[#allocation4 + $0x38] sm:$0xff] }
 0x2a0   : > { %v624_v25 = vpop.xlane.xlu0 %623 }
 0x2a1   : > { %655 = vst.msk [vmem:[#allocation3 + $0x18] sm:$0xff] %vm294_vm1, %v646_v23  ;;  %v644_v26 = vadd.f32 %v624_v25, %v612_v24 }
 0x2a2   : > { %v866_v28 = vld [vmem:[#allocation3 + $0x10] sm:$0xff] }
 0x2a3   : > { %653 = vst.msk [vmem:[#allocation3 + $0x8] sm:$0xff] %vm294_vm1, %v644_v26  ;;  %1275 = vrcp.f32 %v866_v28  ;;  %v665_v26 = vld [vmem:[#allocation4 + $0x28] sm:$0xff] }
 0x2a4   : > { %v864_v14 = vld [vmem:[#allocation3] sm:$0xff] }
 0x2a5   : > { %1277 = vrcp.f32 %v864_v14 }
 0x2a8   : > { %v867_v31 = vld [vmem:[#allocation3 + $0x18] sm:$0xff] }
 0x2a9   : > { %1279 = vrcp.f32 %v867_v31 }
 0x2aa   : > { %v633_v33 = vpop.xlane.xlu0 %632  ;;  %v865_v36 = vld [vmem:[#allocation3 + $0x8] sm:$0xff] }
 0x2ab   : > { %v647_v37 = vadd.f32 %v633_v33, %v615_v16  ;;  %1281 = vrcp.f32 %v865_v36 }
 0x2ad   : > { %656 = vst.msk [vmem:[#allocation3 + $0x20] sm:$0xff] %vm294_vm1, %v647_v37 }
 0x2ae   : > { %v639_v40 = vpop.xlane.xlu0 %638  ;;  %v636_v29 = vpop.xlane.xlu1 %635 }
 0x2af   : > { %v649_v47 = vadd.f32 %v639_v40, %v617_v38  ;;  %v648_v27 = vadd.f32 %v636_v29, %v616_v22 }
 0x2b0   : > { %v1276_v51 = vpop.eup %1275 }
 0x2b1   : > { %658 = vst.msk [vmem:[#allocation3 + $0x30] sm:$0xff] %vm294_vm1, %v649_v47  ;;  %657 = vst.msk [vmem:[#allocation3 + $0x28] sm:$0xff] %vm294_vm1, %v648_v27  ;;  %892 = vperm.xlu1 %1230, %v1276_v51  }
 0x2b2   : > { %v642_v60 = vpop.xlane.xlu1 %641  ;;  %v1278_v63 = vpop.eup %1277 }
 0x2b3   : > { %v650_v62 = vadd.f32 %v642_v60, %v618_v56 }
 0x2b4   : > { %v868_v32 = vld [vmem:[#allocation3 + $0x20] sm:$0xff] }
 0x2b5   : > { %659 = vst.msk [vmem:[#allocation3 + $0x38] sm:$0xff] %vm294_vm1, %v650_v62  ;;  %882 = vperm.xlu1 %1230, %v1278_v63   ;;  %1283 = vrcp.f32 %v868_v32 }
 0x2b6   : > { %v1280_v2 = vpop.eup %1279  ;;  %v676_v17 = vpop.permute.xlu1 %675 }
 0x2b7   : > { %897 = vperm.xlu0 %1229, %v1280_v2   ;;  %v671_v18 = vpop.permute.xlu0 %670  ;;  %v709_v57 = vmul.f32 %v676_v17, %v661_v49 }
 0x2b8   : > { %v870_v6 = vld [vmem:[#allocation3 + $0x30] sm:$0xff]  ;;  %v869_v8 = vld [vmem:[#allocation3 + $0x28] sm:$0xff]  ;;  %v1282_v10 = vpop.eup %1281  ;;  %v708_v45 = vmul.f32 %v671_v18, %v660_v53 }
 0x2b9   : > { %1285 = vrcp.f32 %v870_v6 }
 0x2ba   : > { %1287 = vrcp.f32 %v869_v8  ;;  %v681_v48 = vpop.permute.xlu1 %680 }
 0x2bb   : > { %887 = vperm.xlu0 %1229, %v1282_v10   ;;  %v710_v41 = vmul.f32 %v681_v48, %v662_v20  ;;  %v686_v42 = vpop.permute.xlu0 %685 }
 0x2bc   : > { %v871_v34 = vld [vmem:[#allocation3 + $0x38] sm:$0xff]  ;;  %v711_v52 = vmul.f32 %v686_v42, %v663_v39 }
 0x2bd   : > { %1289 = vrcp.f32 %v871_v34 }
 0x2be   : > { %v691_v61 = vpop.permute.xlu1 %690 }
 0x2bf   : > { %v696_v1 = vpop.permute.xlu0 %695  ;;  %v712_v24 = vmul.f32 %v691_v61, %v664_v5 }
 0x2c0   : > { %v713_v16 = vmul.f32 %v696_v1, %v665_v26 }
 0x2c2   : > { %v1284_v11 = vpop.eup %1283  ;;  %v701_v4 = vpop.permute.xlu1 %700 }
 0x2c3   : > { %902 = vperm.xlu1 %1230, %v1284_v11   ;;  %v714_v7 = vmul.f32 %v701_v4, %v666_v3  ;;  %v706_v21 = vpop.permute.xlu0 %705 }
 0x2c4   : > { %v715_v14 = vmul.f32 %v706_v21, %v667_v9 }
 0x2c6   : > { %v1286_v12 = vpop.eup %1285 }
 0x2c7   : > { %v1288_v13 = vpop.eup %1287  ;;  %912 = vperm.xlu1 %1230, %v1286_v12  }
 0x2c8   : > { %907 = vperm.xlu0 %1229, %v1288_v13  }
 0x2ca   : > { %v1290_v15 = vpop.eup %1289 }
 0x2cc   : > { %917 = vperm.xlu0 %1229, %v1290_v15  }
 0x2d9   : > { %v1192_v44 = vpop.f32.mrf.mxu1 }
 0x2da   : > { %v831_v46 = vadd.f32 %v1192_v44, %v710_v41 }
 0x2db   : > { %v798_v50 = vpop.f32.mrf.mxu1 }
 0x2dc   : > { %839 = vst.msk [vmem:[#allocation4 + $0x10] sm:$0xff] %vm311_vm0, %v831_v46  ;;  %v829_v54 = vadd.f32 %v798_v50, %v708_v45 }
 0x2dd   : > { %v1193_v55 = vpop.f32.mrf.mxu1 }
 0x2de   : > { %837 = vst.msk [vmem:[#allocation4] sm:$0xff] %vm311_vm0, %v829_v54  ;;  %v832_v58 = vadd.f32 %v1193_v55, %v711_v52 }
 0x2df   : > { %v801_v59 = vpop.f32.mrf.mxu1 }
 0x2e0   : > { %840 = vst.msk [vmem:[#allocation4 + $0x18] sm:$0xff] %vm311_vm0, %v832_v58  ;;  %v830_v0 = vadd.f32 %v801_v59, %v709_v57 }
 0x2e2   : > { %838 = vst.msk [vmem:[#allocation4 + $0x8] sm:$0xff] %vm311_vm0, %v830_v0 }
 0x2e3   : > { %v858_v36 = vld [vmem:[#allocation4 + $0x10] sm:$0xff] }
 0x2e5   : > { %v856_v40 = vld [vmem:[#allocation4] sm:$0xff] }
 0x2e7   : > { %v859_v47 = vld [vmem:[#allocation4 + $0x18] sm:$0xff] }
 0x2e9   : > { %v857_v63 = vld [vmem:[#allocation4 + $0x8] sm:$0xff] }
 0x2ea   : > { %v1196_v23 = vpop.f32.mrf.mxu1 }
 0x2eb   : > { %v835_v25 = vadd.f32 %v1196_v23, %v714_v7 }
 0x2ec   : > { %v814_v28 = vpop.f32.mrf.mxu1 }
 0x2ed   : > { %843 = vst.msk [vmem:[#allocation4 + $0x30] sm:$0xff] %vm311_vm0, %v835_v25  ;;  %v833_v30 = vadd.f32 %v814_v28, %v712_v24 }
 0x2ee   : > { %v1197_v31 = vpop.f32.mrf.mxu1 }
 0x2ef   : > { %841 = vst.msk [vmem:[#allocation4 + $0x20] sm:$0xff] %vm311_vm0, %v833_v30  ;;  %v836_v33 = vadd.f32 %v1197_v31, %v715_v14 }
 0x2f0   : > { %v817_v35 = vpop.f32.mrf.mxu1 }
 0x2f1   : > { %844 = vst.msk [vmem:[#allocation4 + $0x38] sm:$0xff] %vm311_vm0, %v836_v33  ;;  %v834_v19 = vadd.f32 %v817_v35, %v713_v16 }
 0x2f3   : > { %842 = vst.msk [vmem:[#allocation4 + $0x28] sm:$0xff] %vm311_vm0, %v834_v19 }
 0x2f4   : > { %v862_v11 = vld [vmem:[#allocation4 + $0x30] sm:$0xff] }
 0x2f6   : > { %v860_v6 = vld [vmem:[#allocation4 + $0x20] sm:$0xff] }
 0x2f8   : > { %v863_v53 = vld [vmem:[#allocation4 + $0x38] sm:$0xff] }
 0x2fa   : > { %v861_v13 = vld [vmem:[#allocation4 + $0x28] sm:$0xff] }
 0x32c   : > { %v893_v37 = vpop.permute.xlu1 %892 }
 0x32d   : > { %v922_v38 = vmul.f32 %v893_v37, %v858_v36 }
 0x32f   : > { %v1144_v22 = vpack.c.bf16 %v922_v38, %v922_v38 }
 0x330   : > { %v883_v29 = vpop.permute.xlu1 %882 }
 0x331   : > { %963 = vst.msk [vmem:[%s1582_s28 + $0x8] sm:$0xf] %vm960_vm3, %v1144_v22  ;;  %v920_v43 = vmul.f32 %v883_v29, %v856_v40 }
 0x332   : > { %v898_v27 = vpop.permute.xlu0 %897 }
 0x333   : > { %v1142_v51 = vpack.c.bf16 %v920_v43, %v920_v43  ;;  %v923_v56 = vmul.f32 %v898_v27, %v859_v47 }
 0x335   : > { %961 = vst.msk [vmem:[%s1582_s28] sm:$0xf] %vm960_vm3, %v1142_v51  ;;  %v1145_v60 = vpack.c.bf16 %v923_v56, %v923_v56 }
 0x336   : > { %v888_v62 = vpop.permute.xlu0 %887 }
 0x337   : > { %964 = vst.msk [vmem:[%s1582_s28 + $0xc] sm:$0xf] %vm960_vm3, %v1145_v60  ;;  %v921_v32 = vmul.f32 %v888_v62, %v857_v63 }
 0x339   : > { %v1143_v2 = vpack.c.bf16 %v921_v32, %v921_v32 }
 0x33b   : > { %962 = vst.msk [vmem:[%s1582_s28 + $0x4] sm:$0xf] %vm960_vm3, %v1143_v2 }
 0x33e   : > { %v903_v8 = vpop.permute.xlu1 %902 }
 0x33f   : > { %v924_v10 = vmul.f32 %v903_v8, %v860_v6 }
 0x341   : > { %v1146_v34 = vpack.c.bf16 %v924_v10, %v924_v10 }
 0x342   : > { %v913_v12 = vpop.permute.xlu1 %912 }
 0x343   : > { %965 = vst.msk [vmem:[%s1582_s28 + $0x10] sm:$0xf] %vm960_vm3, %v1146_v34  ;;  %v908_v15 = vpop.permute.xlu0 %907  ;;  %v926_v17 = vmul.f32 %v913_v12, %v862_v11 }
 0x344   : > { %v925_v18 = vmul.f32 %v908_v15, %v861_v13 }
 0x345   : > { %v1148_v20 = vpack.c.bf16 %v926_v17, %v926_v17 }
 0x346   : > { %v1147_v48 = vpack.c.bf16 %v925_v18, %v925_v18 }
 0x347   : > { %967 = vst.msk [vmem:[%s1582_s28 + $0x18] sm:$0xf] %vm960_vm3, %v1148_v20  ;;  %v918_v41 = vpop.permute.xlu0 %917 }
 0x348   : > { %966 = vst.msk [vmem:[%s1582_s28 + $0x14] sm:$0xf] %vm960_vm3, %v1147_v48  ;;  %v927_v39 = vmul.f32 %v918_v41, %v863_v53 }
 0x34a   : > { %v1149_v42 = vpack.c.bf16 %v927_v39, %v927_v39 }
 0x34c   : > { %968 = vst.msk [vmem:[%s1582_s28 + $0x1c] sm:$0xf] %vm960_vm3, %v1149_v42 }
 0x34d PF: > { %s13_s14 = sadd.s32 1, %s1313_s14   ;;  %s1613_s12 = smov %s1309_s13 }
 0x34e   : > { %p10_p5 = scmp.ge.s32.totalorder %s13_s14, 10   ;;  %s1614_s13 = smov %s1616_s15 }
 0x350   :  { %12 = sbr.rel (!%p10_p5) target bundleno = 2 (0x2), region = 76 }

// kernel: microdit_forward.21
= control target key start
LH: loop header
LB: loop body
LE: loop exit
PB: predicated region body
PF: predicated region fallthrough
CT: control target
= control target key end

     0   :  { %s1066_s21 = smov 0   ;;  %s1068_s22 = smov 0   ;;  %s1186_s0 = inlined_call_operand.vmem [shape: bf16[128,128], index: 0, kind: input, shape index: {}]   ;;  %s1187_s1 = inlined_call_operand.vmem [shape: bf16[128,128], index: 1, kind: input, shape index: {}]   ;;  %s1188_s2 = inlined_call_operand.vmem [shape: f32[1,128], index: 2, kind: input, shape index: {}]   ;;  %s1189_s3 = inlined_call_operand.vmem [shape: bf16[128,128], index: 3, kind: input, shape index: {}]   ;;  %s1190_s4 = inlined_call_operand.vmem [shape: f32[1,128], index: 4, kind: input, shape index: {}]   ;;  %s1191_s5 = inlined_call_operand.vmem [shape: f32[1,128], index: 5, kind: input, shape index: {}]   ;;  %s1192_s6 = inlined_call_operand.vmem [shape: bf16[128,128], index: 6, kind: output, shape index: {}]  }
   0x1   :  { %s1070_s23 = smov 0  }
   0x2 LB: > { %s28_s24 = sadd.s32 1, %s1025_s22  ;;  %p821_p0 = scmp.ge.s32.totalorder %s1029_s23, 1  ;;  %s1029_s23 = sphi %s1070_s23, %s16_s23   ;;  %s1025_s22 = sphi %s1068_s22, %s1194_s22   ;;  %s1021_s21 = sphi %s1066_s21, %s1193_s21  }
   0x3   : > { %p30_p1 = scmp.ge.s32.totalorder %s28_s24, 2  ;;  %p252_p2 = scmp.lt.s32.totalorder %s1029_s23, 3 }
   0x5   : > { %s1196_s24 = smov (%p30_p1, %s28_s24), 0  ;;  %p253_p3 = pnand %p821_p0, %p252_p2 }
   0x6   : > { %s822_s27 = sshll.u32 (!%p253_p3), %s1021_s21, 3 }
   0x7   : > { %256 = sbr.rel (%p253_p3) target bundleno = 569 (0x239), region = 44  ;;  %p296_p4 = scmp.lt.s32.totalorder (!%p253_p3), %s822_s27, 15 }
   0xc   : > { %v979_v0 = vld [vmem:[%s1187_s1 + $0x38] sm:$0xff]   ;;  %v980_v1 = vld [vmem:[%s1187_s1 + $0x30] sm:$0xff]   ;;  %s1198_s27 = smov (!%p296_p4, %s822_s27), 15  ;;  %v981_v2 = vld [vmem:[%s1187_s1 + $0x28] sm:$0xff]  }
   0xd   : > { %915 = vmatprep.subr.bf16.mxu0 %v979_v0  ;;  %939 = vmatprep.subr.bf16.mxu1 %v979_v0  ;;  %s1093_s8 = sshll.u32 %s1198_s27, 2  ;;  %v982_v3 = vld [vmem:[%s1187_s1 + $0x20] sm:$0xff]   ;;  %v983_v6 = vld [vmem:[%s1187_s1 + $0x18] sm:$0xff]   ;;  %v984_v7 = vld [vmem:[%s1187_s1 + $0x10] sm:$0xff]  }
   0xe   : > { %916 = vmatpush3.bf16.msra.mxu0 %v979_v0  ;;  %947 = vmatpush3.bf16.msra.mxu1 %v979_v0  ;;  %s1099_s11 = scalar_lea.vmem %s1186_s0, %s1093_s8  ;;  %v985_v8 = vld [vmem:[%s1187_s1 + $0x8] sm:$0xff]   ;;  %v986_v9 = vld [vmem:[%s1187_s1] sm:$0xff]   ;;  %s314_s27 = scalar_lea.vmem %s1189_s3, %s1093_s8 }
   0xf   : > { %917 = vmatprep.subr.bf16.mxu0 %v980_v1  ;;  %940 = vmatprep.subr.bf16.mxu1 %v980_v1  ;;  %v987_v4 = vld [vmem:[%s1099_s11] sm:$0xff]   ;;  %v988_v5 = vld [vmem:[%s1099_s11 + $0x10] sm:$0xff]   ;;  %v989_v10 = vld [vmem:[%s1099_s11 + $0x8] sm:$0xff]   ;;  %s320_s13 = scalar_lea.vmem %s1192_s6, %s1093_s8 }
  0x10   : > { %931 = vmatprep.mubr.bf16.mxu0 %v987_v4  ;;  %935 = vmatprep.mubr.bf16.mxu1 %v988_v5  ;;  %v990_v11 = vld [vmem:[%s1099_s11 + $0x18] sm:$0xff]   ;;  %v897_v12 = vld [vmem:[%s314_s27 + $0x8] sm:$0xff]   ;;  %v828_v13 = vld [vmem:[%s1188_s2] ss:$0 sm:$0xff] }
  0x11   : > { %v862_v14 = vld [vmem:[%s314_s27] sm:$0xff]   ;;  %v867_v15 = vunpack.c.l.bf16 %v897_v12  ;;  %v898_v22 = vld [vmem:[%s314_s27 + $0x10] sm:$0xff]   ;;  %v868_v25 = vunpack.c.h.bf16 %v897_v12  ;;  %v899_v37 = vld [vmem:[%s314_s27 + $0x18] sm:$0xff]  }
  0x12   : > { %918 = vmatpush3.bf16.msra.mxu0 %v980_v1  ;;  %948 = vmatpush3.bf16.msra.mxu1 %v980_v1  ;;  %v863_v19 = vunpack.c.l.bf16 %v862_v14  ;;  %v871_v31 = vunpack.c.l.bf16 %v898_v22  ;;  %v872_v36 = vunpack.c.h.bf16 %v898_v22  ;;  %v864_v40 = vunpack.c.h.bf16 %v862_v14 }
  0x13   : > { %919 = vmatprep.subr.bf16.mxu0 %v981_v2  ;;  %941 = vmatprep.subr.bf16.mxu1 %v981_v2  ;;  %v876_v43 = vunpack.c.h.bf16 %v899_v37  ;;  %v875_v46 = vunpack.c.l.bf16 %v899_v37 }
  0x16   : > { %920 = vmatpush3.bf16.msra.mxu0 %v981_v2  ;;  %949 = vmatpush3.bf16.msra.mxu1 %v981_v2 }
  0x17   : > { %921 = vmatprep.subr.bf16.mxu0 %v982_v3  ;;  %942 = vmatprep.subr.bf16.mxu1 %v982_v3 }
  0x1a   : > { %922 = vmatpush3.bf16.msra.mxu0 %v982_v3  ;;  %950 = vmatpush3.bf16.msra.mxu1 %v982_v3 }
  0x1b   : > { %923 = vmatprep.subr.bf16.mxu0 %v983_v6  ;;  %943 = vmatprep.subr.bf16.mxu1 %v983_v6 }
  0x1e   : > { %924 = vmatpush3.bf16.msra.mxu0 %v983_v6  ;;  %951 = vmatpush3.bf16.msra.mxu1 %v983_v6 }
  0x1f   : > { %925 = vmatprep.subr.bf16.mxu0 %v984_v7  ;;  %944 = vmatprep.subr.bf16.mxu1 %v984_v7 }
  0x22   : > { %926 = vmatpush3.bf16.msra.mxu0 %v984_v7  ;;  %952 = vmatpush3.bf16.msra.mxu1 %v984_v7 }
  0x23   : > { %927 = vmatprep.subr.bf16.mxu0 %v985_v8  ;;  %945 = vmatprep.subr.bf16.mxu1 %v985_v8 }
  0x26   : > { %928 = vmatpush3.bf16.msra.mxu0 %v985_v8  ;;  %953 = vmatpush3.bf16.msra.mxu1 %v985_v8 }
  0x27   : > { %929 = vmatprep.subr.bf16.mxu0 %v986_v9  ;;  %946 = vmatprep.subr.bf16.mxu1 %v986_v9 }
  0x2a   : > { %930 = vmatpush3.bf16.msra.mxu0 %v986_v9  ;;  %954 = vmatpush3.bf16.msra.mxu1 %v986_v9 }
  0x2d   : > { %932 = vmatmul.mubr.bf16.vlgmr.msra.gmra.mxu0 %v989_v10  ;;  %936 = vmatmul.mubr.bf16.vlgmr.msra.gmra.mxu1 %v990_v11 }
  0xed   : > { %v933_v16 = vpop.f32.mrf.mxu0  ;;  %v937_v17 = vpop.f32.mrf.mxu1 }
  0xee   : > { %v513_v18 = vadd.f32 %v933_v16, %v828_v13  ;;  %v517_v44 = vadd.f32 %v937_v17, %v828_v13 }
  0xef   : > { %v480_v20 = vpop.f32.mrf.mxu0  ;;  %v496_v21 = vpop.f32.mrf.mxu1 }
  0xf0   : > { %v511_v23 = vadd.f32 %v828_v13, %v480_v20  ;;  %v556_v24 = vadd.f32 %v867_v15, %v513_v18  ;;  %v515_v28 = vadd.f32 %v828_v13, %v496_v21  ;;  %v560_v48 = vadd.f32 %v875_v46, %v517_v44 }
  0xf1   : > { %v934_v26 = vpop.f32.mrf.mxu0  ;;  %v938_v27 = vpop.f32.mrf.mxu1 }
  0xf2   : > { %v514_v29 = vadd.f32 %v934_v26, %v828_v13  ;;  %566 = vadd.xlane.f32.xlu1 %v556_v24  ;;  %v554_v30 = vadd.f32 %v863_v19, %v511_v23  ;;  %v558_v39 = vadd.f32 %v871_v31, %v515_v28  ;;  %v518_v41 = vadd.f32 %v938_v27, %v828_v13 }
  0xf3   : > { %v483_v32 = vpop.f32.mrf.mxu0  ;;  %v499_v33 = vpop.f32.mrf.mxu1 }
  0xf4   : > { %v516_v34 = vadd.f32 %v828_v13, %v499_v33  ;;  %562 = vadd.xlane.f32.xlu0 %v554_v30  ;;  %v557_v35 = vadd.f32 %v868_v25, %v514_v29  ;;  %v512_v38 = vadd.f32 %v828_v13, %v483_v32  ;;  %v561_v47 = vadd.f32 %v876_v43, %v518_v41 }
  0xf6   : > { %568 = vadd.xlane.f32.xlu1 %v557_v35  ;;  %v559_v42 = vadd.f32 %v872_v36, %v516_v34  ;;  %v555_v45 = vadd.f32 %v864_v40, %v512_v38 }
  0xf8   : > { %570 = vadd.xlane.f32.xlu0 %v558_v39 }
  0xfa   : > { %572 = vadd.xlane.f32.xlu1 %v559_v42 }
  0xfc   : > { %564 = vadd.xlane.f32.xlu0 %v555_v45 }
  0xfe   : > { %576 = vadd.xlane.f32.xlu1 %v561_v47 }
 0x100   : > { %574 = vadd.xlane.f32.xlu0 %v560_v48 }
 0x17b   : > { %v567_v49 = vpop.xlane.xlu1 %566 }
 0x17c   : > { %v581_v50 = vmul.f32 0.0078125, %v567_v49 }
 0x17d   : > { %v563_v51 = vpop.xlane.xlu0 %562 }
 0x17e   : > { %v1127_v52 = vsub.f32 %v556_v24, %v581_v50  ;;  %v579_v53 = vmul.f32 0.0078125, %v563_v51 }
 0x17f   : > { %v569_v54 = vpop.xlane.xlu1 %568 }
 0x180   : > { %v1129_v55 = vsub.f32 %v554_v30, %v579_v53  ;;  %v582_v56 = vmul.f32 0.0078125, %v569_v54  ;;  %v597_v57 = vmul.f32 %v1127_v52, %v1127_v52 }
 0x181   : > { %v571_v58 = vpop.xlane.xlu0 %570 }
 0x182   : > { %v1133_v59 = vsub.f32 %v557_v35, %v582_v56  ;;  %v583_v60 = vmul.f32 0.0078125, %v571_v58  ;;  %607 = vadd.xlane.f32.xlu0 %v597_v57  ;;  %v595_v0 = vmul.f32 %v1129_v55, %v1129_v55 }
 0x183   : > { %v573_v61 = vpop.xlane.xlu1 %572 }
 0x184   : > { %v1135_v62 = vsub.f32 %v558_v39, %v583_v60  ;;  %v598_v63 = vmul.f32 %v1133_v59, %v1133_v59  ;;  %v584_v2 = vmul.f32 0.0078125, %v573_v61 }
 0x185   : > { %v565_v1 = vpop.xlane.xlu0 %564 }
 0x186   : > { %v580_v3 = vmul.f32 0.0078125, %v565_v1  ;;  %609 = vadd.xlane.f32.xlu1 %v598_v63  ;;  %603 = vadd.xlane.f32.xlu0 %v595_v0  ;;  %v599_v6 = vmul.f32 %v1135_v62, %v1135_v62  ;;  %v1145_v8 = vsub.f32 %v559_v42, %v584_v2  ;;  %v841_v42 = vld [vmem:[%s1190_s4] ss:$0 sm:$0xff] }
 0x187   : > { %v577_v4 = vpop.xlane.xlu1 %576 }
 0x188   : > { %v1141_v5 = vsub.f32 %v555_v45, %v580_v3  ;;  %v586_v9 = vmul.f32 0.0078125, %v577_v4  ;;  %v600_v14 = vmul.f32 %v1145_v8, %v1145_v8 }
 0x189   : > { %v575_v7 = vpop.xlane.xlu0 %574 }
 0x18a   : > { %v585_v10 = vmul.f32 0.0078125, %v575_v7  ;;  %611 = vadd.xlane.f32.xlu0 %v599_v6  ;;  %v596_v11 = vmul.f32 %v1141_v5, %v1141_v5  ;;  %v1151_v13 = vsub.f32 %v561_v47, %v586_v9 }
 0x18c   : > { %v1149_v12 = vsub.f32 %v560_v48, %v585_v10  ;;  %605 = vadd.xlane.f32.xlu1 %v596_v11  ;;  %v602_v16 = vmul.f32 %v1151_v13, %v1151_v13  ;;  %v842_v48 = vld [vmem:[%s1191_s5] ss:$0 sm:$0xff] }
 0x18e   : > { %v601_v15 = vmul.f32 %v1149_v12, %v1149_v12 }
 0x190   : > { %613 = vadd.xlane.f32.xlu1 %v600_v14  ;;  %615 = vadd.xlane.f32.xlu0 %v601_v15 }
 0x194   : > { %617 = vadd.xlane.f32.xlu1 %v602_v16 }
 0x20b   : > { %v608_v17 = vpop.xlane.xlu0 %607 }
 0x20c   : > { %v621_v18 = vmul.f32 0.0078125, %v608_v17 }
 0x20e   : > { %v629_v19 = vadd.f32 1e-05, %v621_v18 }
 0x20f   : > { %v610_v20 = vpop.xlane.xlu1 %609  ;;  %v604_v21 = vpop.xlane.xlu0 %603 }
 0x210   : > { %991 = vrsqrt.f32 %v629_v19  ;;  %v622_v22 = vmul.f32 0.0078125, %v610_v20  ;;  %v619_v23 = vmul.f32 0.0078125, %v604_v21 }
 0x212   : > { %v630_v24 = vadd.f32 1e-05, %v622_v22  ;;  %v627_v25 = vadd.f32 1e-05, %v619_v23 }
 0x213   : > { %v612_v26 = vpop.xlane.xlu0 %611 }
 0x214   : > { %993 = vrsqrt.f32 %v630_v24  ;;  %v623_v27 = vmul.f32 0.0078125, %v612_v26 }
 0x215   : > { %995 = vrsqrt.f32 %v627_v25  ;;  %v606_v28 = vpop.xlane.xlu1 %605 }
 0x216   : > { %v631_v29 = vadd.f32 1e-05, %v623_v27  ;;  %v620_v30 = vmul.f32 0.0078125, %v606_v28 }
 0x218   : > { %997 = vrsqrt.f32 %v631_v29  ;;  %v628_v31 = vadd.f32 1e-05, %v620_v30 }
 0x219   : > { %v614_v32 = vpop.xlane.xlu1 %613  ;;  %v616_v33 = vpop.xlane.xlu0 %615 }
 0x21a   : > { %999 = vrsqrt.f32 %v628_v31  ;;  %v624_v34 = vmul.f32 0.0078125, %v614_v32  ;;  %v625_v35 = vmul.f32 0.0078125, %v616_v33 }
 0x21c   : > { %v632_v36 = vadd.f32 1e-05, %v624_v34  ;;  %v633_v37 = vadd.f32 1e-05, %v625_v35 }
 0x21d   : > { %v992_v38 = vpop.eup %991  ;;  %v618_v39 = vpop.xlane.xlu1 %617 }
 0x21e   : > { %v645_v40 = vmul.f32 %v992_v38, %v1127_v52  ;;  %1001 = vrsqrt.f32 %v632_v36  ;;  %v626_v41 = vmul.f32 0.0078125, %v618_v39 }
 0x21f   : > { %1003 = vrsqrt.f32 %v633_v37 }
 0x220   : > { %v634_v43 = vadd.f32 1e-05, %v626_v41  ;;  %v660_v46 = vmul.f32 %v841_v42, %v645_v40 }
 0x221   : > { %v994_v44 = vpop.eup %993 }
 0x222   : > { %v996_v45 = vpop.eup %995  ;;  %v646_v47 = vmul.f32 %v994_v44, %v1133_v59  ;;  %1005 = vrsqrt.f32 %v634_v43  ;;  %v675_v52 = vadd.f32 %v842_v48, %v660_v46 }
 0x223   : > { %v643_v50 = vmul.f32 %v996_v45, %v1129_v55 }
 0x224   : > { %v661_v49 = vmul.f32 %v841_v42, %v646_v47 }
 0x225   : > { %v998_v51 = vpop.eup %997  ;;  %v658_v57 = vmul.f32 %v841_v42, %v643_v50 }
 0x226   : > { %v676_v53 = vadd.f32 %v842_v48, %v661_v49  ;;  %v647_v58 = vmul.f32 %v998_v51, %v1135_v62 }
 0x227   : > { %v1000_v54 = vpop.eup %999  ;;  %v673_v0 = vadd.f32 %v842_v48, %v658_v57 }
 0x228   : > { %v885_v56 = vpack.c.bf16 %v676_v53, %v675_v52  ;;  %v644_v59 = vmul.f32 %v1000_v54, %v1141_v5  ;;  %v662_v55 = vmul.f32 %v841_v42, %v647_v58 }
 0x22a   : > { %900 = vst [vmem:[%s320_s13 + $0x8] sm:$0xff] %v885_v56   ;;  %v659_v60 = vmul.f32 %v841_v42, %v644_v59  ;;  %v677_v9 = vadd.f32 %v842_v48, %v662_v55 }
 0x22b   : > { %v1002_v61 = vpop.eup %1001 }
 0x22c   : > { %v1004_v63 = vpop.eup %1003  ;;  %v674_v1 = vadd.f32 %v842_v48, %v659_v60  ;;  %v648_v2 = vmul.f32 %v1002_v61, %v1145_v8 }
 0x22d   : > { %v649_v3 = vmul.f32 %v1004_v63, %v1149_v12 }
 0x22e   : > { %v880_v4 = vpack.c.bf16 %v674_v1, %v673_v0  ;;  %v663_v6 = vmul.f32 %v841_v42, %v648_v2 }
 0x22f   : > { %v1006_v7 = vpop.eup %1005  ;;  %v664_v62 = vmul.f32 %v841_v42, %v649_v3 }
 0x230   : > { %881 = vst [vmem:[%s320_s13] sm:$0xff] %v880_v4   ;;  %v678_v10 = vadd.f32 %v842_v48, %v663_v6  ;;  %v650_v5 = vmul.f32 %v1006_v7, %v1151_v13 }
 0x231   : > { %v679_v15 = vadd.f32 %v842_v48, %v664_v62 }
 0x232   : > { %v890_v11 = vpack.c.bf16 %v678_v10, %v677_v9  ;;  %v665_v14 = vmul.f32 %v841_v42, %v650_v5 }
 0x234   : > { %901 = vst [vmem:[%s320_s13 + $0x10] sm:$0xff] %v890_v11   ;;  %v680_v16 = vadd.f32 %v842_v48, %v665_v14 }
 0x236   : > { %v895_v17 = vpack.c.bf16 %v680_v16, %v679_v15 }
 0x238   : > { %902 = vst [vmem:[%s320_s13 + $0x18] sm:$0xff] %v895_v17  }
 0x239 PF: > { %s16_s23 = sadd.s32 1, %s1029_s23   ;;  %s1193_s21 = smov %s1025_s22 }
 0x23a   : > { %p13_p5 = scmp.ge.s32.totalorder %s16_s23, 4   ;;  %s1194_s22 = smov %s1196_s24 }
 0x23c   :  { %15 = sbr.rel (!%p13_p5) target bundleno = 2 (0x2), region = 88 }

// kernel: microdit_forward.35
= control target key start
LH: loop header
LB: loop body
LE: loop exit
PB: predicated region body
PF: predicated region fallthrough
CT: control target
= control target key end

     0   :  { %s1018_s18 = smov 0   ;;  %s1020_s19 = smov 0   ;;  %s1109_s0 = inlined_call_operand.vmem [shape: bf16[128,128], index: 0, kind: input, shape index: {}]   ;;  %s1110_s1 = inlined_call_operand.vmem [shape: bf16[128,128], index: 1, kind: input, shape index: {}]   ;;  %s1111_s2 = inlined_call_operand.vmem [shape: f32[1,128], index: 2, kind: input, shape index: {}]   ;;  %s1112_s3 = inlined_call_operand.vmem [shape: bf16[128,128], index: 3, kind: input, shape index: {}]   ;;  %s1113_s4 = inlined_call_operand.vmem [shape: f32[1,128], index: 4, kind: input, shape index: {}]   ;;  %s1114_s5 = inlined_call_operand.vmem [shape: f32[128,128], index: 5, kind: output, shape index: {}]  }
   0x1   :  { %s1022_s20 = smov 0  }
   0x2 LB: > { %s27_s21 = sadd.s32 1, %s982_s19  ;;  %p811_p0 = scmp.ge.s32.totalorder %s986_s20, 1  ;;  %s986_s20 = sphi %s1022_s20, %s15_s20   ;;  %s982_s19 = sphi %s1020_s19, %s1116_s19   ;;  %s978_s18 = sphi %s1018_s18, %s1115_s18  }
   0x3   : > { %p29_p1 = scmp.ge.s32.totalorder %s27_s21, 2  ;;  %p228_p2 = scmp.lt.s32.totalorder %s986_s20, 3 }
   0x5   : > { %s1118_s21 = smov (%p29_p1, %s27_s21), 0  ;;  %p229_p3 = pnand %p811_p0, %p228_p2 }
   0x6   : > { %s812_s24 = sshll.u32 (!%p229_p3), %s978_s18, 3 }
   0x7   : > { %232 = sbr.rel (%p229_p3) target bundleno = 490 (0x1ea), region = 40  ;;  %p269_p4 = scmp.lt.s32.totalorder (!%p229_p3), %s812_s24, 15 }
   0xc   : > { %v936_v0 = vld [vmem:[%s1110_s1 + $0x38] sm:$0xff]   ;;  %v937_v1 = vld [vmem:[%s1110_s1 + $0x30] sm:$0xff]   ;;  %s1120_s24 = smov (!%p269_p4, %s812_s24), 15  ;;  %v938_v2 = vld [vmem:[%s1110_s1 + $0x28] sm:$0xff]  }
   0xd   : > { %864 = vmatprep.subr.bf16.mxu0 %v936_v0  ;;  %s813_s29 = sshll.u32 %s1120_s24, 2  ;;  %v939_v3 = vld [vmem:[%s1110_s1 + $0x20] sm:$0xff]   ;;  %v940_v5 = vld [vmem:[%s1110_s1 + $0x18] sm:$0xff]   ;;  %v941_v6 = vld [vmem:[%s1110_s1 + $0x10] sm:$0xff]   ;;  %s815_s15 = sshll.u32 %s1120_s24, 3 }
   0xe   : > { %865 = vmatpush3.bf16.msra.mxu0 %v936_v0  ;;  %s272_s7 = scalar_lea.vmem %s1109_s0, %s813_s29  ;;  %v942_v7 = vld [vmem:[%s1110_s1 + $0x8] sm:$0xff]   ;;  %v943_v8 = vld [vmem:[%s1110_s1] sm:$0xff]   ;;  %v948_v12 = vld [vmem:[%s1112_s3 + $0x38] sm:$0xff]   ;;  %s291_s23 = scalar_lea.vmem %s1114_s5, %s815_s15 }
   0xf   : > { %866 = vmatprep.subr.bf16.mxu0 %v937_v1  ;;  %v944_v4 = vld [vmem:[%s272_s7] sm:$0xff]   ;;  %v945_v9 = vld [vmem:[%s272_s7 + $0x8] sm:$0xff]   ;;  %v946_v10 = vld [vmem:[%s272_s7 + $0x10] sm:$0xff]   ;;  %888 = vmatprep.subr.bf16.mxu1 %v948_v12 }
  0x10   : > { %880 = vmatprep.mubr.bf16.mxu0 %v944_v4  ;;  %v947_v11 = vld [vmem:[%s272_s7 + $0x18] sm:$0xff]   ;;  %889 = vmatpush3.bf16.msra.mxu1 %v948_v12  ;;  %v949_v13 = vld [vmem:[%s1112_s3 + $0x30] sm:$0xff]   ;;  %v950_v14 = vld [vmem:[%s1112_s3 + $0x28] sm:$0xff]  }
  0x11   : > { %890 = vmatprep.subr.bf16.mxu1 %v949_v13  ;;  %v951_v15 = vld [vmem:[%s1112_s3 + $0x20] sm:$0xff]   ;;  %v952_v16 = vld [vmem:[%s1112_s3 + $0x18] sm:$0xff]   ;;  %v953_v17 = vld [vmem:[%s1112_s3 + $0x10] sm:$0xff]  }
  0x12   : > { %867 = vmatpush3.bf16.msra.mxu0 %v937_v1  ;;  %v954_v18 = vld [vmem:[%s1112_s3 + $0x8] sm:$0xff]   ;;  %v955_v19 = vld [vmem:[%s1112_s3] sm:$0xff]  }
  0x13   : > { %868 = vmatprep.subr.bf16.mxu0 %v938_v2  ;;  %v817_v21 = vld [vmem:[%s1111_s2] ss:$0 sm:$0xff] }
  0x14   : > { %891 = vmatpush3.bf16.msra.mxu1 %v949_v13  ;;  %v816_v13 = vld [vmem:[%s1113_s4] ss:$0 sm:$0xff] }
  0x15   : > { %892 = vmatprep.subr.bf16.mxu1 %v950_v14 }
  0x16   : > { %869 = vmatpush3.bf16.msra.mxu0 %v938_v2 }
  0x17   : > { %870 = vmatprep.subr.bf16.mxu0 %v939_v3 }
  0x18   : > { %893 = vmatpush3.bf16.msra.mxu1 %v950_v14 }
  0x19   : > { %894 = vmatprep.subr.bf16.mxu1 %v951_v15 }
  0x1a   : > { %871 = vmatpush3.bf16.msra.mxu0 %v939_v3 }
  0x1b   : > { %872 = vmatprep.subr.bf16.mxu0 %v940_v5 }
  0x1c   : > { %895 = vmatpush3.bf16.msra.mxu1 %v951_v15 }
  0x1d   : > { %896 = vmatprep.subr.bf16.mxu1 %v952_v16 }
  0x1e   : > { %873 = vmatpush3.bf16.msra.mxu0 %v940_v5 }
  0x1f   : > { %874 = vmatprep.subr.bf16.mxu0 %v941_v6 }
  0x20   : > { %897 = vmatpush3.bf16.msra.mxu1 %v952_v16 }
  0x21   : > { %898 = vmatprep.subr.bf16.mxu1 %v953_v17 }
  0x22   : > { %875 = vmatpush3.bf16.msra.mxu0 %v941_v6 }
  0x23   : > { %876 = vmatprep.subr.bf16.mxu0 %v942_v7 }
  0x24   : > { %899 = vmatpush3.bf16.msra.mxu1 %v953_v17 }
  0x25   : > { %900 = vmatprep.subr.bf16.mxu1 %v954_v18 }
  0x26   : > { %877 = vmatpush3.bf16.msra.mxu0 %v942_v7 }
  0x27   : > { %878 = vmatprep.subr.bf16.mxu0 %v943_v8 }
  0x28   : > { %901 = vmatpush3.bf16.msra.mxu1 %v954_v18 }
  0x29   : > { %902 = vmatprep.subr.bf16.mxu1 %v955_v19 }
  0x2a   : > { %879 = vmatpush3.bf16.msra.mxu0 %v943_v8 }
  0x2c   : > { %903 = vmatpush3.bf16.msra.mxu1 %v955_v19 }
  0x2d   : > { %881 = vmatmul.mubr.bf16.vlgmr.msra.gmra.mxu0 %v945_v9 }
  0x2e   : > { %884 = vmatprep.mubr.bf16.mxu0 %v946_v10 }
  0x35   : > { %885 = vmatmul.mubr.bf16.gmra.mxu0 %v947_v11 }
  0xed   : > { %v882_v20 = vpop.f32.mrf.mxu0 }
  0xee   : > { %v463_v24 = vadd.f32 %v882_v20, %v817_v21 }
  0xef   : > { %v454_v22 = vpop.f32.mrf.mxu0 }
  0xf0   : > { %v455_v27 = vadd.f32 %v817_v21, %v454_v22 }
  0xf1   : > { %v883_v23 = vpop.f32.mrf.mxu0 }
  0xf2   : > { %v466_v25 = vadd.f32 %v883_v23, %v817_v21 }
  0xf3   : > { %v457_v26 = vpop.f32.mrf.mxu0 }
  0xf4   : > { %v486_v28 = vpack.c.bf16 %v466_v25, %v463_v24  ;;  %v458_v29 = vadd.f32 %v817_v21, %v457_v26 }
  0xf5   : > { %v886_v30 = vpop.f32.mrf.mxu0 }
  0xf6   : > { %v490_v31 = vmul.bf16 %v486_v28, %v486_v28  ;;  %v485_v32 = vpack.c.bf16 %v458_v29, %v455_v27  ;;  %v479_v38 = vadd.f32 %v886_v30, %v817_v21 }
  0xf7   : > { %v470_v33 = vpop.f32.mrf.mxu0 }
  0xf8   : > { %v494_v34 = vmul.bf16 %v490_v31, %v486_v28  ;;  %v489_v35 = vmul.bf16 %v485_v32, %v485_v32  ;;  %v471_v41 = vadd.f32 %v817_v21, %v470_v33 }
  0xf9   : > { %v887_v36 = vpop.f32.mrf.mxu0 }
  0xfa   : > { %v498_v37 = vmul.bf16 1027030327, %v494_v34  ;;  %v482_v39 = vadd.f32 %v887_v36, %v817_v21  ;;  %v493_v40 = vmul.bf16 %v489_v35, %v485_v32 }
  0xfb   : > { %v473_v42 = vpop.f32.mrf.mxu0 }
  0xfc   : > { %v502_v43 = vadd.bf16 %v498_v37, %v486_v28  ;;  %v488_v44 = vpack.c.bf16 %v482_v39, %v479_v38  ;;  %v474_v45 = vadd.f32 %v817_v21, %v473_v42  ;;  %v497_v46 = vmul.bf16 1027030327, %v493_v40 }
  0xfe   : > { %v492_v47 = vmul.bf16 %v488_v44, %v488_v44  ;;  %v487_v48 = vpack.c.bf16 %v474_v45, %v471_v41  ;;  %v501_v49 = vadd.bf16 %v497_v46, %v485_v32  ;;  %v506_v50 = vmul.bf16 1061961548, %v502_v43 }
 0x100   : > { %v496_v51 = vmul.bf16 %v492_v47, %v488_v44  ;;  %v491_v52 = vmul.bf16 %v487_v48, %v487_v48  ;;  %v505_v53 = vmul.bf16 1061961548, %v501_v49  ;;  %956 = vtanh.bf16 %v506_v50 }
 0x102   : > { %v500_v54 = vmul.bf16 1027030327, %v496_v51  ;;  %v495_v55 = vmul.bf16 %v491_v52, %v487_v48  ;;  %958 = vtanh.bf16 %v505_v53 }
 0x104   : > { %v504_v56 = vadd.bf16 %v500_v54, %v488_v44  ;;  %v499_v57 = vmul.bf16 1027030327, %v495_v55 }
 0x106   : > { %v503_v58 = vadd.bf16 %v499_v57, %v487_v48  ;;  %v508_v59 = vmul.bf16 1061961548, %v504_v56 }
 0x108   : > { %v507_v60 = vmul.bf16 1061961548, %v503_v58  ;;  %960 = vtanh.bf16 %v508_v59 }
 0x10a   : > { %962 = vtanh.bf16 %v507_v60 }
 0x10e   : > { %v957_v61 = vpop.eup %956 }
 0x10f   : > { %v514_v62 = vadd.bf16 1065369472, %v957_v61 }
 0x110   : > { %v959_v63 = vpop.eup %958 }
 0x111   : > { %v513_v0 = vadd.bf16 1065369472, %v959_v63  ;;  %v518_v1 = vmul.bf16 1056980736, %v514_v62 }
 0x113   : > { %v517_v2 = vmul.bf16 1056980736, %v513_v0  ;;  %v522_v5 = vmul.bf16 %v518_v1, %v486_v28 }
 0x115   : > { %v521_v3 = vmul.bf16 %v517_v2, %v485_v32 }
 0x116   : > { %v961_v4 = vpop.eup %960 }
 0x117   : > { %904 = vmatprep.mubr.bf16.mxu1 %v521_v3  ;;  %v516_v6 = vadd.bf16 1065369472, %v961_v4 }
 0x118   : > { %v963_v7 = vpop.eup %962  ;;  %905 = vmatmul.mubr.bf16.vlgmr.msra.gmra.mxu1 %v522_v5 }
 0x119   : > { %v515_v8 = vadd.bf16 1065369472, %v963_v7  ;;  %v520_v9 = vmul.bf16 1056980736, %v516_v6 }
 0x11b   : > { %v519_v10 = vmul.bf16 1056980736, %v515_v8  ;;  %v524_v12 = vmul.bf16 %v520_v9, %v488_v44 }
 0x11d   : > { %v523_v11 = vmul.bf16 %v519_v10, %v487_v48 }
 0x11f   : > { %908 = vmatprep.mubr.bf16.mxu1 %v523_v11 }
 0x120   : > { %909 = vmatmul.mubr.bf16.gmra.mxu1 %v524_v12 }
 0x1d8   : > { %v906_v14 = vpop.f32.mrf.mxu1 }
 0x1d9   : > { %v664_v15 = vadd.f32 %v906_v14, %v816_v13 }
 0x1da   : > { %v631_v16 = vpop.f32.mrf.mxu1 }
 0x1db   : > { %691 = vst [vmem:[%s291_s23 + $0x10] sm:$0xff] %v664_v15  ;;  %v662_v17 = vadd.f32 %v816_v13, %v631_v16 }
 0x1dc   : > { %v907_v18 = vpop.f32.mrf.mxu1 }
 0x1dd   : > { %689 = vst [vmem:[%s291_s23] sm:$0xff] %v662_v17  ;;  %v665_v19 = vadd.f32 %v907_v18, %v816_v13 }
 0x1de   : > { %v634_v20 = vpop.f32.mrf.mxu1 }
 0x1df   : > { %692 = vst [vmem:[%s291_s23 + $0x18] sm:$0xff] %v665_v19  ;;  %v663_v21 = vadd.f32 %v816_v13, %v634_v20 }
 0x1e0   : > { %v910_v22 = vpop.f32.mrf.mxu1 }
 0x1e1   : > { %690 = vst [vmem:[%s291_s23 + $0x8] sm:$0xff] %v663_v21  ;;  %v668_v23 = vadd.f32 %v910_v22, %v816_v13 }
 0x1e2   : > { %v647_v24 = vpop.f32.mrf.mxu1 }
 0x1e3   : > { %695 = vst [vmem:[%s291_s23 + $0x30] sm:$0xff] %v668_v23  ;;  %v666_v25 = vadd.f32 %v816_v13, %v647_v24 }
 0x1e4   : > { %v911_v26 = vpop.f32.mrf.mxu1 }
 0x1e5   : > { %693 = vst [vmem:[%s291_s23 + $0x20] sm:$0xff] %v666_v25  ;;  %v669_v27 = vadd.f32 %v911_v26, %v816_v13 }
 0x1e6   : > { %v650_v28 = vpop.f32.mrf.mxu1 }
 0x1e7   : > { %696 = vst [vmem:[%s291_s23 + $0x38] sm:$0xff] %v669_v27  ;;  %v667_v29 = vadd.f32 %v816_v13, %v650_v28 }
 0x1e9   : > { %694 = vst [vmem:[%s291_s23 + $0x28] sm:$0xff] %v667_v29 }
 0x1ea PF: > { %s15_s20 = sadd.s32 1, %s986_s20   ;;  %s1115_s18 = smov %s982_s19 }
 0x1eb   : > { %p12_p5 = scmp.ge.s32.totalorder %s15_s20, 4   ;;  %s1116_s19 = smov %s1118_s21 }
 0x1ed   :  { %14 = sbr.rel (!%p12_p5) target bundleno = 2 (0x2), region = 87 }

// kernel: microdit_forward.22
= control target key start
LH: loop header
LB: loop body
LE: loop exit
PB: predicated region body
PF: predicated region fallthrough
CT: control target
= control target key end

     0   :  { %s2449_s0 = inlined_call_operand.vmem [shape: bf16[128,128], index: 0, kind: input, shape index: {}]   ;;  %s2450_s1 = inlined_call_operand.vmem [shape: bf16[128,2048], index: 1, kind: input, shape index: {}]   ;;  %s2451_s2 = inlined_call_operand.vmem [shape: f32[1,2048], index: 2, kind: input, shape index: {}]   ;;  %s2452_s3 = inlined_call_operand.vmem [shape: bf16[2048,128], index: 3, kind: input, shape index: {}]   ;;  %s2453_s4 = inlined_call_operand.vmem [shape: f32[1,128], index: 4, kind: input, shape index: {}]   ;;  %s2454_s5 = inlined_call_operand.vmem [shape: f32[1,128], index: 5, kind: input, shape index: {}]   ;;  %s2455_s6 = inlined_call_operand.vmem [shape: f32[1,128], index: 6, kind: input, shape index: {}]   ;;  %s2456_s7 = inlined_call_operand.vmem [shape: bf16[128,128], index: 7, kind: output, shape index: {}]  }
   0x1   :  { %2457 = sst [smem:[#allocation4_spill]] %s2450_s1 }
   0x2   :  { %s2078_s24 = smov 0   ;;  %s2080_s25 = smov 0  }
   0x3   :  { %s2082_s26 = smov 0   ;;  %s2084_s27 = smov 0  }
   0x4   :  { %s2086_s28 = smov 0   ;;  %s2088_s29 = smov 0  }
   0x5   :  { %s2090_s30 = smov 0  }
   0x6 LB: > { %s26_s8 = sadd.s32 1, %s2027_s28  ;;  %s29_s9 = sadd.s32 1, %s2031_s29  ;;  %s2035_s30 = sphi %s2090_s30, %s17_s30   ;;  %s2031_s29 = sphi %s2088_s29, %s2464_s29   ;;  %s2027_s28 = sphi %s2086_s28, %s2463_s28   ;;  %s2023_s27 = sphi %s2084_s27, %s2462_s27   ;;  %s2019_s26 = sphi %s2082_s26, %s2461_s26   ;;  %s2015_s25 = sphi %s2080_s25, %s2460_s25   ;;  %s2011_s24 = sphi %s2078_s24, %s2459_s24  }
   0x7   : > { %p27_p0 = scmp.ge.s32.totalorder %s26_s8, 4  ;;  %s62_s10 = sadd.s32 1, %s2015_s25 }
   0x8   : > { %p69_p1 = scmp.ne.s32.totalorder %s2015_s25, %s2011_s24  ;;  %p70_p2 = scmp.eq.s32.totalorder %s2035_s30, 0 }
   0x9   : > { %s2466_s8 = smov (%p27_p0, %s26_s8), 0  ;;  %s2468_s9 = smov (!%p27_p0, %s29_s9), %s2031_s29 }
   0xa   : > { %s59_s11 = ssub.s32 %s2027_s28, %s2466_s8  ;;  %p71_p3 = por %p70_p2, %p69_p1 }
   0xb   : > { %p31_p4 = scmp.ge.s32.totalorder %s2468_s9, 2  ;;  %p60_p5 = scmp.eq.s32.totalorder %s59_s11, 0 }
   0xc   : > { %p1597_p6 = scmp.ge.s32.totalorder %s2035_s30, 8 }
   0xd   : > { %s2470_s9 = smov (%p31_p4, %s2468_s9), 0 }
   0xe   : > { %s2127_s12 = scalar_select %p60_p5, %s2015_s25, %s62_s10  }
   0xf   : > { %245 = sbr.rel (%p1597_p6) target bundleno = 46 (0x2e), region = 28 }
  0x14   : > { %257 = sbr.rel (!%p71_p3) target bundleno = 46 (0x2e), region = 36  ;;  %s259_s13 = sand.u32 (%p71_p3), 1, %s2015_s25  }
  0x15   : > { %s1693_s14 = sshll.u32 (%p71_p3), %s2027_s28, 4  ;;  %s1598_s15 = sshll.u32 (%p71_p3), %s259_s13, 8 }
  0x16   : > { %s2458_s1 = sld [smem:[#allocation4_spill]] (%p71_p3)  ;;  %s2140_s19 = scalar_lea.vmem (%p71_p3), [#allocation3], %s1598_s15 }
  0x1c   : > { %s2135_s18 = scalar_lea.vmem %s2458_s1, %s1693_s14 }
  0x1d   : > { %v277_v0 = vld [vmem:[%s2135_s18] sm:$0xff]  ;;  %v279_v1 = vld [vmem:[%s2135_s18 + $0x8] sm:$0xff] }
  0x1e   : > { %v281_v2 = vld [vmem:[%s2135_s18 + $0x40] sm:$0xff]  ;;  %278 = vst [vmem:[%s2140_s19] sm:$0xff] %v277_v0  ;;  %280 = vst [vmem:[%s2140_s19 + $0x8] sm:$0xff] %v279_v1  ;;  %v283_v3 = vld [vmem:[%s2135_s18 + $0x48] sm:$0xff] }
  0x1f   : > { %282 = vst [vmem:[%s2140_s19 + $0x10] sm:$0xff] %v281_v2  ;;  %v285_v4 = vld [vmem:[%s2135_s18 + $0x80] sm:$0xff]  ;;  %v287_v5 = vld [vmem:[%s2135_s18 + $0x88] sm:$0xff]  ;;  %284 = vst [vmem:[%s2140_s19 + $0x18] sm:$0xff] %v283_v3 }
  0x20   : > { %286 = vst [vmem:[%s2140_s19 + $0x20] sm:$0xff] %v285_v4  ;;  %288 = vst [vmem:[%s2140_s19 + $0x28] sm:$0xff] %v287_v5  ;;  %v289_v6 = vld [vmem:[%s2135_s18 + $0xc0] sm:$0xff]  ;;  %v291_v7 = vld [vmem:[%s2135_s18 + $0xc8] sm:$0xff] }
  0x21   : > { %v293_v8 = vld [vmem:[%s2135_s18 + $0x100] sm:$0xff]  ;;  %290 = vst [vmem:[%s2140_s19 + $0x30] sm:$0xff] %v289_v6  ;;  %292 = vst [vmem:[%s2140_s19 + $0x38] sm:$0xff] %v291_v7  ;;  %v295_v9 = vld [vmem:[%s2135_s18 + $0x108] sm:$0xff] }
  0x22   : > { %294 = vst [vmem:[%s2140_s19 + $0x40] sm:$0xff] %v293_v8  ;;  %v297_v10 = vld [vmem:[%s2135_s18 + $0x140] sm:$0xff]  ;;  %v299_v11 = vld [vmem:[%s2135_s18 + $0x148] sm:$0xff]  ;;  %296 = vst [vmem:[%s2140_s19 + $0x48] sm:$0xff] %v295_v9 }
  0x23   : > { %298 = vst [vmem:[%s2140_s19 + $0x50] sm:$0xff] %v297_v10  ;;  %300 = vst [vmem:[%s2140_s19 + $0x58] sm:$0xff] %v299_v11  ;;  %v301_v12 = vld [vmem:[%s2135_s18 + $0x180] sm:$0xff]  ;;  %v303_v13 = vld [vmem:[%s2135_s18 + $0x188] sm:$0xff] }
  0x24   : > { %v305_v14 = vld [vmem:[%s2135_s18 + $0x1c0] sm:$0xff]  ;;  %302 = vst [vmem:[%s2140_s19 + $0x60] sm:$0xff] %v301_v12  ;;  %304 = vst [vmem:[%s2140_s19 + $0x68] sm:$0xff] %v303_v13  ;;  %v307_v15 = vld [vmem:[%s2135_s18 + $0x1c8] sm:$0xff] }
  0x25   : > { %306 = vst [vmem:[%s2140_s19 + $0x70] sm:$0xff] %v305_v14  ;;  %v309_v16 = vld [vmem:[%s2135_s18 + $0x200] sm:$0xff]  ;;  %v311_v17 = vld [vmem:[%s2135_s18 + $0x208] sm:$0xff]  ;;  %308 = vst [vmem:[%s2140_s19 + $0x78] sm:$0xff] %v307_v15 }
  0x26   : > { %310 = vst [vmem:[%s2140_s19 + $0x80] sm:$0xff] %v309_v16  ;;  %312 = vst [vmem:[%s2140_s19 + $0x88] sm:$0xff] %v311_v17  ;;  %v313_v18 = vld [vmem:[%s2135_s18 + $0x240] sm:$0xff]  ;;  %v315_v19 = vld [vmem:[%s2135_s18 + $0x248] sm:$0xff] }
  0x27   : > { %v317_v20 = vld [vmem:[%s2135_s18 + $0x280] sm:$0xff]  ;;  %314 = vst [vmem:[%s2140_s19 + $0x90] sm:$0xff] %v313_v18  ;;  %316 = vst [vmem:[%s2140_s19 + $0x98] sm:$0xff] %v315_v19  ;;  %v319_v21 = vld [vmem:[%s2135_s18 + $0x288] sm:$0xff] }
  0x28   : > { %318 = vst [vmem:[%s2140_s19 + $0xa0] sm:$0xff] %v317_v20  ;;  %v321_v22 = vld [vmem:[%s2135_s18 + $0x2c0] sm:$0xff]  ;;  %v323_v23 = vld [vmem:[%s2135_s18 + $0x2c8] sm:$0xff]  ;;  %320 = vst [vmem:[%s2140_s19 + $0xa8] sm:$0xff] %v319_v21 }
  0x29   : > { %322 = vst [vmem:[%s2140_s19 + $0xb0] sm:$0xff] %v321_v22  ;;  %324 = vst [vmem:[%s2140_s19 + $0xb8] sm:$0xff] %v323_v23  ;;  %v325_v24 = vld [vmem:[%s2135_s18 + $0x300] sm:$0xff]  ;;  %v327_v25 = vld [vmem:[%s2135_s18 + $0x308] sm:$0xff] }
  0x2a   : > { %v329_v26 = vld [vmem:[%s2135_s18 + $0x340] sm:$0xff]  ;;  %326 = vst [vmem:[%s2140_s19 + $0xc0] sm:$0xff] %v325_v24  ;;  %328 = vst [vmem:[%s2140_s19 + $0xc8] sm:$0xff] %v327_v25  ;;  %v331_v27 = vld [vmem:[%s2135_s18 + $0x348] sm:$0xff] }
  0x2b   : > { %330 = vst [vmem:[%s2140_s19 + $0xd0] sm:$0xff] %v329_v26  ;;  %v333_v28 = vld [vmem:[%s2135_s18 + $0x380] sm:$0xff]  ;;  %v335_v29 = vld [vmem:[%s2135_s18 + $0x388] sm:$0xff]  ;;  %332 = vst [vmem:[%s2140_s19 + $0xd8] sm:$0xff] %v331_v27 }
  0x2c   : > { %334 = vst [vmem:[%s2140_s19 + $0xe0] sm:$0xff] %v333_v28  ;;  %336 = vst [vmem:[%s2140_s19 + $0xe8] sm:$0xff] %v335_v29  ;;  %v337_v30 = vld [vmem:[%s2135_s18 + $0x3c0] sm:$0xff]  ;;  %v339_v31 = vld [vmem:[%s2135_s18 + $0x3c8] sm:$0xff] }
  0x2d   : > { %338 = vst [vmem:[%s2140_s19 + $0xf0] sm:$0xff] %v337_v30  ;;  %340 = vst [vmem:[%s2140_s19 + $0xf8] sm:$0xff] %v339_v31 }
  0x2e PF: > { %p1601_p7 = scmp.ge.s32.totalorder %s2035_s30, 1  ;;  %p362_p8 = scmp.lt.s32.totalorder %s2035_s30, 9 }
  0x30   : > { %p363_p9 = pnand %p1601_p7, %p362_p8 }
  0x31   : > { %s369_s20 = sand.u32 (!%p363_p9), 1, %s2011_s24   ;;  %s1603_s21 = sshll.u32 (!%p363_p9), %s2023_s27, 3 }
  0x32   : > { %366 = sbr.rel (%p363_p9) target bundleno = 869 (0x365), region = 67  ;;  %s1602_s22 = sshll.u32 (!%p363_p9), %s369_s20, 8 }
  0x33   : > { %p415_p10 = scmp.lt.s32.totalorder (!%p363_p9), %s1603_s21, 15  ;;  %s1605_s23 = sshll.u32 (!%p363_p9), %s2019_s26, 2 }
  0x34   : > { %p422_p11 = scmp.lt.s32.totalorder (!%p363_p9), %s1605_s23, 15  ;;  %s1606_s10 = sshll.u32 (!%p363_p9), %s2019_s26, 6 }
  0x35   : > { %p427_p12 = scmp.lt.s32.totalorder (!%p363_p9), %s1606_s10, 255  ;;  %s2230_s14 = scalar_lea.vmem (!%p363_p9), [#allocation3], %s1602_s22 }
  0x36   : > { %p1610_p13 = scmp.ne.s32.totalorder (!%p363_p9), %s2019_s26, 0 }
  0x37   : > { %s2472_s21 = smov (!%p415_p10, %s1603_s21), 15  ;;  %s2474_s23 = smov (!%p422_p11, %s1605_s23), 15 }
  0x38   : > { %s1604_s11 = sshll.u32 %s2472_s21, 2  ;;  %s2476_s10 = smov (!%p427_p12, %s1606_s10), 255 }
  0x39   : > { %s2212_s15 = scalar_lea.vmem %s2449_s0, %s1604_s11  ;;  %s2217_s18 = scalar_lea.vmem %s2456_s7, %s1604_s11 }
  0x3a   : > { %s424_s19 = scalar_lea.vmem %s2451_s2, %s2474_s23  ;;  %s1607_s20 = sshll.u32 %s2476_s10, 2 }
  0x3b   : > { %s2228_s13 = scalar_lea.vmem %s2452_s3, %s1607_s20  ;;  %442 = sbr.rel (%p1610_p13) target bundleno = 69 (0x45), region = 75 }
  0x40   : > { %v1611_v32 = vld [vmem:[%s2453_s4] ss:$0 sm:$0xff] }
  0x41   : > { %450 = vst [vmem:[#allocation2 + $0x30] sm:$0xff] %v1611_v32  ;;  %451 = vst [vmem:[#allocation2] sm:$0xff] %v1611_v32 }
  0x42   : > { %452 = vst [vmem:[#allocation2 + $0x18] sm:$0xff] %v1611_v32  ;;  %453 = vst [vmem:[#allocation2 + $0x10] sm:$0xff] %v1611_v32 }
  0x43   : > { %454 = vst [vmem:[#allocation2 + $0x8] sm:$0xff] %v1611_v32  ;;  %455 = vst [vmem:[#allocation2 + $0x20] sm:$0xff] %v1611_v32 }
  0x44   : > { %456 = vst [vmem:[#allocation2 + $0x28] sm:$0xff] %v1611_v32  ;;  %457 = vst [vmem:[#allocation2 + $0x38] sm:$0xff] %v1611_v32 }
  0x45 PF: > { %v1881_v33 = vld [vmem:[%s2230_s14 + $0xe4] ss:$16 sps:$4 sm:$0xff]   ;;  %v1883_v34 = vld [vmem:[%s2230_s14 + $0xec] ss:$16 sps:$4 sm:$0xff]   ;;  %v2037_v35 = vmov 0   ;;  %p1680_p0 = scmp.ne.s32.totalorder %s2019_s26, 3 }
  0x46   : > { %736 = vmatprep.mubr.bf16.mxu0 %v2037_v35  ;;  %809 = vmatprep.mubr.bf16.mxu1 %v2037_v35  ;;  %v1885_v36 = vld [vmem:[%s2230_s14 + $0xe0] ss:$16 sps:$4 sm:$0xff]   ;;  %v1886_v37 = vld [vmem:[%s2230_s14 + $0xe8] ss:$16 sps:$4 sm:$0xff]   ;;  %v1887_v38 = vld [vmem:[%s2230_s14 + $0xc4] ss:$16 sps:$4 sm:$0xff]  }
  0x47   : > { %704 = vmatprep.subr.bf16.mxu0 %v1881_v33  ;;  %777 = vmatprep.subr.bf16.mxu1 %v1883_v34  ;;  %v1889_v39 = vld [vmem:[%s2230_s14 + $0xcc] ss:$16 sps:$4 sm:$0xff]   ;;  %v1891_v40 = vld [vmem:[%s2230_s14 + $0xc0] ss:$16 sps:$4 sm:$0xff]   ;;  %v1892_v41 = vld [vmem:[%s2230_s14 + $0xc8] ss:$16 sps:$4 sm:$0xff]  }
  0x48   : > { %705 = vmatpush1.bf16.msra.mxu0 %v1885_v36  ;;  %778 = vmatpush1.bf16.msra.mxu1 %v1886_v37  ;;  %v1893_v42 = vld [vmem:[%s2230_s14 + $0xa4] ss:$16 sps:$4 sm:$0xff]   ;;  %v1895_v43 = vld [vmem:[%s2230_s14 + $0xac] ss:$16 sps:$4 sm:$0xff]   ;;  %v1897_v44 = vld [vmem:[%s2230_s14 + $0xa0] ss:$16 sps:$4 sm:$0xff]  }
  0x49   : > { %706 = vmatprep.subr.bf16.mxu0 %v1887_v38  ;;  %779 = vmatprep.subr.bf16.mxu1 %v1889_v39  ;;  %v1898_v45 = vld [vmem:[%s2230_s14 + $0xa8] ss:$16 sps:$4 sm:$0xff]   ;;  %v1899_v46 = vld [vmem:[%s2230_s14 + $0x84] ss:$16 sps:$4 sm:$0xff]   ;;  %v1901_v47 = vld [vmem:[%s2230_s14 + $0x8c] ss:$16 sps:$4 sm:$0xff]   ;;  %v500_v39 = vlaneseq }
  0x4a   : > { %v1903_v48 = vld [vmem:[%s2230_s14 + $0x80] ss:$16 sps:$4 sm:$0xff]   ;;  %v1904_v49 = vld [vmem:[%s2230_s14 + $0x88] ss:$16 sps:$4 sm:$0xff]   ;;  %v1905_v50 = vld [vmem:[%s2230_s14 + $0x64] ss:$16 sps:$4 sm:$0xff]  }
  0x4b   : > { %v1907_v51 = vld [vmem:[%s2230_s14 + $0x6c] ss:$16 sps:$4 sm:$0xff]   ;;  %v1909_v52 = vld [vmem:[%s2230_s14 + $0x60] ss:$16 sps:$4 sm:$0xff]   ;;  %v1910_v53 = vld [vmem:[%s2230_s14 + $0x68] ss:$16 sps:$4 sm:$0xff]  }
  0x4c   : > { %707 = vmatpush1.bf16.msra.mxu0 %v1891_v40  ;;  %780 = vmatpush1.bf16.msra.mxu1 %v1892_v41  ;;  %v1911_v54 = vld [vmem:[%s2230_s14 + $0x44] ss:$16 sps:$4 sm:$0xff]   ;;  %v1913_v55 = vld [vmem:[%s2230_s14 + $0x4c] ss:$16 sps:$4 sm:$0xff]   ;;  %v1915_v56 = vld [vmem:[%s2230_s14 + $0x40] ss:$16 sps:$4 sm:$0xff]  }
  0x4d   : > { %708 = vmatprep.subr.bf16.mxu0 %v1893_v42  ;;  %781 = vmatprep.subr.bf16.mxu1 %v1895_v43  ;;  %v1916_v57 = vld [vmem:[%s2230_s14 + $0x48] ss:$16 sps:$4 sm:$0xff]   ;;  %v1917_v58 = vld [vmem:[%s2230_s14 + $0x24] ss:$16 sps:$4 sm:$0xff]   ;;  %v1919_v59 = vld [vmem:[%s2230_s14 + $0x2c] ss:$16 sps:$4 sm:$0xff]  }
  0x4e   : > { %v1921_v60 = vld [vmem:[%s2230_s14 + $0x20] ss:$16 sps:$4 sm:$0xff]   ;;  %v1922_v61 = vld [vmem:[%s2230_s14 + $0x28] ss:$16 sps:$4 sm:$0xff]   ;;  %v1923_v62 = vld [vmem:[%s2230_s14 + $0x4] ss:$16 sps:$4 sm:$0xff]  }
  0x4f   : > { %v1925_v63 = vld [vmem:[%s2230_s14 + $0xc] ss:$16 sps:$4 sm:$0xff]   ;;  %v1927_v0 = vld [vmem:[%s2230_s14] ss:$16 sps:$4 sm:$0xff]   ;;  %v1928_v1 = vld [vmem:[%s2230_s14 + $0x8] ss:$16 sps:$4 sm:$0xff]  }
  0x50   : > { %709 = vmatpush1.bf16.msra.mxu0 %v1897_v44  ;;  %782 = vmatpush1.bf16.msra.mxu1 %v1898_v45  ;;  %v1933_v2 = vld [vmem:[%s2228_s13 + $0x78] sm:$0xff]   ;;  %v1929_v4 = vld [vmem:[%s2212_s15] sm:$0xff]   ;;  %v1937_v7 = vld [vmem:[%s2228_s13 + $0x70] sm:$0xff]   ;;  %v501_v40 = vshrl.u32 %v500_v39, 7 }
  0x51   : > { %710 = vmatprep.subr.bf16.mxu0 %v1899_v46  ;;  %783 = vmatprep.subr.bf16.mxu1 %v1901_v47  ;;  %v1934_v3 = vld [vmem:[%s2228_s13 + $0xf8] sm:$0xff]   ;;  %v1938_v8 = vld [vmem:[%s2228_s13 + $0xf0] sm:$0xff]   ;;  %v1930_v11 = vld [vmem:[%s2212_s15 + $0x8] sm:$0xff]  }
  0x52   : > { %v1935_v5 = vld [vmem:[%s2228_s13 + $0x38] sm:$0xff]   ;;  %v1939_v9 = vld [vmem:[%s2228_s13 + $0x30] sm:$0xff]   ;;  %v1941_v12 = vld [vmem:[%s2228_s13 + $0x68] sm:$0xff]   ;;  %v502_v41 = vsub.s32 0, %v501_v40  ;;  %v510_v42 = vsub.s32 2, %v501_v40  ;;  %v506_v44 = vsub.s32 1, %v501_v40 }
  0x53   : > { %v1936_v6 = vld [vmem:[%s2228_s13 + $0xb8] sm:$0xff]   ;;  %v1940_v10 = vld [vmem:[%s2228_s13 + $0xb0] sm:$0xff]   ;;  %v1942_v13 = vld [vmem:[%s2228_s13 + $0xe8] sm:$0xff]   ;;  %v514_v45 = vsub.s32 3, %v501_v40 }
  0x54   : > { %711 = vmatpush1.bf16.msra.mxu0 %v1903_v48  ;;  %784 = vmatpush1.bf16.msra.mxu1 %v1904_v49  ;;  %v1943_v14 = vld [vmem:[%s2228_s13 + $0x28] sm:$0xff]   ;;  %v1945_v16 = vld [vmem:[%s2228_s13 + $0x60] sm:$0xff]   ;;  %v1931_v20 = vld [vmem:[%s2212_s15 + $0x10] sm:$0xff]  }
  0x55   : > { %712 = vmatprep.subr.bf16.mxu0 %v1905_v50  ;;  %785 = vmatprep.subr.bf16.mxu1 %v1907_v51  ;;  %v1944_v15 = vld [vmem:[%s2228_s13 + $0xa8] sm:$0xff]   ;;  %v1946_v17 = vld [vmem:[%s2228_s13 + $0xe0] sm:$0xff]   ;;  %v1949_v21 = vld [vmem:[%s2228_s13 + $0x58] sm:$0xff]  }
  0x56   : > { %v1947_v18 = vld [vmem:[%s2228_s13 + $0x20] sm:$0xff]   ;;  %v1950_v22 = vld [vmem:[%s2228_s13 + $0xd8] sm:$0xff]   ;;  %v1953_v26 = vld [vmem:[%s2228_s13 + $0x50] sm:$0xff]  }
  0x57   : > { %v1948_v19 = vld [vmem:[%s2228_s13 + $0xa0] sm:$0xff]   ;;  %v1951_v23 = vld [vmem:[%s2228_s13 + $0x18] sm:$0xff]   ;;  %v1954_v27 = vld [vmem:[%s2228_s13 + $0xd0] sm:$0xff]  }
  0x58   : > { %713 = vmatpush1.bf16.msra.mxu0 %v1909_v52  ;;  %786 = vmatpush1.bf16.msra.mxu1 %v1910_v53  ;;  %v1952_v24 = vld [vmem:[%s2228_s13 + $0x98] sm:$0xff]   ;;  %v1955_v28 = vld [vmem:[%s2228_s13 + $0x10] sm:$0xff]   ;;  %v1957_v30 = vld [vmem:[%s2228_s13 + $0x48] sm:$0xff]  }
  0x59   : > { %714 = vmatprep.subr.bf16.mxu0 %v1911_v54  ;;  %787 = vmatprep.subr.bf16.mxu1 %v1913_v55  ;;  %v1932_v25 = vld [vmem:[%s2212_s15 + $0x18] sm:$0xff]   ;;  %v1956_v29 = vld [vmem:[%s2228_s13 + $0x90] sm:$0xff]   ;;  %v1958_v31 = vld [vmem:[%s2228_s13 + $0xc8] sm:$0xff]  }
  0x5a   : > { %v1959_v32 = vld [vmem:[%s2228_s13 + $0x8] sm:$0xff]   ;;  %v1961_v34 = vld [vmem:[%s2228_s13 + $0x40] sm:$0xff]  }
  0x5b   : > { %v1960_v33 = vld [vmem:[%s2228_s13 + $0x88] sm:$0xff]   ;;  %v1962_v36 = vld [vmem:[%s2228_s13 + $0xc0] sm:$0xff]  }
  0x5c   : > { %715 = vmatpush1.bf16.msra.mxu0 %v1915_v56  ;;  %788 = vmatpush1.bf16.msra.mxu1 %v1916_v57  ;;  %v1963_v37 = vld [vmem:[%s2228_s13] sm:$0xff]  }
  0x5d   : > { %716 = vmatprep.subr.bf16.mxu0 %v1917_v58  ;;  %789 = vmatprep.subr.bf16.mxu1 %v1919_v59  ;;  %v1964_v38 = vld [vmem:[%s2228_s13 + $0x80] sm:$0xff]  }
  0x5e   : > { %v498_v43 = vld [vmem:[%s424_s19] sm:$0xf] }
  0x5f   : > { %v2317_v48 = vrot.slane %v498_v43, %v502_v41  ;;  %v2319_v49 = vrot.slane %v498_v43, %v510_v42  ;;  %v2321_v52 = vrot.slane %v498_v43, %v506_v44  ;;  %v2323_v53 = vrot.slane %v498_v43, %v514_v45 }
  0x60   : > { %717 = vmatpush1.bf16.msra.mxu0 %v1921_v60  ;;  %790 = vmatpush1.bf16.msra.mxu1 %v1922_v61 }
  0x61   : > { %718 = vmatprep.subr.bf16.mxu0 %v1923_v62  ;;  %791 = vmatprep.subr.bf16.mxu1 %v1925_v63 }
  0x64   : > { %719 = vmatpush1.bf16.msra.mxu0 %v1927_v0  ;;  %792 = vmatpush1.bf16.msra.mxu1 %v1928_v1 }
  0x65   : > { %1744 = vmatprep.subr.bf16.mxu0 %v1933_v2  ;;  %1784 = vmatprep.subr.bf16.mxu1 %v1934_v3 }
  0x67   : > { %737 = vmatmul.mubr.bf16.vlgmr.msra.gmra.mxu0 %v1929_v4  ;;  %810 = vmatmul.mubr.bf16.vlgmr.msra.gmra.mxu1 %v1929_v4 }
  0x68   : > { %746 = vmatprep.mubr.bf16.mxu0 %v2037_v35  ;;  %819 = vmatprep.mubr.bf16.mxu1 %v2037_v35 }
  0x69   : > { %1745 = vmatpush3.bf16.msra.mxu0 %v1935_v5  ;;  %1785 = vmatpush3.bf16.msra.mxu1 %v1936_v6 }
  0x6a   : > { %1746 = vmatprep.subr.bf16.mxu0 %v1937_v7  ;;  %1786 = vmatprep.subr.bf16.mxu1 %v1938_v8 }
  0x6d   : > { %1747 = vmatpush3.bf16.msra.mxu0 %v1939_v9  ;;  %1787 = vmatpush3.bf16.msra.mxu1 %v1940_v10 }
  0x6e   : > { %1748 = vmatprep.subr.bf16.mxu0 %v1941_v12  ;;  %1788 = vmatprep.subr.bf16.mxu1 %v1942_v13 }
  0x6f   : > { %747 = vmatmul.mubr.bf16.gmra.mxu0 %v1930_v11  ;;  %820 = vmatmul.mubr.bf16.gmra.mxu1 %v1930_v11 }
  0x70   : > { %756 = vmatprep.mubr.bf16.mxu0 %v2037_v35  ;;  %829 = vmatprep.mubr.bf16.mxu1 %v2037_v35 }
  0x71   : > { %1749 = vmatpush3.bf16.msra.mxu0 %v1943_v14  ;;  %1789 = vmatpush3.bf16.msra.mxu1 %v1944_v15 }
  0x72   : > { %1750 = vmatprep.subr.bf16.mxu0 %v1945_v16  ;;  %1790 = vmatprep.subr.bf16.mxu1 %v1946_v17 }
  0x75   : > { %1751 = vmatpush3.bf16.msra.mxu0 %v1947_v18  ;;  %1791 = vmatpush3.bf16.msra.mxu1 %v1948_v19 }
  0x76   : > { %1752 = vmatprep.subr.bf16.mxu0 %v1949_v21  ;;  %1792 = vmatprep.subr.bf16.mxu1 %v1950_v22 }
  0x77   : > { %757 = vmatmul.mubr.bf16.gmra.mxu0 %v1931_v20  ;;  %830 = vmatmul.mubr.bf16.gmra.mxu1 %v1931_v20 }
  0x78   : > { %766 = vmatprep.mubr.bf16.mxu0 %v2037_v35  ;;  %839 = vmatprep.mubr.bf16.mxu1 %v2037_v35 }
  0x79   : > { %1753 = vmatpush3.bf16.msra.mxu0 %v1951_v23  ;;  %1793 = vmatpush3.bf16.msra.mxu1 %v1952_v24 }
  0x7a   : > { %1754 = vmatprep.subr.bf16.mxu0 %v1953_v26  ;;  %1794 = vmatprep.subr.bf16.mxu1 %v1954_v27 }
  0x7d   : > { %1755 = vmatpush3.bf16.msra.mxu0 %v1955_v28  ;;  %1795 = vmatpush3.bf16.msra.mxu1 %v1956_v29 }
  0x7e   : > { %1756 = vmatprep.subr.bf16.mxu0 %v1957_v30  ;;  %1796 = vmatprep.subr.bf16.mxu1 %v1958_v31 }
  0x7f   : > { %767 = vmatmul.mubr.bf16.gmra.mxu0 %v1932_v25  ;;  %840 = vmatmul.mubr.bf16.gmra.mxu1 %v1932_v25 }
  0x81   : > { %1757 = vmatpush3.bf16.msra.mxu0 %v1959_v32  ;;  %1797 = vmatpush3.bf16.msra.mxu1 %v1960_v33 }
  0x82   : > { %1758 = vmatprep.subr.bf16.mxu0 %v1961_v34  ;;  %1798 = vmatprep.subr.bf16.mxu1 %v1962_v36 }
  0x85   : > { %1759 = vmatpush3.bf16.msra.mxu0 %v1963_v37  ;;  %1799 = vmatpush3.bf16.msra.mxu1 %v1964_v38 }
 0x127   : > { %v738_v46 = vpop.f32.mrf.mxu0  ;;  %v811_v47 = vpop.f32.mrf.mxu1 }
 0x128   : > { %v739_v58 = vadd.f32 %v738_v46, %v2317_v48  ;;  %v812_v59 = vadd.f32 %v811_v47, %v2319_v49 }
 0x129   : > { %v740_v50 = vpop.f32.mrf.mxu0  ;;  %v813_v51 = vpop.f32.mrf.mxu1 }
 0x12a   : > { %v741_v62 = vadd.f32 %v740_v50, %v2321_v52  ;;  %v814_v63 = vadd.f32 %v813_v51, %v2323_v53 }
 0x12b   : > { %v742_v54 = vpop.f32.mrf.mxu0  ;;  %v815_v55 = vpop.f32.mrf.mxu1 }
 0x12c   : > { %v743_v56 = vadd.f32 %v742_v54, %v2317_v48  ;;  %v816_v57 = vadd.f32 %v815_v55, %v2319_v49 }
 0x12d   : > { %v744_v60 = vpop.f32.mrf.mxu0  ;;  %v817_v61 = vpop.f32.mrf.mxu1 }
 0x12e   : > { %v745_v0 = vadd.f32 %v744_v60, %v2321_v52  ;;  %v818_v1 = vadd.f32 %v817_v61, %v2323_v53  ;;  %v850_v2 = vpack.c.bf16 %v743_v56, %v739_v58  ;;  %v852_v3 = vpack.c.bf16 %v816_v57, %v812_v59 }
 0x12f   : > { %v748_v4 = vpop.f32.mrf.mxu0  ;;  %v821_v5 = vpop.f32.mrf.mxu1 }
 0x130   : > { %v851_v6 = vpack.c.bf16 %v745_v0, %v741_v62  ;;  %v853_v7 = vpack.c.bf16 %v818_v1, %v814_v63  ;;  %v866_v12 = vmax.bf16 %v2037_v35, %v850_v2  ;;  %v868_v13 = vmax.bf16 %v2037_v35, %v852_v3 }
 0x131   : > { %v750_v8 = vpop.f32.mrf.mxu0  ;;  %v823_v9 = vpop.f32.mrf.mxu1  ;;  %v749_v18 = vadd.f32 %v748_v4, %v2317_v48  ;;  %v822_v19 = vadd.f32 %v821_v5, %v2319_v49 }
 0x132   : > { %v867_v10 = vmax.bf16 %v2037_v35, %v851_v6  ;;  %v869_v11 = vmax.bf16 %v2037_v35, %v853_v7  ;;  %v751_v22 = vadd.f32 %v750_v8, %v2321_v52  ;;  %v824_v23 = vadd.f32 %v823_v9, %v2323_v53 }
 0x133   : > { %v752_v14 = vpop.f32.mrf.mxu0  ;;  %v825_v15 = vpop.f32.mrf.mxu1 }
 0x134   : > { %v753_v16 = vadd.f32 %v752_v14, %v2317_v48  ;;  %v826_v17 = vadd.f32 %v825_v15, %v2319_v49  ;;  %1178 = vmatprep.mubr.bf16.mxu0 %v867_v10  ;;  %1243 = vmatprep.mubr.bf16.mxu1 %v869_v11 }
 0x135   : > { %v754_v20 = vpop.f32.mrf.mxu0  ;;  %v827_v21 = vpop.f32.mrf.mxu1  ;;  %1179 = vmatmul.mubr.bf16.vlgmr.msra.gmra.mxu0 %v866_v12  ;;  %1244 = vmatmul.mubr.bf16.vlgmr.msra.gmra.mxu1 %v868_v13 }
 0x136   : > { %v755_v24 = vadd.f32 %v754_v20, %v2321_v52  ;;  %v828_v25 = vadd.f32 %v827_v21, %v2323_v53  ;;  %v854_v26 = vpack.c.bf16 %v753_v16, %v749_v18  ;;  %v856_v27 = vpack.c.bf16 %v826_v17, %v822_v19 }
 0x137   : > { %v758_v28 = vpop.f32.mrf.mxu0  ;;  %v831_v29 = vpop.f32.mrf.mxu1 }
 0x138   : > { %v855_v30 = vpack.c.bf16 %v755_v24, %v751_v22  ;;  %v857_v31 = vpack.c.bf16 %v828_v25, %v824_v23  ;;  %v870_v39 = vmax.bf16 %v2037_v35, %v854_v26  ;;  %v872_v40 = vmax.bf16 %v2037_v35, %v856_v27  ;;  %v882_v25 = vld [vmem:[#allocation2 + $0x30] sm:$0xff] }
 0x139   : > { %v760_v32 = vpop.f32.mrf.mxu0  ;;  %v833_v33 = vpop.f32.mrf.mxu1  ;;  %v759_v43 = vadd.f32 %v758_v28, %v2317_v48  ;;  %v832_v44 = vadd.f32 %v831_v29, %v2319_v49 }
 0x13a   : > { %v871_v34 = vmax.bf16 %v2037_v35, %v855_v30  ;;  %v873_v36 = vmax.bf16 %v2037_v35, %v857_v31  ;;  %v761_v47 = vadd.f32 %v760_v32, %v2321_v52  ;;  %v834_v50 = vadd.f32 %v833_v33, %v2323_v53 }
 0x13b   : > { %v762_v37 = vpop.f32.mrf.mxu0  ;;  %v835_v38 = vpop.f32.mrf.mxu1 }
 0x13c   : > { %v763_v41 = vadd.f32 %v762_v37, %v2317_v48  ;;  %v836_v42 = vadd.f32 %v835_v38, %v2319_v49  ;;  %1186 = vmatprep.mubr.bf16.mxu0 %v871_v34  ;;  %1251 = vmatprep.mubr.bf16.mxu1 %v873_v36 }
 0x13d   : > { %v764_v45 = vpop.f32.mrf.mxu0  ;;  %v837_v46 = vpop.f32.mrf.mxu1  ;;  %1187 = vmatmul.mubr.bf16.gmra.mxu0 %v870_v39  ;;  %1252 = vmatmul.mubr.bf16.gmra.mxu1 %v872_v40 }
 0x13e   : > { %v765_v51 = vadd.f32 %v764_v45, %v2321_v52  ;;  %v838_v54 = vadd.f32 %v837_v46, %v2323_v53  ;;  %v858_v55 = vpack.c.bf16 %v763_v41, %v759_v43  ;;  %v860_v56 = vpack.c.bf16 %v836_v42, %v832_v44  ;;  %v884_v43 = vld [vmem:[#allocation2 + $0x18] sm:$0xff] }
 0x13f   : > { %v768_v57 = vpop.f32.mrf.mxu0  ;;  %v841_v58 = vpop.f32.mrf.mxu1 }
 0x140   : > { %v859_v59 = vpack.c.bf16 %v765_v51, %v761_v47  ;;  %v861_v60 = vpack.c.bf16 %v838_v54, %v834_v50  ;;  %v874_v3 = vmax.bf16 %v2037_v35, %v858_v55  ;;  %v876_v4 = vmax.bf16 %v2037_v35, %v860_v56  ;;  %v885_v56 = vld [vmem:[#allocation2 + $0x10] sm:$0xff] }
 0x141   : > { %v770_v61 = vpop.f32.mrf.mxu0  ;;  %v843_v62 = vpop.f32.mrf.mxu1  ;;  %v769_v7 = vadd.f32 %v768_v57, %v2317_v48  ;;  %v842_v8 = vadd.f32 %v841_v58, %v2319_v49 }
 0x142   : > { %v875_v63 = vmax.bf16 %v2037_v35, %v859_v59  ;;  %v877_v0 = vmax.bf16 %v2037_v35, %v861_v60  ;;  %v771_v11 = vadd.f32 %v770_v61, %v2321_v52  ;;  %v844_v12 = vadd.f32 %v843_v62, %v2323_v53 }
 0x143   : > { %v772_v1 = vpop.f32.mrf.mxu0  ;;  %v845_v2 = vpop.f32.mrf.mxu1 }
 0x144   : > { %v773_v5 = vadd.f32 %v772_v1, %v2317_v48  ;;  %v846_v6 = vadd.f32 %v845_v2, %v2319_v49  ;;  %1194 = vmatprep.mubr.bf16.mxu0 %v875_v63  ;;  %1259 = vmatprep.mubr.bf16.mxu1 %v877_v0  ;;  %v886_v1 = vld [vmem:[#allocation2 + $0x8] sm:$0xff] }
 0x145   : > { %v774_v9 = vpop.f32.mrf.mxu0  ;;  %v847_v10 = vpop.f32.mrf.mxu1  ;;  %1195 = vmatmul.mubr.bf16.gmra.mxu0 %v874_v3  ;;  %1260 = vmatmul.mubr.bf16.gmra.mxu1 %v876_v4 }
 0x146   : > { %v775_v13 = vadd.f32 %v774_v9, %v2321_v52  ;;  %v848_v14 = vadd.f32 %v847_v10, %v2323_v53  ;;  %v862_v15 = vpack.c.bf16 %v773_v5, %v769_v7  ;;  %v864_v16 = vpack.c.bf16 %v846_v6, %v842_v8  ;;  %v887_v10 = vld [vmem:[#allocation2 + $0x20] sm:$0xff] }
 0x148   : > { %v863_v17 = vpack.c.bf16 %v775_v13, %v771_v11  ;;  %v865_v18 = vpack.c.bf16 %v848_v14, %v844_v12  ;;  %v878_v19 = vmax.bf16 %v2037_v35, %v862_v15  ;;  %v880_v20 = vmax.bf16 %v2037_v35, %v864_v16 }
 0x14a   : > { %v879_v48 = vmax.bf16 %v2037_v35, %v863_v17  ;;  %v881_v49 = vmax.bf16 %v2037_v35, %v865_v18  ;;  %v883_v35 = vld [vmem:[#allocation2] sm:$0xff] }
 0x14c   : > { %1202 = vmatprep.mubr.bf16.mxu0 %v879_v48  ;;  %1267 = vmatprep.mubr.bf16.mxu1 %v881_v49  ;;  %v888_v48 = vld [vmem:[#allocation2 + $0x28] sm:$0xff] }
 0x14d   : > { %1203 = vmatmul.mubr.bf16.gmra.mxu0 %v878_v19  ;;  %1268 = vmatmul.mubr.bf16.gmra.mxu1 %v880_v20 }
 0x1f5   : > { %v1760_v21 = vpop.f32.mrf.mxu0  ;;  %v1800_v52 = vpop.f32.mrf.mxu1 }
 0x1f7   : > { %v1761_v22 = vpop.f32.mrf.mxu0  ;;  %v1801_v53 = vpop.f32.mrf.mxu1 }
 0x1f8   : > { %v1762_v23 = vadd.f32 %v1761_v22, %v1760_v21  ;;  %v1802_v24 = vadd.f32 %v1801_v53, %v1800_v52 }
 0x1f9   : > { %v1763_v26 = vpop.f32.mrf.mxu0  ;;  %v1803_v27 = vpop.f32.mrf.mxu1 }
 0x1fa   : > { %v1246_v28 = vadd.f32 %v1802_v24, %v1762_v23  ;;  %v889_v24 = vld [vmem:[#allocation2 + $0x38] sm:$0xff] }
 0x1fb   : > { %v1764_v29 = vpop.f32.mrf.mxu0  ;;  %v1804_v30 = vpop.f32.mrf.mxu1 }
 0x1fc   : > { %v1276_v31 = vadd.f32 %v1246_v28, %v882_v25  ;;  %v1765_v32 = vadd.f32 %v1764_v29, %v1763_v26  ;;  %v1805_v33 = vadd.f32 %v1804_v30, %v1803_v27 }
 0x1fd   : > { %v1766_v34 = vpop.f32.mrf.mxu0  ;;  %v1806_v36 = vpop.f32.mrf.mxu1 }
 0x1fe   : > { %1284 = vst [vmem:[#allocation2 + $0x30] sm:$0xff] %v1276_v31  ;;  %v1249_v37 = vadd.f32 %v1805_v33, %v1765_v32 }
 0x1ff   : > { %v1767_v38 = vpop.f32.mrf.mxu0  ;;  %v1807_v39 = vpop.f32.mrf.mxu1 }
 0x200   : > { %v1277_v40 = vadd.f32 %v1249_v37, %v883_v35  ;;  %v1768_v41 = vadd.f32 %v1767_v38, %v1766_v34  ;;  %v1808_v42 = vadd.f32 %v1807_v39, %v1806_v36 }
 0x201   : > { %v1769_v44 = vpop.f32.mrf.mxu0  ;;  %v1809_v45 = vpop.f32.mrf.mxu1 }
 0x202   : > { %1285 = vst [vmem:[#allocation2] sm:$0xff] %v1277_v40  ;;  %v1254_v46 = vadd.f32 %v1808_v42, %v1768_v41 }
 0x203   : > { %v1770_v47 = vpop.f32.mrf.mxu0  ;;  %v1810_v50 = vpop.f32.mrf.mxu1 }
 0x204   : > { %v1278_v51 = vadd.f32 %v1254_v46, %v884_v43  ;;  %v1771_v54 = vadd.f32 %v1770_v47, %v1769_v44  ;;  %v1811_v55 = vadd.f32 %v1810_v50, %v1809_v45 }
 0x205   : > { %v1772_v57 = vpop.f32.mrf.mxu0  ;;  %v1812_v58 = vpop.f32.mrf.mxu1 }
 0x206   : > { %1286 = vst [vmem:[#allocation2 + $0x18] sm:$0xff] %v1278_v51  ;;  %v1257_v59 = vadd.f32 %v1811_v55, %v1771_v54 }
 0x207   : > { %v1773_v60 = vpop.f32.mrf.mxu0  ;;  %v1813_v61 = vpop.f32.mrf.mxu1 }
 0x208   : > { %v1279_v62 = vadd.f32 %v1257_v59, %v885_v56  ;;  %v1774_v63 = vadd.f32 %v1773_v60, %v1772_v57  ;;  %v1814_v0 = vadd.f32 %v1813_v61, %v1812_v58 }
 0x209   : > { %v1775_v2 = vpop.f32.mrf.mxu0  ;;  %v1815_v3 = vpop.f32.mrf.mxu1 }
 0x20a   : > { %1287 = vst [vmem:[#allocation2 + $0x10] sm:$0xff] %v1279_v62  ;;  %v1262_v4 = vadd.f32 %v1814_v0, %v1774_v63 }
 0x20b   : > { %v1776_v5 = vpop.f32.mrf.mxu0  ;;  %v1816_v6 = vpop.f32.mrf.mxu1 }
 0x20c   : > { %v1280_v7 = vadd.f32 %v1262_v4, %v886_v1  ;;  %v1777_v8 = vadd.f32 %v1776_v5, %v1775_v2  ;;  %v1817_v9 = vadd.f32 %v1816_v6, %v1815_v3 }
 0x20d   : > { %v1778_v11 = vpop.f32.mrf.mxu0  ;;  %v1818_v12 = vpop.f32.mrf.mxu1 }
 0x20e   : > { %1288 = vst [vmem:[#allocation2 + $0x8] sm:$0xff] %v1280_v7  ;;  %v1265_v13 = vadd.f32 %v1817_v9, %v1777_v8 }
 0x20f   : > { %v1779_v14 = vpop.f32.mrf.mxu0  ;;  %v1819_v15 = vpop.f32.mrf.mxu1 }
 0x210   : > { %v1281_v16 = vadd.f32 %v1265_v13, %v887_v10  ;;  %v1780_v17 = vadd.f32 %v1779_v14, %v1778_v11  ;;  %v1820_v18 = vadd.f32 %v1819_v15, %v1818_v12 }
 0x211   : > { %v1781_v49 = vpop.f32.mrf.mxu0  ;;  %v1821_v19 = vpop.f32.mrf.mxu1 }
 0x212   : > { %1289 = vst [vmem:[#allocation2 + $0x20] sm:$0xff] %v1281_v16  ;;  %v1270_v20 = vadd.f32 %v1820_v18, %v1780_v17 }
 0x213   : > { %v1782_v21 = vpop.f32.mrf.mxu0  ;;  %v1822_v52 = vpop.f32.mrf.mxu1 }
 0x214   : > { %v1282_v22 = vadd.f32 %v1270_v20, %v888_v48  ;;  %v1783_v53 = vadd.f32 %v1782_v21, %v1781_v49  ;;  %v1823_v23 = vadd.f32 %v1822_v52, %v1821_v19 }
 0x216   : > { %1290 = vst [vmem:[#allocation2 + $0x28] sm:$0xff] %v1282_v22  ;;  %v1273_v25 = vadd.f32 %v1823_v23, %v1783_v53  ;;  %1295 = sbr.rel (%p1680_p0) target bundleno = 869 (0x365), region = 79 }
 0x218   : > { %v1283_v26 = vadd.f32 %v1273_v25, %v889_v24 }
 0x21a   : > { %1291 = vst [vmem:[#allocation2 + $0x38] sm:$0xff] %v1283_v26 }
 0x21b   : > { %v1296_v27 = vld [vmem:[#allocation2 + $0x30] sm:$0xff]  ;;  %v1703_v28 = vld [vmem:[%s2212_s15] sm:$0xff]   ;;  %v1298_v30 = vld [vmem:[#allocation2 + $0x18] sm:$0xff] }
 0x21c   : > { %v1704_v29 = vunpack.c.l.bf16 %v1703_v28  ;;  %v1738_v31 = vld [vmem:[%s2212_s15 + $0x8] sm:$0xff]   ;;  %v1705_v32 = vunpack.c.h.bf16 %v1703_v28  ;;  %v1297_v35 = vld [vmem:[#allocation2] sm:$0xff]  ;;  %v1739_v36 = vld [vmem:[%s2212_s15 + $0x10] sm:$0xff]  }
 0x21d   : > { %v1708_v33 = vunpack.c.l.bf16 %v1738_v31  ;;  %v1709_v34 = vunpack.c.h.bf16 %v1738_v31  ;;  %v1299_v38 = vld [vmem:[#allocation2 + $0x10] sm:$0xff]  ;;  %v1712_v41 = vunpack.c.l.bf16 %v1739_v36  ;;  %v1300_v43 = vld [vmem:[#allocation2 + $0x8] sm:$0xff]  ;;  %v1713_v44 = vunpack.c.h.bf16 %v1739_v36  ;;  %v1740_v45 = vld [vmem:[%s2212_s15 + $0x18] sm:$0xff]  }
 0x21e   : > { %v1320_v37 = vadd.f32 %v1704_v29, %v1296_v27  ;;  %v1321_v40 = vadd.f32 %v1705_v32, %v1297_v35  ;;  %v1301_v46 = vld [vmem:[#allocation2 + $0x20] sm:$0xff]  ;;  %v1716_v50 = vunpack.c.l.bf16 %v1740_v45  ;;  %v1302_v54 = vld [vmem:[#allocation2 + $0x28] sm:$0xff]  ;;  %v1717_v55 = vunpack.c.h.bf16 %v1740_v45 }
 0x21f   : > { %v1322_v39 = vadd.f32 %v1708_v33, %v1298_v30  ;;  %v1323_v42 = vadd.f32 %v1709_v34, %v1299_v38  ;;  %v1324_v47 = vadd.f32 %v1712_v41, %v1300_v43  ;;  %v1325_v51 = vadd.f32 %v1713_v44, %v1301_v46 }
 0x220   : > { %1328 = vadd.xlane.f32.xlu0 %v1320_v37  ;;  %v1326_v57 = vadd.f32 %v1716_v50, %v1302_v54 }
 0x221   : > { %1332 = vadd.xlane.f32.xlu1 %v1322_v39  ;;  %v1303_v56 = vld [vmem:[#allocation2 + $0x38] sm:$0xff] }
 0x222   : > { %v1327_v58 = vadd.f32 %v1717_v55, %v1303_v56 }
 0x224   : > { %1330 = vadd.xlane.f32.xlu0 %v1321_v40 }
 0x225   : > { %1334 = vadd.xlane.f32.xlu1 %v1323_v42 }
 0x228   : > { %1336 = vadd.xlane.f32.xlu0 %v1324_v47 }
 0x229   : > { %1338 = vadd.xlane.f32.xlu1 %v1325_v51 }
 0x22c   : > { %1340 = vadd.xlane.f32.xlu0 %v1326_v57 }
 0x22d   : > { %1342 = vadd.xlane.f32.xlu1 %v1327_v58 }
 0x2a9   : > { %v1329_v59 = vpop.xlane.xlu0 %1328 }
 0x2aa   : > { %v1345_v60 = vmul.f32 0.0078125, %v1329_v59  ;;  %v1333_v61 = vpop.xlane.xlu1 %1332 }
 0x2ab   : > { %v1347_v62 = vmul.f32 0.0078125, %v1333_v61 }
 0x2ac   : > { %v2378_v63 = vsub.f32 %v1320_v37, %v1345_v60 }
 0x2ad   : > { %v2380_v0 = vsub.f32 %v1322_v39, %v1347_v62  ;;  %v1331_v1 = vpop.xlane.xlu0 %1330 }
 0x2ae   : > { %v1346_v2 = vmul.f32 0.0078125, %v1331_v1  ;;  %v1361_v3 = vmul.f32 %v2378_v63, %v2378_v63  ;;  %v1335_v4 = vpop.xlane.xlu1 %1334 }
 0x2af   : > { %v1348_v5 = vmul.f32 0.0078125, %v1335_v4  ;;  %v1363_v7 = vmul.f32 %v2380_v0, %v2380_v0 }
 0x2b0   : > { %v2384_v6 = vsub.f32 %v1321_v40, %v1346_v2  ;;  %1369 = vadd.xlane.f32.xlu0 %v1361_v3 }
 0x2b1   : > { %v2388_v8 = vsub.f32 %v1323_v42, %v1348_v5  ;;  %v1337_v9 = vpop.xlane.xlu0 %1336 }
 0x2b2   : > { %v1349_v10 = vmul.f32 0.0078125, %v1337_v9  ;;  %v1362_v11 = vmul.f32 %v2384_v6, %v2384_v6  ;;  %v1339_v12 = vpop.xlane.xlu1 %1338 }
 0x2b3   : > { %v1350_v13 = vmul.f32 0.0078125, %v1339_v12  ;;  %v1364_v15 = vmul.f32 %v2388_v8, %v2388_v8 }
 0x2b4   : > { %v2392_v14 = vsub.f32 %v1324_v47, %v1349_v10  ;;  %1373 = vadd.xlane.f32.xlu0 %v1363_v7  ;;  %1371 = vadd.xlane.f32.xlu1 %v1362_v11 }
 0x2b5   : > { %v2396_v16 = vsub.f32 %v1325_v51, %v1350_v13  ;;  %v1341_v17 = vpop.xlane.xlu0 %1340  ;;  %v1681_v51 = vld [vmem:[%s2454_s5] ss:$0 sm:$0xff] }
 0x2b6   : > { %v1351_v18 = vmul.f32 0.0078125, %v1341_v17  ;;  %v1365_v48 = vmul.f32 %v2392_v14, %v2392_v14  ;;  %v1343_v49 = vpop.xlane.xlu1 %1342 }
 0x2b7   : > { %v1352_v19 = vmul.f32 0.0078125, %v1343_v49  ;;  %v1366_v21 = vmul.f32 %v2396_v16, %v2396_v16 }
 0x2b8   : > { %v2400_v20 = vsub.f32 %v1326_v57, %v1351_v18  ;;  %1375 = vadd.xlane.f32.xlu1 %v1364_v15  ;;  %1377 = vadd.xlane.f32.xlu0 %v1365_v48 }
 0x2b9   : > { %v2404_v52 = vsub.f32 %v1327_v58, %v1352_v19  ;;  %v1682_v58 = vld [vmem:[%s2455_s6] ss:$0 sm:$0xff] }
 0x2ba   : > { %v1367_v22 = vmul.f32 %v2400_v20, %v2400_v20 }
 0x2bb   : > { %v1368_v53 = vmul.f32 %v2404_v52, %v2404_v52 }
 0x2bc   : > { %1379 = vadd.xlane.f32.xlu1 %v1366_v21  ;;  %1381 = vadd.xlane.f32.xlu0 %v1367_v22 }
 0x2c0   : > { %1383 = vadd.xlane.f32.xlu1 %v1368_v53 }
 0x339   : > { %v1370_v23 = vpop.xlane.xlu0 %1369 }
 0x33a   : > { %v1385_v24 = vmul.f32 0.0078125, %v1370_v23 }
 0x33c   : > { %v1393_v25 = vadd.f32 1e-05, %v1385_v24 }
 0x33d   : > { %v1372_v26 = vpop.xlane.xlu1 %1371  ;;  %v1374_v27 = vpop.xlane.xlu0 %1373 }
 0x33e   : > { %1965 = vrsqrt.f32 %v1393_v25  ;;  %v1386_v28 = vmul.f32 0.0078125, %v1372_v26  ;;  %v1387_v29 = vmul.f32 0.0078125, %v1374_v27 }
 0x340   : > { %v1394_v30 = vadd.f32 1e-05, %v1386_v28  ;;  %v1395_v31 = vadd.f32 1e-05, %v1387_v29 }
 0x341   : > { %v1376_v32 = vpop.xlane.xlu1 %1375  ;;  %v1378_v33 = vpop.xlane.xlu0 %1377 }
 0x342   : > { %1967 = vrsqrt.f32 %v1394_v30  ;;  %v1388_v35 = vmul.f32 0.0078125, %v1376_v32  ;;  %v1389_v34 = vmul.f32 0.0078125, %v1378_v33 }
 0x343   : > { %1969 = vrsqrt.f32 %v1395_v31 }
 0x344   : > { %v1396_v36 = vadd.f32 1e-05, %v1388_v35  ;;  %v1397_v37 = vadd.f32 1e-05, %v1389_v34 }
 0x345   : > { %v1380_v38 = vpop.xlane.xlu1 %1379  ;;  %v1382_v39 = vpop.xlane.xlu0 %1381 }
 0x346   : > { %1971 = vrsqrt.f32 %v1396_v36  ;;  %v1390_v40 = vmul.f32 0.0078125, %v1380_v38  ;;  %v1391_v41 = vmul.f32 0.0078125, %v1382_v39 }
 0x347   : > { %1973 = vrsqrt.f32 %v1397_v37 }
 0x348   : > { %v1398_v42 = vadd.f32 1e-05, %v1390_v40  ;;  %v1399_v43 = vadd.f32 1e-05, %v1391_v41 }
 0x349   : > { %v1384_v44 = vpop.xlane.xlu1 %1383 }
 0x34a   : > { %1975 = vrsqrt.f32 %v1398_v42  ;;  %v1392_v45 = vmul.f32 0.0078125, %v1384_v44 }
 0x34b   : > { %v1966_v46 = vpop.eup %1965  ;;  %1977 = vrsqrt.f32 %v1399_v43 }
 0x34c   : > { %v1409_v47 = vmul.f32 %v1966_v46, %v2378_v63  ;;  %v1400_v50 = vadd.f32 1e-05, %v1392_v45 }
 0x34e   : > { %1979 = vrsqrt.f32 %v1400_v50  ;;  %v1424_v56 = vmul.f32 %v1681_v51, %v1409_v47 }
 0x34f   : > { %v1968_v54 = vpop.eup %1967 }
 0x350   : > { %v1970_v55 = vpop.eup %1969  ;;  %v1410_v57 = vmul.f32 %v1968_v54, %v2384_v6  ;;  %v1439_v63 = vadd.f32 %v1682_v58, %v1424_v56 }
 0x351   : > { %v1411_v59 = vmul.f32 %v1970_v55, %v2380_v0 }
 0x352   : > { %v1425_v60 = vmul.f32 %v1681_v51, %v1410_v57 }
 0x353   : > { %v1972_v61 = vpop.eup %1971  ;;  %v1426_v2 = vmul.f32 %v1681_v51, %v1411_v59 }
 0x354   : > { %v1974_v62 = vpop.eup %1973  ;;  %v1440_v1 = vadd.f32 %v1682_v58, %v1425_v60  ;;  %v1412_v3 = vmul.f32 %v1972_v61, %v2388_v8 }
 0x355   : > { %v1413_v4 = vmul.f32 %v1974_v62, %v2392_v14  ;;  %v1441_v10 = vadd.f32 %v1682_v58, %v1426_v2 }
 0x356   : > { %v1721_v5 = vpack.c.bf16 %v1440_v1, %v1439_v63  ;;  %v1427_v7 = vmul.f32 %v1681_v51, %v1412_v3 }
 0x357   : > { %v1976_v6 = vpop.eup %1975  ;;  %v1428_v0 = vmul.f32 %v1681_v51, %v1413_v4 }
 0x358   : > { %v1978_v9 = vpop.eup %1977  ;;  %1722 = vst [vmem:[%s2217_s18] sm:$0xff] %v1721_v5   ;;  %v1442_v11 = vadd.f32 %v1682_v58, %v1427_v7  ;;  %v1414_v12 = vmul.f32 %v1976_v6, %v2396_v16 }
 0x359   : > { %v1415_v13 = vmul.f32 %v1978_v9, %v2400_v20  ;;  %v1443_v8 = vadd.f32 %v1682_v58, %v1428_v0 }
 0x35a   : > { %v1726_v15 = vpack.c.bf16 %v1442_v11, %v1441_v10  ;;  %v1429_v17 = vmul.f32 %v1681_v51, %v1414_v12 }
 0x35b   : > { %v1980_v18 = vpop.eup %1979  ;;  %v1430_v48 = vmul.f32 %v1681_v51, %v1415_v13 }
 0x35c   : > { %1741 = vst [vmem:[%s2217_s18 + $0x8] sm:$0xff] %v1726_v15   ;;  %v1444_v14 = vadd.f32 %v1682_v58, %v1429_v17  ;;  %v1416_v49 = vmul.f32 %v1980_v18, %v2404_v52 }
 0x35d   : > { %v1445_v22 = vadd.f32 %v1682_v58, %v1430_v48 }
 0x35e   : > { %v1731_v19 = vpack.c.bf16 %v1444_v14, %v1443_v8  ;;  %v1431_v21 = vmul.f32 %v1681_v51, %v1416_v49 }
 0x360   : > { %1742 = vst [vmem:[%s2217_s18 + $0x10] sm:$0xff] %v1731_v19   ;;  %v1446_v53 = vadd.f32 %v1682_v58, %v1431_v21 }
 0x362   : > { %v1736_v23 = vpack.c.bf16 %v1446_v53, %v1445_v22 }
 0x364   : > { %1743 = vst [vmem:[%s2217_s18 + $0x18] sm:$0xff] %v1736_v23  }
 0x365 PF: > { %s17_s30 = sadd.s32 1, %s2035_s30   ;;  %s2459_s24 = smov %s2015_s25 }
 0x366   : > { %p14_p1 = scmp.ge.s32.totalorder %s17_s30, 10   ;;  %s2460_s25 = smov %s2127_s12 }
 0x367   : > { %s2461_s26 = smov %s2027_s28  ;;  %s2462_s27 = smov %s2031_s29 }
 0x368   : > { %s2463_s28 = smov %s2466_s8  ;;  %s2464_s29 = smov %s2470_s9 }
 0x369   :  { %16 = sbr.rel (!%p14_p1) target bundleno = 6 (0x6), region = 123 }

// kernel: microdit_forward.30
= control target key start
LH: loop header
LB: loop body
LE: loop exit
PB: predicated region body
PF: predicated region fallthrough
CT: control target
= control target key end

     0   :  { %s1509_s24 = smov 0   ;;  %s1511_s25 = smov 0   ;;  %s1765_s0 = inlined_call_operand.vmem [shape: bf16[128,128], index: 0, kind: input, shape index: {}]   ;;  %s1766_s1 = inlined_call_operand.vmem [shape: bf16[128,256], index: 1, kind: input, shape index: {}]   ;;  %s1767_s2 = inlined_call_operand.vmem [shape: f32[1,256], index: 2, kind: input, shape index: {}]   ;;  %s1768_s3 = inlined_call_operand.vmem [shape: bf16[256,128], index: 3, kind: input, shape index: {}]   ;;  %s1769_s4 = inlined_call_operand.vmem [shape: f32[1,128], index: 4, kind: input, shape index: {}]   ;;  %s1770_s5 = inlined_call_operand.vmem [shape: f32[1,128], index: 5, kind: input, shape index: {}]   ;;  %s1771_s6 = inlined_call_operand.vmem [shape: f32[1,128], index: 6, kind: input, shape index: {}]   ;;  %s1772_s7 = inlined_call_operand.vmem [shape: bf16[128,128], index: 7, kind: output, shape index: {}]  }
   0x1   :  { %s1513_s26 = smov 0  }
   0x2 LB: > { %s29_s27 = sadd.s32 1, %s1462_s25  ;;  %p1199_p0 = scmp.ge.s32.totalorder %s1466_s26, 1  ;;  %s1466_s26 = sphi %s1513_s26, %s17_s26   ;;  %s1462_s25 = sphi %s1511_s25, %s1774_s25   ;;  %s1458_s24 = sphi %s1509_s24, %s1773_s24  }
   0x3   : > { %p31_p1 = scmp.ge.s32.totalorder %s29_s27, 2  ;;  %p282_p2 = scmp.lt.s32.totalorder %s1466_s26, 3 }
   0x5   : > { %s1776_s27 = smov (%p31_p1, %s29_s27), 0  ;;  %p283_p3 = pnand %p1199_p0, %p282_p2 }
   0x6   : > { %s1200_s30 = sshll.u32 (!%p283_p3), %s1458_s24, 3 }
   0x7   : > { %286 = sbr.rel (%p283_p3) target bundleno = 818 (0x332), region = 48  ;;  %p329_p4 = scmp.lt.s32.totalorder (!%p283_p3), %s1200_s30, 15 }
   0xc   : > { %v1368_v0 = vld [vmem:[%s1766_s1 + $0x74] ss:$8 sps:$4 sm:$0xff]   ;;  %v1370_v1 = vld [vmem:[%s1766_s1 + $0x70] ss:$8 sps:$4 sm:$0xff]   ;;  %v1468_v2 = vmov 0   ;;  %s1778_s30 = smov (!%p329_p4, %s1200_s30), 15  ;;  %v407_v37 = vlaneseq }
   0xd   : > { %553 = vmatprep.mubr.bf16.mxu0 %v1468_v2  ;;  %521 = vmatprep.subr.bf16.mxu0 %v1368_v0  ;;  %v1371_v3 = vld [vmem:[%s1766_s1 + $0x64] ss:$8 sps:$4 sm:$0xff]   ;;  %v1373_v4 = vld [vmem:[%s1766_s1 + $0x60] ss:$8 sps:$4 sm:$0xff]   ;;  %v1374_v5 = vld [vmem:[%s1766_s1 + $0x54] ss:$8 sps:$4 sm:$0xff]  }
   0xe   : > { %522 = vmatpush1.bf16.msra.mxu0 %v1370_v1  ;;  %s1201_s16 = sshll.u32 %s1778_s30, 2  ;;  %v1376_v6 = vld [vmem:[%s1766_s1 + $0x50] ss:$8 sps:$4 sm:$0xff]   ;;  %v1377_v7 = vld [vmem:[%s1766_s1 + $0x44] ss:$8 sps:$4 sm:$0xff]   ;;  %v408_v38 = vshrl.u32 %v407_v37, 7 }
   0xf   : > { %523 = vmatprep.subr.bf16.mxu0 %v1371_v3  ;;  %s1556_s23 = scalar_lea.vmem %s1765_s0, %s1201_s16  ;;  %v1379_v8 = vld [vmem:[%s1766_s1 + $0x40] ss:$8 sps:$4 sm:$0xff]   ;;  %v1380_v9 = vld [vmem:[%s1766_s1 + $0x34] ss:$8 sps:$4 sm:$0xff]   ;;  %v1382_v10 = vld [vmem:[%s1766_s1 + $0x30] ss:$8 sps:$4 sm:$0xff]   ;;  %s1745_s13 = scalar_lea.vmem %s1772_s7, %s1201_s16 }
  0x10   : > { %v1383_v11 = vld [vmem:[%s1766_s1 + $0x24] ss:$8 sps:$4 sm:$0xff]   ;;  %v1385_v12 = vld [vmem:[%s1766_s1 + $0x20] ss:$8 sps:$4 sm:$0xff]   ;;  %v1386_v13 = vld [vmem:[%s1766_s1 + $0x14] ss:$8 sps:$4 sm:$0xff]  }
  0x11   : > { %v1388_v14 = vld [vmem:[%s1766_s1 + $0x10] ss:$8 sps:$4 sm:$0xff]   ;;  %v1389_v15 = vld [vmem:[%s1766_s1 + $0x4] ss:$8 sps:$4 sm:$0xff]   ;;  %v1391_v16 = vld [vmem:[%s1766_s1] ss:$8 sps:$4 sm:$0xff]  }
  0x12   : > { %524 = vmatpush1.bf16.msra.mxu0 %v1373_v4  ;;  %v1392_v17 = vld [vmem:[%s1556_s23] sm:$0xff]   ;;  %v1393_v18 = vld [vmem:[%s1556_s23 + $0x8] sm:$0xff]   ;;  %v1394_v19 = vld [vmem:[%s1556_s23 + $0x10] sm:$0xff]   ;;  %v409_v39 = vsub.s32 0, %v408_v38  ;;  %v413_v41 = vsub.s32 1, %v408_v38 }
  0x13   : > { %525 = vmatprep.subr.bf16.mxu0 %v1374_v5  ;;  %v1395_v20 = vld [vmem:[%s1556_s23 + $0x18] sm:$0xff]   ;;  %v1398_v23 = vld [vmem:[%s1768_s3 + $0x70] sm:$0xff]   ;;  %v1400_v25 = vld [vmem:[%s1768_s3 + $0x68] sm:$0xff]  }
  0x14   : > { %v1396_v21 = vld [vmem:[%s1768_s3 + $0x78] sm:$0xff]   ;;  %v1399_v24 = vld [vmem:[%s1768_s3 + $0x30] sm:$0xff]   ;;  %v1401_v26 = vld [vmem:[%s1768_s3 + $0x28] sm:$0xff]  }
  0x15   : > { %v1397_v22 = vld [vmem:[%s1768_s3 + $0x38] sm:$0xff]   ;;  %1303 = vmatprep.subr.bf16.mxu1 %v1396_v21  ;;  %v1402_v27 = vld [vmem:[%s1768_s3 + $0x60] sm:$0xff]   ;;  %v1406_v31 = vld [vmem:[%s1768_s3 + $0x50] sm:$0xff]  }
  0x16   : > { %526 = vmatpush1.bf16.msra.mxu0 %v1376_v6  ;;  %1304 = vmatpush3.bf16.msra.mxu1 %v1397_v22  ;;  %v1403_v28 = vld [vmem:[%s1768_s3 + $0x20] sm:$0xff]   ;;  %v1404_v29 = vld [vmem:[%s1768_s3 + $0x58] sm:$0xff]   ;;  %v1407_v32 = vld [vmem:[%s1768_s3 + $0x10] sm:$0xff]  }
  0x17   : > { %527 = vmatprep.subr.bf16.mxu0 %v1377_v7  ;;  %1305 = vmatprep.subr.bf16.mxu1 %v1398_v23  ;;  %v1405_v30 = vld [vmem:[%s1768_s3 + $0x18] sm:$0xff]   ;;  %v1408_v33 = vld [vmem:[%s1768_s3 + $0x48] sm:$0xff]   ;;  %v1410_v35 = vld [vmem:[%s1768_s3 + $0x40] sm:$0xff]  }
  0x18   : > { %v1409_v34 = vld [vmem:[%s1768_s3 + $0x8] sm:$0xff]   ;;  %v1411_v36 = vld [vmem:[%s1768_s3] sm:$0xff]  }
  0x19   : > { %v405_v40 = vld [vmem:[%s1767_s2] sm:$0x3] }
  0x1a   : > { %528 = vmatpush1.bf16.msra.mxu0 %v1379_v8  ;;  %1306 = vmatpush3.bf16.msra.mxu1 %v1399_v24  ;;  %v1640_v43 = vrot.slane %v405_v40, %v409_v39  ;;  %v1642_v45 = vrot.slane %v405_v40, %v413_v41 }
  0x1b   : > { %529 = vmatprep.subr.bf16.mxu0 %v1380_v9  ;;  %1307 = vmatprep.subr.bf16.mxu1 %v1400_v25 }
  0x1e   : > { %530 = vmatpush1.bf16.msra.mxu0 %v1382_v10  ;;  %1308 = vmatpush3.bf16.msra.mxu1 %v1401_v26 }
  0x1f   : > { %531 = vmatprep.subr.bf16.mxu0 %v1383_v11  ;;  %1309 = vmatprep.subr.bf16.mxu1 %v1402_v27 }
  0x22   : > { %532 = vmatpush1.bf16.msra.mxu0 %v1385_v12  ;;  %1310 = vmatpush3.bf16.msra.mxu1 %v1403_v28 }
  0x23   : > { %533 = vmatprep.subr.bf16.mxu0 %v1386_v13  ;;  %1311 = vmatprep.subr.bf16.mxu1 %v1404_v29 }
  0x26   : > { %534 = vmatpush1.bf16.msra.mxu0 %v1388_v14  ;;  %1312 = vmatpush3.bf16.msra.mxu1 %v1405_v30 }
  0x27   : > { %535 = vmatprep.subr.bf16.mxu0 %v1389_v15  ;;  %1313 = vmatprep.subr.bf16.mxu1 %v1406_v31 }
  0x2a   : > { %536 = vmatpush1.bf16.msra.mxu0 %v1391_v16  ;;  %1314 = vmatpush3.bf16.msra.mxu1 %v1407_v32 }
  0x2b   : > { %1315 = vmatprep.subr.bf16.mxu1 %v1408_v33 }
  0x2d   : > { %554 = vmatmul.mubr.bf16.vlgmr.msra.gmra.mxu0 %v1392_v17 }
  0x2e   : > { %563 = vmatprep.mubr.bf16.mxu0 %v1468_v2  ;;  %1316 = vmatpush3.bf16.msra.mxu1 %v1409_v34 }
  0x2f   : > { %1317 = vmatprep.subr.bf16.mxu1 %v1410_v35 }
  0x32   : > { %1318 = vmatpush3.bf16.msra.mxu1 %v1411_v36 }
  0x35   : > { %564 = vmatmul.mubr.bf16.gmra.mxu0 %v1393_v18 }
  0x36   : > { %573 = vmatprep.mubr.bf16.mxu0 %v1468_v2 }
  0x3d   : > { %574 = vmatmul.mubr.bf16.gmra.mxu0 %v1394_v19 }
  0x3e   : > { %583 = vmatprep.mubr.bf16.mxu0 %v1468_v2 }
  0x45   : > { %584 = vmatmul.mubr.bf16.gmra.mxu0 %v1395_v20 }
  0xed   : > { %v555_v42 = vpop.f32.mrf.mxu0 }
  0xee   : > { %v556_v47 = vadd.f32 %v555_v42, %v1640_v43 }
  0xef   : > { %v557_v44 = vpop.f32.mrf.mxu0 }
  0xf0   : > { %v558_v50 = vadd.f32 %v557_v44, %v1642_v45 }
  0xf1   : > { %v559_v46 = vpop.f32.mrf.mxu0 }
  0xf2   : > { %v560_v48 = vadd.f32 %v559_v46, %v1640_v43 }
  0xf3   : > { %v561_v49 = vpop.f32.mrf.mxu0 }
  0xf4   : > { %v1647_v51 = vpack.c.bf16 %v560_v48, %v556_v47  ;;  %v562_v52 = vadd.f32 %v561_v49, %v1642_v45 }
  0xf5   : > { %v565_v53 = vpop.f32.mrf.mxu0 }
  0xf6   : > { %v602_v54 = vmul.bf16 %v1647_v51, %v1647_v51  ;;  %v1652_v55 = vpack.c.bf16 %v562_v52, %v558_v50  ;;  %v566_v61 = vadd.f32 %v565_v53, %v1640_v43 }
  0xf7   : > { %v567_v56 = vpop.f32.mrf.mxu0 }
  0xf8   : > { %v610_v57 = vmul.bf16 %v602_v54, %v1647_v51  ;;  %v603_v58 = vmul.bf16 %v1652_v55, %v1652_v55  ;;  %v568_v0 = vadd.f32 %v567_v56, %v1642_v45 }
  0xf9   : > { %v569_v59 = vpop.f32.mrf.mxu0 }
  0xfa   : > { %v618_v60 = vmul.bf16 1027030327, %v610_v57  ;;  %v570_v62 = vadd.f32 %v569_v59, %v1640_v43  ;;  %v611_v63 = vmul.bf16 %v603_v58, %v1652_v55 }
  0xfb   : > { %v571_v1 = vpop.f32.mrf.mxu0 }
  0xfc   : > { %v626_v2 = vadd.bf16 %v618_v60, %v1647_v51  ;;  %v1662_v3 = vpack.c.bf16 %v570_v62, %v566_v61  ;;  %v572_v4 = vadd.f32 %v571_v1, %v1642_v45  ;;  %v619_v5 = vmul.bf16 1027030327, %v611_v63 }
  0xfd   : > { %v575_v6 = vpop.f32.mrf.mxu0 }
  0xfe   : > { %v604_v7 = vmul.bf16 %v1662_v3, %v1662_v3  ;;  %v1667_v8 = vpack.c.bf16 %v572_v4, %v568_v0  ;;  %v627_v9 = vadd.bf16 %v619_v5, %v1652_v55  ;;  %v634_v11 = vmul.bf16 1061961548, %v626_v2 }
  0xff   : > { %v577_v10 = vpop.f32.mrf.mxu0  ;;  %v576_v15 = vadd.f32 %v575_v6, %v1640_v43 }
 0x100   : > { %v612_v12 = vmul.bf16 %v604_v7, %v1662_v3  ;;  %v605_v13 = vmul.bf16 %v1667_v8, %v1667_v8  ;;  %v635_v14 = vmul.bf16 1061961548, %v627_v9  ;;  %1412 = vtanh.bf16 %v634_v11 }
 0x101   : > { %v579_v16 = vpop.f32.mrf.mxu0  ;;  %v578_v20 = vadd.f32 %v577_v10, %v1642_v45 }
 0x102   : > { %v620_v17 = vmul.bf16 1027030327, %v612_v12  ;;  %v613_v18 = vmul.bf16 %v605_v13, %v1667_v8  ;;  %v580_v19 = vadd.f32 %v579_v16, %v1640_v43  ;;  %1414 = vtanh.bf16 %v635_v14 }
 0x103   : > { %v581_v21 = vpop.f32.mrf.mxu0 }
 0x104   : > { %v628_v22 = vadd.bf16 %v620_v17, %v1662_v3  ;;  %v621_v23 = vmul.bf16 1027030327, %v613_v18  ;;  %v1678_v24 = vpack.c.bf16 %v580_v19, %v576_v15  ;;  %v582_v25 = vadd.f32 %v581_v21, %v1642_v45 }
 0x105   : > { %v585_v26 = vpop.f32.mrf.mxu0 }
 0x106   : > { %v629_v27 = vadd.bf16 %v621_v23, %v1667_v8  ;;  %v606_v28 = vmul.bf16 %v1678_v24, %v1678_v24  ;;  %v1684_v29 = vpack.c.bf16 %v582_v25, %v578_v20  ;;  %v636_v31 = vmul.bf16 1061961548, %v628_v22 }
 0x107   : > { %v587_v30 = vpop.f32.mrf.mxu0  ;;  %v586_v35 = vadd.f32 %v585_v26, %v1640_v43 }
 0x108   : > { %v614_v32 = vmul.bf16 %v606_v28, %v1678_v24  ;;  %v607_v33 = vmul.bf16 %v1684_v29, %v1684_v29  ;;  %v637_v34 = vmul.bf16 1061961548, %v629_v27  ;;  %1416 = vtanh.bf16 %v636_v31  ;;  %v1262_v31 = vld [vmem:[%s1556_s23] sm:$0xff]  }
 0x109   : > { %v589_v36 = vpop.f32.mrf.mxu0  ;;  %v588_v40 = vadd.f32 %v587_v30, %v1642_v45 }
 0x10a   : > { %v622_v37 = vmul.bf16 1027030327, %v614_v32  ;;  %v615_v38 = vmul.bf16 %v607_v33, %v1684_v29  ;;  %v590_v39 = vadd.f32 %v589_v36, %v1640_v43  ;;  %1418 = vtanh.bf16 %v637_v34 }
 0x10b   : > { %v591_v41 = vpop.f32.mrf.mxu0  ;;  %v1263_v33 = vunpack.c.l.bf16 %v1262_v31 }
 0x10c   : > { %v630_v42 = vadd.bf16 %v622_v37, %v1678_v24  ;;  %v623_v44 = vmul.bf16 1027030327, %v615_v38  ;;  %v600_v46 = vpack.c.bf16 %v590_v39, %v586_v35  ;;  %v592_v47 = vadd.f32 %v591_v41, %v1642_v45  ;;  %v1297_v41 = vld [vmem:[%s1556_s23 + $0x8] sm:$0xff]  }
 0x10d   : > { %v1264_v39 = vunpack.c.h.bf16 %v1262_v31 }
 0x10e   : > { %v631_v48 = vadd.bf16 %v623_v44, %v1684_v29  ;;  %v608_v49 = vmul.bf16 %v600_v46, %v600_v46  ;;  %v601_v50 = vpack.c.bf16 %v592_v47, %v588_v40  ;;  %v638_v52 = vmul.bf16 1061961548, %v630_v42  ;;  %v1413_v53 = vpop.eup %1412 }
 0x10f   : > { %v650_v43 = vadd.bf16 1065369472, %v1413_v53 }
 0x110   : > { %v1415_v54 = vpop.eup %1414  ;;  %v616_v56 = vmul.bf16 %v608_v49, %v600_v46  ;;  %v609_v57 = vmul.bf16 %v601_v50, %v601_v50  ;;  %v639_v58 = vmul.bf16 1061961548, %v631_v48  ;;  %1420 = vtanh.bf16 %v638_v52 }
 0x111   : > { %v651_v59 = vadd.bf16 1065369472, %v1415_v54  ;;  %v658_v62 = vmul.bf16 1056980736, %v650_v43  ;;  %v1267_v48 = vunpack.c.l.bf16 %v1297_v41  ;;  %v1298_v43 = vld [vmem:[%s1556_s23 + $0x10] sm:$0xff]  }
 0x112   : > { %v624_v60 = vmul.bf16 1027030327, %v616_v56  ;;  %v617_v61 = vmul.bf16 %v609_v57, %v601_v50  ;;  %1422 = vtanh.bf16 %v639_v58  ;;  %v1268_v56 = vunpack.c.h.bf16 %v1297_v41 }
 0x113   : > { %v659_v63 = vmul.bf16 1056980736, %v651_v59  ;;  %v666_v4 = vmul.bf16 %v658_v62, %v1647_v51  ;;  %v1271_v62 = vunpack.c.l.bf16 %v1298_v43 }
 0x114   : > { %v632_v0 = vadd.bf16 %v624_v60, %v600_v46  ;;  %v625_v45 = vmul.bf16 1027030327, %v617_v61 }
 0x115   : > { %v667_v1 = vmul.bf16 %v659_v63, %v1652_v55 }
 0x116   : > { %v633_v2 = vadd.bf16 %v625_v45, %v601_v50  ;;  %v640_v5 = vmul.bf16 1061961548, %v632_v0  ;;  %v1417_v6 = vpop.eup %1416 }
 0x117   : > { %842 = vmatprep.mubr.bf16.mxu1 %v667_v1  ;;  %v652_v9 = vadd.bf16 1065369472, %v1417_v6  ;;  %v1299_v6 = vld [vmem:[%s1556_s23 + $0x18] sm:$0xff]  }
 0x118   : > { %v1419_v7 = vpop.eup %1418  ;;  %843 = vmatmul.mubr.bf16.vlgmr.msra.gmra.mxu1 %v666_v4  ;;  %v641_v10 = vmul.bf16 1061961548, %v633_v2  ;;  %1424 = vtanh.bf16 %v640_v5  ;;  %v1272_v4 = vunpack.c.h.bf16 %v1298_v43 }
 0x119   : > { %v653_v11 = vadd.bf16 1065369472, %v1419_v7  ;;  %v660_v12 = vmul.bf16 1056980736, %v652_v9 }
 0x11a   : > { %1426 = vtanh.bf16 %v641_v10 }
 0x11b   : > { %v661_v13 = vmul.bf16 1056980736, %v653_v11  ;;  %v668_v15 = vmul.bf16 %v660_v12, %v1662_v3  ;;  %v1275_v12 = vunpack.c.l.bf16 %v1299_v6 }
 0x11d   : > { %v669_v14 = vmul.bf16 %v661_v13, %v1667_v8 }
 0x11e   : > { %v1421_v55 = vpop.eup %1420 }
 0x11f   : > { %850 = vmatprep.mubr.bf16.mxu1 %v669_v14  ;;  %v654_v51 = vadd.bf16 1065369472, %v1421_v55 }
 0x120   : > { %v1423_v16 = vpop.eup %1422  ;;  %851 = vmatmul.mubr.bf16.gmra.mxu1 %v668_v15 }
 0x121   : > { %v655_v17 = vadd.bf16 1065369472, %v1423_v16  ;;  %v662_v18 = vmul.bf16 1056980736, %v654_v51  ;;  %v1276_v51 = vunpack.c.h.bf16 %v1299_v6 }
 0x123   : > { %v663_v19 = vmul.bf16 1056980736, %v655_v17  ;;  %v670_v22 = vmul.bf16 %v662_v18, %v1678_v24 }
 0x125   : > { %v671_v20 = vmul.bf16 %v663_v19, %v1684_v29  ;;  %v1204_v29 = vld [vmem:[%s1769_s4] ss:$0 sm:$0xff] }
 0x126   : > { %v1425_v21 = vpop.eup %1424 }
 0x127   : > { %858 = vmatprep.mubr.bf16.mxu1 %v671_v20  ;;  %v656_v23 = vadd.bf16 1065369472, %v1425_v21 }
 0x128   : > { %v1427_v25 = vpop.eup %1426  ;;  %859 = vmatmul.mubr.bf16.gmra.mxu1 %v670_v22 }
 0x129   : > { %v657_v8 = vadd.bf16 1065369472, %v1427_v25  ;;  %v664_v3 = vmul.bf16 1056980736, %v656_v23 }
 0x12b   : > { %v665_v26 = vmul.bf16 1056980736, %v657_v8  ;;  %v672_v28 = vmul.bf16 %v664_v3, %v600_v46 }
 0x12d   : > { %v673_v27 = vmul.bf16 %v665_v26, %v601_v50 }
 0x12f   : > { %866 = vmatprep.mubr.bf16.mxu1 %v673_v27 }
 0x130   : > { %867 = vmatmul.mubr.bf16.gmra.mxu1 %v672_v28 }
 0x1d8   : > { %v1319_v30 = vpop.f32.mrf.mxu1 }
 0x1da   : > { %v1320_v32 = vpop.f32.mrf.mxu1 }
 0x1db   : > { %v1321_v24 = vadd.f32 %v1320_v32, %v1319_v30 }
 0x1dc   : > { %v1322_v34 = vpop.f32.mrf.mxu1 }
 0x1dd   : > { %v875_v35 = vadd.f32 %v1321_v24, %v1204_v29 }
 0x1de   : > { %v1323_v36 = vpop.f32.mrf.mxu1 }
 0x1df   : > { %v1324_v37 = vadd.f32 %v1323_v36, %v1322_v34  ;;  %v918_v38 = vadd.f32 %v1263_v33, %v875_v35 }
 0x1e0   : > { %v1325_v40 = vpop.f32.mrf.mxu1 }
 0x1e1   : > { %v876_v42 = vadd.f32 %v1324_v37, %v1204_v29  ;;  %926 = vadd.xlane.f32.xlu0 %v918_v38 }
 0x1e2   : > { %v1326_v44 = vpop.f32.mrf.mxu1 }
 0x1e3   : > { %v1327_v46 = vadd.f32 %v1326_v44, %v1325_v40  ;;  %v919_v47 = vadd.f32 %v1264_v39, %v876_v42 }
 0x1e4   : > { %v1328_v49 = vpop.f32.mrf.mxu1 }
 0x1e5   : > { %v877_v50 = vadd.f32 %v1327_v46, %v1204_v29  ;;  %928 = vadd.xlane.f32.xlu0 %v919_v47 }
 0x1e6   : > { %v1329_v52 = vpop.f32.mrf.mxu1 }
 0x1e7   : > { %v1330_v53 = vadd.f32 %v1329_v52, %v1328_v49  ;;  %v920_v54 = vadd.f32 %v1267_v48, %v877_v50 }
 0x1e8   : > { %v1331_v57 = vpop.f32.mrf.mxu1 }
 0x1e9   : > { %v878_v58 = vadd.f32 %v1330_v53, %v1204_v29  ;;  %930 = vadd.xlane.f32.xlu1 %v920_v54 }
 0x1ea   : > { %v1332_v59 = vpop.f32.mrf.mxu1 }
 0x1eb   : > { %v1333_v60 = vadd.f32 %v1332_v59, %v1331_v57  ;;  %v921_v61 = vadd.f32 %v1268_v56, %v878_v58 }
 0x1ec   : > { %v1334_v63 = vpop.f32.mrf.mxu1 }
 0x1ed   : > { %v879_v0 = vadd.f32 %v1333_v60, %v1204_v29  ;;  %932 = vadd.xlane.f32.xlu1 %v921_v61 }
 0x1ee   : > { %v1335_v45 = vpop.f32.mrf.mxu1 }
 0x1ef   : > { %v1336_v1 = vadd.f32 %v1335_v45, %v1334_v63  ;;  %v922_v2 = vadd.f32 %v1271_v62, %v879_v0 }
 0x1f0   : > { %v1337_v5 = vpop.f32.mrf.mxu1 }
 0x1f1   : > { %v880_v7 = vadd.f32 %v1336_v1, %v1204_v29  ;;  %934 = vadd.xlane.f32.xlu0 %v922_v2 }
 0x1f2   : > { %v1338_v9 = vpop.f32.mrf.mxu1 }
 0x1f3   : > { %v1339_v10 = vadd.f32 %v1338_v9, %v1337_v5  ;;  %v923_v11 = vadd.f32 %v1272_v4, %v880_v7  ;;  %v1241_v5 = vld [vmem:[%s1770_s5] ss:$0 sm:$0xff] }
 0x1f4   : > { %v1340_v13 = vpop.f32.mrf.mxu1 }
 0x1f5   : > { %v881_v14 = vadd.f32 %v1339_v10, %v1204_v29  ;;  %936 = vadd.xlane.f32.xlu1 %v923_v11 }
 0x1f6   : > { %v1341_v15 = vpop.f32.mrf.mxu1 }
 0x1f7   : > { %v1342_v55 = vadd.f32 %v1341_v15, %v1340_v13  ;;  %v924_v16 = vadd.f32 %v1275_v12, %v881_v14  ;;  %v1242_v13 = vld [vmem:[%s1771_s6] ss:$0 sm:$0xff] }
 0x1f9   : > { %v882_v17 = vadd.f32 %v1342_v55, %v1204_v29  ;;  %938 = vadd.xlane.f32.xlu0 %v924_v16 }
 0x1fb   : > { %v925_v18 = vadd.f32 %v1276_v51, %v882_v17 }
 0x1fd   : > { %940 = vadd.xlane.f32.xlu1 %v925_v18 }
 0x26a   : > { %v927_v19 = vpop.xlane.xlu0 %926 }
 0x26b   : > { %v943_v20 = vmul.f32 0.0078125, %v927_v19 }
 0x26d   : > { %v951_v21 = vsub.f32 %v918_v38, %v943_v20 }
 0x26e   : > { %v929_v22 = vpop.xlane.xlu0 %928 }
 0x26f   : > { %v944_v23 = vmul.f32 0.0078125, %v929_v22  ;;  %v959_v25 = vmul.f32 %v951_v21, %v951_v21 }
 0x271   : > { %v952_v8 = vsub.f32 %v919_v47, %v944_v23  ;;  %967 = vadd.xlane.f32.xlu0 %v959_v25 }
 0x272   : > { %v931_v3 = vpop.xlane.xlu1 %930 }
 0x273   : > { %v945_v26 = vmul.f32 0.0078125, %v931_v3  ;;  %v960_v27 = vmul.f32 %v952_v8, %v952_v8 }
 0x275   : > { %v1709_v28 = vsub.f32 %v920_v54, %v945_v26  ;;  %969 = vadd.xlane.f32.xlu1 %v960_v27 }
 0x276   : > { %v933_v30 = vpop.xlane.xlu1 %932 }
 0x277   : > { %v946_v31 = vmul.f32 0.0078125, %v933_v30  ;;  %v961_v29 = vmul.f32 %v1709_v28, %v1709_v28 }
 0x279   : > { %v1713_v32 = vsub.f32 %v921_v61, %v946_v31  ;;  %971 = vadd.xlane.f32.xlu0 %v961_v29 }
 0x27a   : > { %v935_v24 = vpop.xlane.xlu0 %934 }
 0x27b   : > { %v947_v33 = vmul.f32 0.0078125, %v935_v24  ;;  %v962_v34 = vmul.f32 %v1713_v32, %v1713_v32 }
 0x27d   : > { %v1717_v35 = vsub.f32 %v922_v2, %v947_v33  ;;  %973 = vadd.xlane.f32.xlu1 %v962_v34 }
 0x27e   : > { %v937_v36 = vpop.xlane.xlu1 %936 }
 0x27f   : > { %v948_v37 = vmul.f32 0.0078125, %v937_v36  ;;  %v963_v38 = vmul.f32 %v1717_v35, %v1717_v35 }
 0x281   : > { %v1721_v39 = vsub.f32 %v923_v11, %v948_v37  ;;  %975 = vadd.xlane.f32.xlu0 %v963_v38 }
 0x282   : > { %v939_v40 = vpop.xlane.xlu0 %938 }
 0x283   : > { %v949_v41 = vmul.f32 0.0078125, %v939_v40  ;;  %v964_v42 = vmul.f32 %v1721_v39, %v1721_v39 }
 0x285   : > { %v1725_v44 = vsub.f32 %v924_v16, %v949_v41  ;;  %977 = vadd.xlane.f32.xlu1 %v964_v42 }
 0x286   : > { %v941_v46 = vpop.xlane.xlu1 %940 }
 0x287   : > { %v950_v47 = vmul.f32 0.0078125, %v941_v46  ;;  %v965_v48 = vmul.f32 %v1725_v44, %v1725_v44 }
 0x289   : > { %v1729_v49 = vsub.f32 %v925_v18, %v950_v47  ;;  %979 = vadd.xlane.f32.xlu0 %v965_v48 }
 0x28b   : > { %v966_v50 = vmul.f32 %v1729_v49, %v1729_v49 }
 0x28d   : > { %981 = vadd.xlane.f32.xlu1 %v966_v50 }
 0x2fa   : > { %v968_v52 = vpop.xlane.xlu0 %967 }
 0x2fb   : > { %v983_v53 = vmul.f32 0.0078125, %v968_v52 }
 0x2fd   : > { %v991_v54 = vadd.f32 1e-05, %v983_v53 }
 0x2fe   : > { %v970_v56 = vpop.xlane.xlu1 %969 }
 0x2ff   : > { %1428 = vrsqrt.f32 %v991_v54  ;;  %v984_v57 = vmul.f32 0.0078125, %v970_v56 }
 0x301   : > { %v992_v43 = vadd.f32 1e-05, %v984_v57 }
 0x302   : > { %v972_v58 = vpop.xlane.xlu0 %971 }
 0x303   : > { %1430 = vrsqrt.f32 %v992_v43  ;;  %v985_v59 = vmul.f32 0.0078125, %v972_v58 }
 0x305   : > { %v993_v60 = vadd.f32 1e-05, %v985_v59 }
 0x306   : > { %v974_v61 = vpop.xlane.xlu1 %973 }
 0x307   : > { %1432 = vrsqrt.f32 %v993_v60  ;;  %v986_v62 = vmul.f32 0.0078125, %v974_v61 }
 0x309   : > { %v994_v63 = vadd.f32 1e-05, %v986_v62 }
 0x30a   : > { %v976_v0 = vpop.xlane.xlu0 %975 }
 0x30b   : > { %1434 = vrsqrt.f32 %v994_v63  ;;  %v987_v45 = vmul.f32 0.0078125, %v976_v0 }
 0x30c   : > { %v1429_v1 = vpop.eup %1428 }
 0x30d   : > { %v1007_v2 = vmul.f32 %v1429_v1, %v951_v21  ;;  %v995_v4 = vadd.f32 1e-05, %v987_v45 }
 0x30e   : > { %v978_v6 = vpop.xlane.xlu1 %977 }
 0x30f   : > { %1436 = vrsqrt.f32 %v995_v4  ;;  %v988_v7 = vmul.f32 0.0078125, %v978_v6  ;;  %v1022_v10 = vmul.f32 %v1241_v5, %v1007_v2 }
 0x310   : > { %v1431_v9 = vpop.eup %1430 }
 0x311   : > { %v1008_v11 = vmul.f32 %v1431_v9, %v952_v8  ;;  %v996_v12 = vadd.f32 1e-05, %v988_v7  ;;  %v1037_v51 = vadd.f32 %v1242_v13, %v1022_v10 }
 0x312   : > { %v980_v14 = vpop.xlane.xlu0 %979 }
 0x313   : > { %v1023_v15 = vmul.f32 %v1241_v5, %v1008_v11  ;;  %1438 = vrsqrt.f32 %v996_v12  ;;  %v989_v55 = vmul.f32 0.0078125, %v980_v14 }
 0x314   : > { %v1433_v16 = vpop.eup %1432 }
 0x315   : > { %v1038_v17 = vadd.f32 %v1242_v13, %v1023_v15  ;;  %v1009_v18 = vmul.f32 %v1433_v16, %v1709_v28  ;;  %v997_v19 = vadd.f32 1e-05, %v989_v55 }
 0x316   : > { %v982_v20 = vpop.xlane.xlu1 %981 }
 0x317   : > { %v1280_v21 = vpack.c.bf16 %v1038_v17, %v1037_v51  ;;  %1440 = vrsqrt.f32 %v997_v19  ;;  %v990_v22 = vmul.f32 0.0078125, %v982_v20  ;;  %v1024_v25 = vmul.f32 %v1241_v5, %v1009_v18 }
 0x318   : > { %v1435_v23 = vpop.eup %1434 }
 0x319   : > { %1281 = vst [vmem:[%s1745_s13] sm:$0xff] %v1280_v21   ;;  %v1010_v8 = vmul.f32 %v1435_v23, %v1713_v32  ;;  %v998_v3 = vadd.f32 1e-05, %v990_v22  ;;  %v1039_v28 = vadd.f32 %v1242_v13, %v1024_v25 }
 0x31b   : > { %v1025_v26 = vmul.f32 %v1241_v5, %v1010_v8  ;;  %1442 = vrsqrt.f32 %v998_v3 }
 0x31c   : > { %v1437_v27 = vpop.eup %1436 }
 0x31d   : > { %v1040_v30 = vadd.f32 %v1242_v13, %v1025_v26  ;;  %v1011_v31 = vmul.f32 %v1437_v27, %v1717_v35 }
 0x31f   : > { %v1285_v29 = vpack.c.bf16 %v1040_v30, %v1039_v28  ;;  %v1026_v33 = vmul.f32 %v1241_v5, %v1011_v31 }
 0x320   : > { %v1439_v24 = vpop.eup %1438 }
 0x321   : > { %1300 = vst [vmem:[%s1745_s13 + $0x8] sm:$0xff] %v1285_v29   ;;  %v1012_v34 = vmul.f32 %v1439_v24, %v1721_v39  ;;  %v1041_v38 = vadd.f32 %v1242_v13, %v1026_v33 }
 0x323   : > { %v1027_v36 = vmul.f32 %v1241_v5, %v1012_v34 }
 0x324   : > { %v1441_v37 = vpop.eup %1440 }
 0x325   : > { %v1042_v32 = vadd.f32 %v1242_v13, %v1027_v36  ;;  %v1013_v40 = vmul.f32 %v1441_v37, %v1725_v44 }
 0x327   : > { %v1290_v41 = vpack.c.bf16 %v1042_v32, %v1041_v38  ;;  %v1028_v46 = vmul.f32 %v1241_v5, %v1013_v40 }
 0x328   : > { %v1443_v42 = vpop.eup %1442 }
 0x329   : > { %1301 = vst [vmem:[%s1745_s13 + $0x10] sm:$0xff] %v1290_v41   ;;  %v1014_v47 = vmul.f32 %v1443_v42, %v1729_v49  ;;  %v1043_v48 = vadd.f32 %v1242_v13, %v1028_v46 }
 0x32b   : > { %v1029_v35 = vmul.f32 %v1241_v5, %v1014_v47 }
 0x32d   : > { %v1044_v50 = vadd.f32 %v1242_v13, %v1029_v35 }
 0x32f   : > { %v1295_v52 = vpack.c.bf16 %v1044_v50, %v1043_v48 }
 0x331   : > { %1302 = vst [vmem:[%s1745_s13 + $0x18] sm:$0xff] %v1295_v52  }
 0x332 PF: > { %s17_s26 = sadd.s32 1, %s1466_s26   ;;  %s1773_s24 = smov %s1462_s25 }
 0x333   : > { %p14_p5 = scmp.ge.s32.totalorder %s17_s26, 4   ;;  %s1774_s25 = smov %s1776_s27 }
 0x335   :  { %16 = sbr.rel (!%p14_p5) target bundleno = 2 (0x2), region = 95 }

</bundles_post_ra>
